<compile_context>
chip_gen: v7x
topology: tpu7x:2x2x1
jax: 0.10.0
libtpu: 0.0.40
codegen_flags: <defaults>
</compile_context>

<pallas_src>
import functools

import numpy as np
import jax
import jax.numpy as jnp
from jax import lax
from jax.experimental import pallas as pl
from jax.experimental.pallas import tpu as pltpu


# (sh, qh) = divmod(ph + dh, 2) for ph in {0,1}, dh in {-1,0,1}: every tap of a
# 3x3 'same' conv on the fine (upsampled) grid reads one of these 4
# (coarse shift, source parity) combinations per spatial axis.
_TAPS = ((-1, 1), (0, 0), (0, 1), (1, 0))


def _tap_selector():
    """sel[t, p, k] = 1 iff tap t feeds fine-grid output parity p via kernel row k (= dh+1)."""
    sel = np.zeros((4, 2, 3), np.float32)
    for t, (sh, qh) in enumerate(_TAPS):
        for p in range(2):
            dh = 2 * sh + qh - p
            if -1 <= dh <= 1:
                sel[t, p, dh + 1] = 1.0
    return sel


# ----------------------------------------------------------------------------
# Shared in-kernel helpers
# ----------------------------------------------------------------------------
def _zero_halo(q_scr, *, H, W, C):
    """Zero only the 1-coarse-pixel halo of the parity buffers.

    The interior [1:H+1, C:C+W*C] is fully overwritten every grid step, so the
    full-buffer zeroing of the previous version is unnecessary.
    """
    S2 = q_scr.shape[1]
    WC2 = (W + 2) * C
    zrow = jnp.zeros((S2, 1, WC2), q_scr.dtype)
    zcol = jnp.zeros((S2, H + 2, C), q_scr.dtype)
    for p in range(4):
        q_scr[p, :, 0:1, :] = zrow
        q_scr[p, :, H + 1:H + 2, :] = zrow
        q_scr[p, :, :, 0:C] = zcol
        q_scr[p, :, :, (W + 1) * C:(W + 2) * C] = zcol


def _conv_core(q_scr, w_ref, b_ref, a_ref, *, H, W, C):
    """3x3 'same' conv on the upsampled grid + PReLU.

    The K = 16*W*C im2col is split into 4 accumulated K-chunks (one per row
    tap).  Each chunk LHS is an in-register concatenation of 4 shifted windows
    of the (zero-padded) parity buffers, cast to bf16 for the MXU; no explicit
    im2col scratch buffer is materialized and K per matmul stays 4*W*C.
    Output columns are ordered (ph, pw, w, cout) -> 4*W*C lanes.
    """
    WC = W * C
    M4 = 4 * WC
    S2 = q_scr.shape[1]
    acc = jnp.zeros((S2 * H, M4), jnp.float32)
    for g, (sh, qh) in enumerate(_TAPS):       # th outer: matches weight assembly
        cols = []
        for (sw, qw) in _TAPS:                 # tw inner
            q = qh * 2 + qw
            cols.append(q_scr[q, :, 1 + sh:1 + sh + H,
                              (1 + sw) * C:(1 + sw) * C + WC])
        lhs = jnp.concatenate(cols, axis=-1).reshape(S2 * H, M4)
        acc = acc + jnp.dot(lhs.astype(jnp.bfloat16),
                            w_ref[g * M4:(g + 1) * M4, :],
                            preferred_element_type=jnp.float32)
    y = acc + b_ref[...]
    a = a_ref[0]
    return jnp.where(y > 0, y, a * y)          # PReLU, single shared parameter


def _bn_partials(y):
    """(2, M4) per-block partial sums: [sum; sum of squares] -- one store."""
    return jnp.concatenate([jnp.sum(y, axis=0, keepdims=True),
                            jnp.sum(y * y, axis=0, keepdims=True)], axis=0)


# ----------------------------------------------------------------------------
# Kernel 1: ConvTranspose3d(k=2,s=2) + Conv#1(3x3 'same') + PReLU#1 + BN#1 stats
# ----------------------------------------------------------------------------
def _upconv1_kernel(x_ref, wct_ref, bct_ref, w1_ref, b1_ref, a1_ref,
                    y_ref, st_ref, q_scr, *, H, W, C):
    S = x_ref.shape[0]
    WC = W * C
    _zero_halo(q_scr, H=H, W=W, C=C)
    # ConvTranspose3d as one matmul; output columns ordered (pd, ph, pw, w, cout).
    xm = x_ref[...].reshape(S * H, x_ref.shape[2])
    y8 = jnp.dot(xm.astype(jnp.bfloat16), wct_ref[...],
                 preferred_element_type=jnp.float32) + bct_ref[...]
    # Scatter the 8 parity pieces into the halo-padded parity buffers.
    for pd in range(2):
        for ph in range(2):
            for pw in range(2):
                p8 = (pd * 2 + ph) * 2 + pw
                piece = y8[:, p8 * WC:(p8 + 1) * WC].reshape(S, H, WC)
                q_scr[ph * 2 + pw, pd * S:(pd + 1) * S, 1:H + 1, C:C + WC] = piece
    y1 = _conv_core(q_scr, w1_ref, b1_ref, a1_ref, H=H, W=W, C=C)
    st_ref[...] = _bn_partials(y1)[None]                 # single full-block store
    y_ref[...] = y1.reshape(2 * S, H, 4 * WC).astype(y_ref.dtype)   # bf16, lane-dense


# ----------------------------------------------------------------------------
# Kernel 2: BN#1 (apply, batch stats) + Conv#2(3x3 'same') + PReLU#2 + BN#2 stats
# ----------------------------------------------------------------------------
def _bnconv2_kernel(x_ref, sc_ref, sf_ref, w2_ref, b2_ref, a2_ref,
                    y_ref, st_ref, q_scr, *, H, W, C):
    WC = W * C
    _zero_halo(q_scr, H=H, W=W, C=C)
    xn = x_ref[...].astype(jnp.float32) * sc_ref[...] + sf_ref[...]   # BN#1 folded
    for p in range(4):
        q_scr[p, :, 1:H + 1, C:C + WC] = xn[:, :, p * WC:(p + 1) * WC]
    y2 = _conv_core(q_scr, w2_ref, b2_ref, a2_ref, H=H, W=W, C=C)
    st_ref[...] = _bn_partials(y2)[None]
    y_ref[...] = y2.reshape(x_ref.shape[0], H, 4 * WC).astype(y_ref.dtype)


# ----------------------------------------------------------------------------
# pallas_call wrappers
# ----------------------------------------------------------------------------
def _call_upconv1(x_arr, wct, bct, w1, b1, a1, *, S, H, W, Cin, C, vmem_limit):
    ND = x_arr.shape[0]
    NB = ND // S
    WC = W * C
    M4 = 4 * WC
    kern = functools.partial(_upconv1_kernel, H=H, W=W, C=C)
    return pl.pallas_call(
        kern,
        grid=(NB,),
        in_specs=[
            pl.BlockSpec((S, H, W * Cin), lambda i: (i, 0, 0)),
            pl.BlockSpec((W * Cin, 8 * WC), lambda i: (0, 0)),
            pl.BlockSpec((1, 8 * WC), lambda i: (0, 0)),
            pl.BlockSpec((16 * WC, M4), lambda i: (0, 0)),
            pl.BlockSpec((1, M4), lambda i: (0, 0)),
            pl.BlockSpec(memory_space=pltpu.MemorySpace.SMEM),
        ],
        out_specs=[
            pl.BlockSpec((2 * S, H, M4), lambda i: (i, 0, 0)),
            pl.BlockSpec((1, 2, M4), lambda i: (i, 0, 0)),
        ],
        out_shape=[
            jax.ShapeDtypeStruct((2 * ND, H, M4), jnp.bfloat16),   # y1 stored bf16
            jax.ShapeDtypeStruct((NB, 2, M4), jnp.float32),        # BN#1 partials
        ],
        scratch_shapes=[
            pltpu.VMEM((4, 2 * S, H + 2, (W + 2) * C), jnp.float32),
        ],
        compiler_params=pltpu.CompilerParams(
            dimension_semantics=("parallel",),
            vmem_limit_bytes=vmem_limit),
    )(x_arr, wct, bct, w1, b1, a1)


def _call_bnconv2(y1, sc1, sf1, w2, b2, a2, *, S2, H, W, C, vmem_limit):
    B2 = y1.shape[0]
    NB = B2 // S2
    WC = W * C
    M4 = 4 * WC
    kern = functools.partial(_bnconv2_kernel, H=H, W=W, C=C)
    return pl.pallas_call(
        kern,
        grid=(NB,),
        in_specs=[
            pl.BlockSpec((S2, H, M4), lambda i: (i, 0, 0)),
            pl.BlockSpec((1, M4), lambda i: (0, 0)),
            pl.BlockSpec((1, M4), lambda i: (0, 0)),
            pl.BlockSpec((16 * WC, M4), lambda i: (0, 0)),
            pl.BlockSpec((1, M4), lambda i: (0, 0)),
            pl.BlockSpec(memory_space=pltpu.MemorySpace.SMEM),
        ],
        out_specs=[
            pl.BlockSpec((S2, H, M4), lambda i: (i, 0, 0)),
            pl.BlockSpec((1, 2, M4), lambda i: (i, 0, 0)),
        ],
        out_shape=[
            jax.ShapeDtypeStruct((B2, H, M4), jnp.float32),
            jax.ShapeDtypeStruct((NB, 2, M4), jnp.float32),
        ],
        scratch_shapes=[
            pltpu.VMEM((4, S2, H + 2, (W + 2) * C), jnp.float32),
        ],
        compiler_params=pltpu.CompilerParams(
            dimension_semantics=("parallel",),
            vmem_limit_bytes=vmem_limit),
    )(y1, sc1, sf1, w2, b2, a2)


# ----------------------------------------------------------------------------
# Parameter repacking (tiny einsums, done once per call in XLA)
# ----------------------------------------------------------------------------
def _assemble_convt(ct_w, ct_b, W):
    Cin, C = ct_w.shape[0], ct_w.shape[1]
    wt = jnp.transpose(ct_w, (2, 3, 4, 0, 1))            # (pd, ph, pw, cin, cout)
    eye = jnp.eye(W, dtype=ct_w.dtype)
    wct = jnp.einsum('wx,defic->widefxc', eye, wt).reshape(W * Cin, 8 * W * C)
    bct = jnp.tile(ct_b, (8 * W,)).reshape(1, 8 * W * C)
    return wct.astype(jnp.bfloat16), bct


def _assemble_conv3x3(c_w, c_b, W):
    C = c_w.shape[0]
    k = jnp.transpose(c_w, (2, 3, 1, 0))                 # (kh, kw, cin, cout)
    sel = jnp.asarray(_tap_selector(), dtype=c_w.dtype)  # (tap, parity, kernel row)
    m = jnp.einsum('tpi,uqj,ijab->tupqab', sel, sel, k)  # (th, tw, ph, pw, cin, cout)
    eye = jnp.eye(W, dtype=c_w.dtype)
    wbig = jnp.einsum('tupqab,wx->tuwapqxb', m, eye).reshape(16 * W * C, 4 * W * C)
    bbig = jnp.tile(c_b, (4 * W,)).reshape(1, 4 * W * C)
    return wbig.astype(jnp.bfloat16), bbig


def _bn_fold(stats, gamma, beta, count, W, eps=1e-5):
    """Fold per-block (sum, sum_sq) partials into per-channel BN scale/shift."""
    C = gamma.shape[0]
    s = stats.sum(axis=0).reshape(2, 4 * W, C).sum(axis=1)   # (2, C)
    mean = s[0] / count
    var = s[1] / count - mean * mean                          # biased, as in PyTorch
    scale = gamma * lax.rsqrt(var + eps)
    shift = beta - mean * scale
    tiled = (jnp.tile(scale, (4 * W,)).reshape(1, 4 * W * C),
             jnp.tile(shift, (4 * W,)).reshape(1, 4 * W * C))
    return tiled, scale, shift


# ----------------------------------------------------------------------------
# VMEM budgeting / slab selection
# ----------------------------------------------------------------------------
def _vmem_config():
    """(vmem_limit_bytes, usable budget) derived from the chip's VMEM capacity."""
    try:
        cap = int(pltpu.get_tpu_info().vmem_capacity_bytes)
    except Exception:
        cap = 64 * 1024 * 1024          # conservative (v7x) fallback
    limit = max(32 * 1024 * 1024, min((cap * 3) // 4, 64 * 1024 * 1024))
    budget = (limit * 7) // 8
    return int(limit), int(budget)


def _pick_slab(ND, H, W, Cin, C, budget):
    """Largest depth slab S (dividing N*D) whose kernel VMEM footprint fits
    `budget`, preferring an even number (>= 2) of grid steps so that both v7x
    TensorCores get work and block DMAs can overlap with compute."""
    WC = W * C
    M4 = 4 * WC

    def need(S):
        S2 = 2 * S
        out_blk = S2 * H * M4                                # elems of one output block
        q_scr = 4 * S2 * (H + 2) * (W + 2) * C * 4           # parity scratch, f32
        w_conv = 2 * (16 * WC * M4) * 2                      # conv weight, bf16, x2 buffers
        w_ct = 2 * (W * Cin * 8 * WC) * 2                    # convT weight, bf16, x2 buffers
        temps = 4 * out_blk * 4                              # acc / lhs chunks / y8 / y value
        misc = 1 << 20
        k1 = (2 * S * H * W * Cin * 4 + 2 * out_blk * 2
              + w_ct + w_conv + q_scr + temps + misc)
        k2 = (2 * out_blk * 2 + 2 * out_blk * 4
              + w_conv + q_scr + temps + misc)
        return max(k1, k2)

    divisors = sorted((s for s in range(1, ND + 1) if ND % s == 0), reverse=True)
    for s in divisors:
        nb = ND // s
        if nb >= 2 and nb % 2 == 0 and need(s) <= budget:
            return s
    # TODO(synk): pad N*D (masking pad rows out of the BN partial sums) when it
    # has no even-step divisor, instead of falling back to a small slab.
    for s in divisors:
        if ND // s >= 2 and need(s) <= budget:
            return s
    return 1


# ----------------------------------------------------------------------------
# Public forward pass
# ----------------------------------------------------------------------------
@jax.jit
def unet_up_block(x, params):
    # x: (N, Cin, D, H, W)  -- PyTorch NCDHW
    N, Cin, D, H, W = x.shape
    C = params["ct_w"].shape[1]
    ND = N * D
    vmem_limit, budget = _vmem_config()
    S = _pick_slab(ND, H, W, Cin, C, budget)
    NB = ND // S

    # Prologue: NCDHW -> (n*d, h, w*cin) rows (single XLA pass over the small
    # pre-upsample tensor).
    x_arr = jnp.transpose(x, (0, 2, 3, 4, 1)).reshape(ND, H, W * Cin)

    wct, bct = _assemble_convt(params["ct_w"], params["ct_b"], W)
    w1, b1 = _assemble_conv3x3(params["c1_w"], params["c1_b"], W)
    w2, b2 = _assemble_conv3x3(params["c2_w"], params["c2_b"], W)

    # Kernel 1: ConvTranspose3d + Conv#1 + PReLU#1 (+ BN#1 statistics).
    y1, st1 = _call_upconv1(x_arr, wct, bct, w1, b1, params["p1_a"],
                            S=S, H=H, W=W, Cin=Cin, C=C, vmem_limit=vmem_limit)

    count = float(8 * N * D * H * W)     # elements per channel after upsampling
    (sc1, sf1), _, _ = _bn_fold(st1, params["bn1_g"], params["bn1_b"], count, W)

    # Kernel 2: BN#1 (apply) + Conv#2 + PReLU#2 (+ BN#2 statistics).
    y2, st2 = _call_bnconv2(y1, sc1, sf1, w2, b2, params["p2_a"],
                            S2=2 * S, H=H, W=W, C=C, vmem_limit=vmem_limit)

    _, scale2, shift2 = _bn_fold(st2, params["bn2_g"], params["bn2_b"], count, W)

    # Epilogue: BN#2 affine folded into the mandatory NCDHW restore (one fused
    # XLA pass over the output tensor -- no standalone BN pass).
    t = y2.reshape(NB, 2, S, H, 2, 2, W, C)          # (blk, pd, s, h, ph, pw, w, c)
    t = t * scale2 + shift2
    t = jnp.transpose(t, (0, 2, 1, 3, 4, 5, 6, 7))   # (blk, s, pd, h, ph, pw, w, c)
    t = t.reshape(N, D, 2, H, 2, 2, W, C)            # (n, d, pd, h, ph, pw, w, c)
    t = jnp.transpose(t, (0, 7, 1, 2, 3, 4, 6, 5))   # (n, c, d, pd, h, ph, w, pw)
    return t.reshape(N, C, 2 * D, 2 * H, 2 * W)


def init_params(key, in_size, out_size):
    ks = jax.random.split(key, 6)
    return {
        # ConvTranspose3d weight layout in PyTorch: (Cin, Cout, 2, 2, 2)
        "ct_w": 0.1 * jax.random.normal(ks[0], (in_size, out_size, 2, 2, 2), jnp.float32),
        "ct_b": 0.05 * jax.random.normal(ks[1], (out_size,), jnp.float32),
        # Conv2d weight layout in PyTorch: (Cout, Cin, 3, 3)
        "c1_w": 0.1 * jax.random.normal(ks[2], (out_size, out_size, 3, 3), jnp.float32),
        "c1_b": 0.05 * jax.random.normal(ks[3], (out_size,), jnp.float32),
        "c2_w": 0.1 * jax.random.normal(ks[4], (out_size, out_size, 3, 3), jnp.float32),
        "c2_b": 0.05 * jax.random.normal(ks[5], (out_size,), jnp.float32),
        # PReLU default init = 0.25 (single shared parameter)
        "p1_a": jnp.array([0.25], jnp.float32),
        "p2_a": jnp.array([0.25], jnp.float32),
        # BatchNorm3d affine params (default init)
        "bn1_g": jnp.ones((out_size,), jnp.float32),
        "bn1_b": jnp.zeros((out_size,), jnp.float32),
        "bn2_g": jnp.ones((out_size,), jnp.float32),
        "bn2_b": jnp.zeros((out_size,), jnp.float32),
    }


# ----------------------------------------------------------------------------
# Pure-JAX reference of the same forward pass (used only for a numeric check)
# ----------------------------------------------------------------------------
def _reference(x, params, eps=1e-5):
    N, Cin, D, H, W = x.shape
    C = params["ct_w"].shape[1]
    hp = lax.Precision.HIGHEST
    u = jnp.einsum('nidhw,iokpq->nodkhpwq', x, params["ct_w"], precision=hp)
    u = u.reshape(N, C, 2 * D, 2 * H, 2 * W) + params["ct_b"][None, :, None, None, None]

    def block(v, w, b, a, g, bb):
        n, c, d2, h2, w2 = v.shape
        v2 = jnp.transpose(v, (0, 2, 1, 3, 4)).reshape(n * d2, c, h2, w2)
        o = lax.conv_general_dilated(v2, w, (1, 1), 'SAME',
                                     dimension_numbers=('NCHW', 'OIHW', 'NCHW'),
                                     precision=hp)
        o = o + b[None, :, None, None]
        o = jnp.where(o > 0, o, a * o)
        mean = o.mean(axis=(0, 2, 3), keepdims=True)
        var = jnp.mean((o - mean) ** 2, axis=(0, 2, 3), keepdims=True)
        o = (o - mean) * lax.rsqrt(var + eps)
        o = o * g[None, :, None, None] + bb[None, :, None, None]
        return jnp.transpose(o.reshape(n, d2, c, h2, w2), (0, 2, 1, 3, 4))

    y = block(u, params["c1_w"], params["c1_b"], params["p1_a"][0],
              params["bn1_g"], params["bn1_b"])
    y = block(y, params["c2_w"], params["c2_b"], params["p2_a"][0],
              params["bn2_g"], params["bn2_b"])
    return y


if __name__ == "__main__":
    key = jax.random.PRNGKey(0)
    k_x, k_p = jax.random.split(key)

    N, Cin, Cout, D, H, W = 2, 4, 8, 4, 8, 8
    x = jax.random.normal(k_x, (N, Cin, D, H, W), jnp.float32)
    params = init_params(k_p, Cin, Cout)

    out = jax.block_until_ready(unet_up_block(x, params))
    assert out.shape == (N, Cout, 2 * D, 2 * H, 2 * W), out.shape
    assert bool(jnp.all(jnp.isfinite(out)))

    # Numeric self-check against a pure-JAX reference (tolerance accommodates
    # the bf16 MXU operands / bf16 inter-kernel activations).
    ref = _reference(x, params)
    err = float(jnp.max(jnp.abs(out - ref)))
    assert err < 5e-2, f"mismatch vs reference: max abs err = {err}"

    print("KERNEL_OK")
</pallas_src>

<mosaic_0001>
module attributes {stable_mosaic.version = 11 : i64} {
  func.func @_upconv1_kernel(%arg0: i32, %arg1: memref<4x8x32xf32, #tpu.memory_space<vmem>>, %arg2: memref<32x512xbf16, #tpu.memory_space<vmem>>, %arg3: memref<1x512xf32, #tpu.memory_space<vmem>>, %arg4: memref<1024x256xbf16, #tpu.memory_space<vmem>>, %arg5: memref<1x256xf32, #tpu.memory_space<vmem>>, %arg6: memref<1xf32, #tpu.memory_space<smem>>, %arg7: memref<8x8x256xbf16, #tpu.memory_space<vmem>>, %arg8: memref<1x2x256xf32, #tpu.memory_space<vmem>>, %arg9: memref<4x8x10x80xf32, #tpu.memory_space<vmem>>) attributes {dimension_semantics = [#tpu.dimension_semantics<parallel>], iteration_bounds = array<i64: 2>, scalar_prefetch = 0 : i64, scratch_operands = 1 : i64, tpu.core_type = #tpu.core_type<tc>, window_params = [{transform_indices = @transform_0, window_bounds = array<i64: 4, 8, 32>}, {pipeline_mode = #tpu.pipeline_mode<synchronous>, transform_indices = @transform_1, window_bounds = array<i64: 32, 512>}, {pipeline_mode = #tpu.pipeline_mode<synchronous>, transform_indices = @transform_2, window_bounds = array<i64: 1, 512>}, {pipeline_mode = #tpu.pipeline_mode<synchronous>, transform_indices = @transform_3, window_bounds = array<i64: 1024, 256>}, {pipeline_mode = #tpu.pipeline_mode<synchronous>, transform_indices = @transform_4, window_bounds = array<i64: 1, 256>}, {transform_indices = @transform_5, window_bounds = array<i64: 1>}, {transform_indices = @transform_6, window_bounds = array<i64: 8, 8, 256>}, {transform_indices = @transform_7, window_bounds = array<i64: 1, 2, 256>}]} {
    %cst = arith.constant 0.000000e+00 : f32
    %0 = vector.broadcast %cst : f32 to vector<8x1x80xf32>
    %cst_0 = arith.constant 0.000000e+00 : f32
    %1 = vector.broadcast %cst_0 : f32 to vector<8x10x8xf32>
    %c0 = arith.constant 0 : index
    %c0_1 = arith.constant 0 : index
    %c0_2 = arith.constant 0 : index
    %c0_3 = arith.constant 0 : index
    %2 = vector.load %arg9[%c0, %c0_1, %c0_2, %c0_3] : memref<4x8x10x80xf32, #tpu.memory_space<vmem>>, vector<1x8x1x80xf32>
    %3 = vector.shape_cast %2 : vector<1x8x1x80xf32> to vector<8x1x80xf32>
    %4 = vector.shape_cast %0 : vector<8x1x80xf32> to vector<1x8x1x80xf32>
    tpu.vector_store %arg9[%c0, %c0_1, %c0_2, %c0_3], %4 {strides = array<i32>} : memref<4x8x10x80xf32, #tpu.memory_space<vmem>>, vector<1x8x1x80xf32>,
    %c0_4 = arith.constant 0 : index
    %c0_5 = arith.constant 0 : index
    %c9 = arith.constant 9 : index
    %c0_6 = arith.constant 0 : index
    %5 = vector.load %arg9[%c0_4, %c0_5, %c9, %c0_6] : memref<4x8x10x80xf32, #tpu.memory_space<vmem>>, vector<1x8x1x80xf32>
    %6 = vector.shape_cast %5 : vector<1x8x1x80xf32> to vector<8x1x80xf32>
    %7 = vector.shape_cast %0 : vector<8x1x80xf32> to vector<1x8x1x80xf32>
    tpu.vector_store %arg9[%c0_4, %c0_5, %c9, %c0_6], %7 {strides = array<i32>} : memref<4x8x10x80xf32, #tpu.memory_space<vmem>>, vector<1x8x1x80xf32>,
    %c0_7 = arith.constant 0 : index
    %c0_8 = arith.constant 0 : index
    %c0_9 = arith.constant 0 : index
    %c0_10 = arith.constant 0 : index
    %8 = vector.load %arg9[%c0_7, %c0_8, %c0_9, %c0_10] : memref<4x8x10x80xf32, #tpu.memory_space<vmem>>, vector<1x8x10x8xf32>
    %9 = vector.shape_cast %8 : vector<1x8x10x8xf32> to vector<8x10x8xf32>
    %10 = vector.shape_cast %1 : vector<8x10x8xf32> to vector<1x8x10x8xf32>
    tpu.vector_store %arg9[%c0_7, %c0_8, %c0_9, %c0_10], %10 {strides = array<i32>} : memref<4x8x10x80xf32, #tpu.memory_space<vmem>>, vector<1x8x10x8xf32>,
    %c0_11 = arith.constant 0 : index
    %c0_12 = arith.constant 0 : index
    %c0_13 = arith.constant 0 : index
    %c72 = arith.constant 72 : index
    %11 = vector.load %arg9[%c0_11, %c0_12, %c0_13, %c72] : memref<4x8x10x80xf32, #tpu.memory_space<vmem>>, vector<1x8x10x8xf32>
    %12 = vector.shape_cast %11 : vector<1x8x10x8xf32> to vector<8x10x8xf32>
    %13 = vector.shape_cast %1 : vector<8x10x8xf32> to vector<1x8x10x8xf32>
    tpu.vector_store %arg9[%c0_11, %c0_12, %c0_13, %c72], %13 {strides = array<i32>} : memref<4x8x10x80xf32, #tpu.memory_space<vmem>>, vector<1x8x10x8xf32>,
    %c1 = arith.constant 1 : index
    %c0_14 = arith.constant 0 : index
    %c0_15 = arith.constant 0 : index
    %c0_16 = arith.constant 0 : index
    %14 = vector.load %arg9[%c1, %c0_14, %c0_15, %c0_16] : memref<4x8x10x80xf32, #tpu.memory_space<vmem>>, vector<1x8x1x80xf32>
    %15 = vector.shape_cast %14 : vector<1x8x1x80xf32> to vector<8x1x80xf32>
    %16 = vector.shape_cast %0 : vector<8x1x80xf32> to vector<1x8x1x80xf32>
    tpu.vector_store %arg9[%c1, %c0_14, %c0_15, %c0_16], %16 {strides = array<i32>} : memref<4x8x10x80xf32, #tpu.memory_space<vmem>>, vector<1x8x1x80xf32>,
    %c1_17 = arith.constant 1 : index
    %c0_18 = arith.constant 0 : index
    %c9_19 = arith.constant 9 : index
    %c0_20 = arith.constant 0 : index
    %17 = vector.load %arg9[%c1_17, %c0_18, %c9_19, %c0_20] : memref<4x8x10x80xf32, #tpu.memory_space<vmem>>, vector<1x8x1x80xf32>
    %18 = vector.shape_cast %17 : vector<1x8x1x80xf32> to vector<8x1x80xf32>
    %19 = vector.shape_cast %0 : vector<8x1x80xf32> to vector<1x8x1x80xf32>
    tpu.vector_store %arg9[%c1_17, %c0_18, %c9_19, %c0_20], %19 {strides = array<i32>} : memref<4x8x10x80xf32, #tpu.memory_space<vmem>>, vector<1x8x1x80xf32>,
    %c1_21 = arith.constant 1 : index
    %c0_22 = arith.constant 0 : index
    %c0_23 = arith.constant 0 : index
    %c0_24 = arith.constant 0 : index
    %20 = vector.load %arg9[%c1_21, %c0_22, %c0_23, %c0_24] : memref<4x8x10x80xf32, #tpu.memory_space<vmem>>, vector<1x8x10x8xf32>
    %21 = vector.shape_cast %20 : vector<1x8x10x8xf32> to vector<8x10x8xf32>
    %22 = vector.shape_cast %1 : vector<8x10x8xf32> to vector<1x8x10x8xf32>
    tpu.vector_store %arg9[%c1_21, %c0_22, %c0_23, %c0_24], %22 {strides = array<i32>} : memref<4x8x10x80xf32, #tpu.memory_space<vmem>>, vector<1x8x10x8xf32>,
    %c1_25 = arith.constant 1 : index
    %c0_26 = arith.constant 0 : index
    %c0_27 = arith.constant 0 : index
    %c72_28 = arith.constant 72 : index
    %23 = vector.load %arg9[%c1_25, %c0_26, %c0_27, %c72_28] : memref<4x8x10x80xf32, #tpu.memory_space<vmem>>, vector<1x8x10x8xf32>
    %24 = vector.shape_cast %23 : vector<1x8x10x8xf32> to vector<8x10x8xf32>
    %25 = vector.shape_cast %1 : vector<8x10x8xf32> to vector<1x8x10x8xf32>
    tpu.vector_store %arg9[%c1_25, %c0_26, %c0_27, %c72_28], %25 {strides = array<i32>} : memref<4x8x10x80xf32, #tpu.memory_space<vmem>>, vector<1x8x10x8xf32>,
    %c2 = arith.constant 2 : index
    %c0_29 = arith.constant 0 : index
    %c0_30 = arith.constant 0 : index
    %c0_31 = arith.constant 0 : index
    %26 = vector.load %arg9[%c2, %c0_29, %c0_30, %c0_31] : memref<4x8x10x80xf32, #tpu.memory_space<vmem>>, vector<1x8x1x80xf32>
    %27 = vector.shape_cast %26 : vector<1x8x1x80xf32> to vector<8x1x80xf32>
    %28 = vector.shape_cast %0 : vector<8x1x80xf32> to vector<1x8x1x80xf32>
    tpu.vector_store %arg9[%c2, %c0_29, %c0_30, %c0_31], %28 {strides = array<i32>} : memref<4x8x10x80xf32, #tpu.memory_space<vmem>>, vector<1x8x1x80xf32>,
    %c2_32 = arith.constant 2 : index
    %c0_33 = arith.constant 0 : index
    %c9_34 = arith.constant 9 : index
    %c0_35 = arith.constant 0 : index
    %29 = vector.load %arg9[%c2_32, %c0_33, %c9_34, %c0_35] : memref<4x8x10x80xf32, #tpu.memory_space<vmem>>, vector<1x8x1x80xf32>
    %30 = vector.shape_cast %29 : vector<1x8x1x80xf32> to vector<8x1x80xf32>
    %31 = vector.shape_cast %0 : vector<8x1x80xf32> to vector<1x8x1x80xf32>
    tpu.vector_store %arg9[%c2_32, %c0_33, %c9_34, %c0_35], %31 {strides = array<i32>} : memref<4x8x10x80xf32, #tpu.memory_space<vmem>>, vector<1x8x1x80xf32>,
    %c2_36 = arith.constant 2 : index
    %c0_37 = arith.constant 0 : index
    %c0_38 = arith.constant 0 : index
    %c0_39 = arith.constant 0 : index
    %32 = vector.load %arg9[%c2_36, %c0_37, %c0_38, %c0_39] : memref<4x8x10x80xf32, #tpu.memory_space<vmem>>, vector<1x8x10x8xf32>
    %33 = vector.shape_cast %32 : vector<1x8x10x8xf32> to vector<8x10x8xf32>
    %34 = vector.shape_cast %1 : vector<8x10x8xf32> to vector<1x8x10x8xf32>
    tpu.vector_store %arg9[%c2_36, %c0_37, %c0_38, %c0_39], %34 {strides = array<i32>} : memref<4x8x10x80xf32, #tpu.memory_space<vmem>>, vector<1x8x10x8xf32>,
    %c2_40 = arith.constant 2 : index
    %c0_41 = arith.constant 0 : index
    %c0_42 = arith.constant 0 : index
    %c72_43 = arith.constant 72 : index
    %35 = vector.load %arg9[%c2_40, %c0_41, %c0_42, %c72_43] : memref<4x8x10x80xf32, #tpu.memory_space<vmem>>, vector<1x8x10x8xf32>
    %36 = vector.shape_cast %35 : vector<1x8x10x8xf32> to vector<8x10x8xf32>
    %37 = vector.shape_cast %1 : vector<8x10x8xf32> to vector<1x8x10x8xf32>
    tpu.vector_store %arg9[%c2_40, %c0_41, %c0_42, %c72_43], %37 {strides = array<i32>} : memref<4x8x10x80xf32, #tpu.memory_space<vmem>>, vector<1x8x10x8xf32>,
    %c3 = arith.constant 3 : index
    %c0_44 = arith.constant 0 : index
    %c0_45 = arith.constant 0 : index
    %c0_46 = arith.constant 0 : index
    %38 = vector.load %arg9[%c3, %c0_44, %c0_45, %c0_46] : memref<4x8x10x80xf32, #tpu.memory_space<vmem>>, vector<1x8x1x80xf32>
    %39 = vector.shape_cast %38 : vector<1x8x1x80xf32> to vector<8x1x80xf32>
    %40 = vector.shape_cast %0 : vector<8x1x80xf32> to vector<1x8x1x80xf32>
    tpu.vector_store %arg9[%c3, %c0_44, %c0_45, %c0_46], %40 {strides = array<i32>} : memref<4x8x10x80xf32, #tpu.memory_space<vmem>>, vector<1x8x1x80xf32>,
    %c3_47 = arith.constant 3 : index
    %c0_48 = arith.constant 0 : index
    %c9_49 = arith.constant 9 : index
    %c0_50 = arith.constant 0 : index
    %41 = vector.load %arg9[%c3_47, %c0_48, %c9_49, %c0_50] : memref<4x8x10x80xf32, #tpu.memory_space<vmem>>, vector<1x8x1x80xf32>
    %42 = vector.shape_cast %41 : vector<1x8x1x80xf32> to vector<8x1x80xf32>
    %43 = vector.shape_cast %0 : vector<8x1x80xf32> to vector<1x8x1x80xf32>
    tpu.vector_store %arg9[%c3_47, %c0_48, %c9_49, %c0_50], %43 {strides = array<i32>} : memref<4x8x10x80xf32, #tpu.memory_space<vmem>>, vector<1x8x1x80xf32>,
    %c3_51 = arith.constant 3 : index
    %c0_52 = arith.constant 0 : index
    %c0_53 = arith.constant 0 : index
    %c0_54 = arith.constant 0 : index
    %44 = vector.load %arg9[%c3_51, %c0_52, %c0_53, %c0_54] : memref<4x8x10x80xf32, #tpu.memory_space<vmem>>, vector<1x8x10x8xf32>
    %45 = vector.shape_cast %44 : vector<1x8x10x8xf32> to vector<8x10x8xf32>
    %46 = vector.shape_cast %1 : vector<8x10x8xf32> to vector<1x8x10x8xf32>
    tpu.vector_store %arg9[%c3_51, %c0_52, %c0_53, %c0_54], %46 {strides = array<i32>} : memref<4x8x10x80xf32, #tpu.memory_space<vmem>>, vector<1x8x10x8xf32>,
    %c3_55 = arith.constant 3 : index
    %c0_56 = arith.constant 0 : index
    %c0_57 = arith.constant 0 : index
    %c72_58 = arith.constant 72 : index
    %47 = vector.load %arg9[%c3_55, %c0_56, %c0_57, %c72_58] : memref<4x8x10x80xf32, #tpu.memory_space<vmem>>, vector<1x8x10x8xf32>
    %48 = vector.shape_cast %47 : vector<1x8x10x8xf32> to vector<8x10x8xf32>
    %49 = vector.shape_cast %1 : vector<8x10x8xf32> to vector<1x8x10x8xf32>
    tpu.vector_store %arg9[%c3_55, %c0_56, %c0_57, %c72_58], %49 {strides = array<i32>} : memref<4x8x10x80xf32, #tpu.memory_space<vmem>>, vector<1x8x10x8xf32>,
    %c0_59 = arith.constant 0 : index
    %c0_60 = arith.constant 0 : index
    %c0_61 = arith.constant 0 : index
    %50 = vector.load %arg1[%c0_59, %c0_60, %c0_61] : memref<4x8x32xf32, #tpu.memory_space<vmem>>, vector<4x8x32xf32>
    %51 = vector.shape_cast %50 : vector<4x8x32xf32> to vector<32x32xf32>
    %52 = arith.truncf %51 : vector<32x32xf32> to vector<32x32xbf16>
    %c0_62 = arith.constant 0 : index
    %c0_63 = arith.constant 0 : index
    %53 = vector.load %arg2[%c0_62, %c0_63] : memref<32x512xbf16, #tpu.memory_space<vmem>>, vector<32x512xbf16>
    %cst_64 = arith.constant dense<0.000000e+00> : vector<32x512xf32>
    %54 = tpu.matmul %52, %53, %cst_64 {dimension_numbers = #tpu.dot_dimension_numbers<[1], [0], [0], [1], [0, 0, 1, 1], [], []>} : vector<32x32xbf16>, vector<32x512xbf16>, vector<32x512xf32> -> vector<32x512xf32>
    %c0_65 = arith.constant 0 : index
    %c0_66 = arith.constant 0 : index
    %55 = vector.load %arg3[%c0_65, %c0_66] : memref<1x512xf32, #tpu.memory_space<vmem>>, vector<1x512xf32>
    %56 = vector.broadcast %55 : vector<1x512xf32> to vector<32x512xf32>
    %57 = arith.addf %54, %56 : vector<32x512xf32>
    %58 = vector.extract_strided_slice %57 {offsets = [0, 0], sizes = [32, 64], strides = [1, 1]} : vector<32x512xf32> to vector<32x64xf32>
    %59 = vector.shape_cast %58 : vector<32x64xf32> to vector<4x8x64xf32>
    %c0_67 = arith.constant 0 : index
    %c0_68 = arith.constant 0 : index
    %c1_69 = arith.constant 1 : index
    %c8 = arith.constant 8 : index
    %60 = vector.load %arg9[%c0_67, %c0_68, %c1_69, %c8] : memref<4x8x10x80xf32, #tpu.memory_space<vmem>>, vector<1x4x8x64xf32>
    %61 = vector.shape_cast %60 : vector<1x4x8x64xf32> to vector<4x8x64xf32>
    %62 = vector.shape_cast %59 : vector<4x8x64xf32> to vector<1x4x8x64xf32>
    tpu.vector_store %arg9[%c0_67, %c0_68, %c1_69, %c8], %62 {strides = array<i32>} : memref<4x8x10x80xf32, #tpu.memory_space<vmem>>, vector<1x4x8x64xf32>,
    %63 = vector.extract_strided_slice %57 {offsets = [0, 64], sizes = [32, 64], strides = [1, 1]} : vector<32x512xf32> to vector<32x64xf32>
    %64 = vector.shape_cast %63 : vector<32x64xf32> to vector<4x8x64xf32>
    %c1_70 = arith.constant 1 : index
    %c0_71 = arith.constant 0 : index
    %c1_72 = arith.constant 1 : index
    %c8_73 = arith.constant 8 : index
    %65 = vector.load %arg9[%c1_70, %c0_71, %c1_72, %c8_73] : memref<4x8x10x80xf32, #tpu.memory_space<vmem>>, vector<1x4x8x64xf32>
    %66 = vector.shape_cast %65 : vector<1x4x8x64xf32> to vector<4x8x64xf32>
    %67 = vector.shape_cast %64 : vector<4x8x64xf32> to vector<1x4x8x64xf32>
    tpu.vector_store %arg9[%c1_70, %c0_71, %c1_72, %c8_73], %67 {strides = array<i32>} : memref<4x8x10x80xf32, #tpu.memory_space<vmem>>, vector<1x4x8x64xf32>,
    %68 = vector.extract_strided_slice %57 {offsets = [0, 128], sizes = [32, 64], strides = [1, 1]} : vector<32x512xf32> to vector<32x64xf32>
    %69 = vector.shape_cast %68 : vector<32x64xf32> to vector<4x8x64xf32>
    %c2_74 = arith.constant 2 : index
    %c0_75 = arith.constant 0 : index
    %c1_76 = arith.constant 1 : index
    %c8_77 = arith.constant 8 : index
    %70 = vector.load %arg9[%c2_74, %c0_75, %c1_76, %c8_77] : memref<4x8x10x80xf32, #tpu.memory_space<vmem>>, vector<1x4x8x64xf32>
    %71 = vector.shape_cast %70 : vector<1x4x8x64xf32> to vector<4x8x64xf32>
    %72 = vector.shape_cast %69 : vector<4x8x64xf32> to vector<1x4x8x64xf32>
    tpu.vector_store %arg9[%c2_74, %c0_75, %c1_76, %c8_77], %72 {strides = array<i32>} : memref<4x8x10x80xf32, #tpu.memory_space<vmem>>, vector<1x4x8x64xf32>,
    %73 = vector.extract_strided_slice %57 {offsets = [0, 192], sizes = [32, 64], strides = [1, 1]} : vector<32x512xf32> to vector<32x64xf32>
    %74 = vector.shape_cast %73 : vector<32x64xf32> to vector<4x8x64xf32>
    %c3_78 = arith.constant 3 : index
    %c0_79 = arith.constant 0 : index
    %c1_80 = arith.constant 1 : index
    %c8_81 = arith.constant 8 : index
    %75 = vector.load %arg9[%c3_78, %c0_79, %c1_80, %c8_81] : memref<4x8x10x80xf32, #tpu.memory_space<vmem>>, vector<1x4x8x64xf32>
    %76 = vector.shape_cast %75 : vector<1x4x8x64xf32> to vector<4x8x64xf32>
    %77 = vector.shape_cast %74 : vector<4x8x64xf32> to vector<1x4x8x64xf32>
    tpu.vector_store %arg9[%c3_78, %c0_79, %c1_80, %c8_81], %77 {strides = array<i32>} : memref<4x8x10x80xf32, #tpu.memory_space<vmem>>, vector<1x4x8x64xf32>,
    %78 = vector.extract_strided_slice %57 {offsets = [0, 256], sizes = [32, 64], strides = [1, 1]} : vector<32x512xf32> to vector<32x64xf32>
    %79 = vector.shape_cast %78 : vector<32x64xf32> to vector<4x8x64xf32>
    %c0_82 = arith.constant 0 : index
    %c4 = arith.constant 4 : index
    %c1_83 = arith.constant 1 : index
    %c8_84 = arith.constant 8 : index
    %80 = vector.load %arg9[%c0_82, %c4, %c1_83, %c8_84] : memref<4x8x10x80xf32, #tpu.memory_space<vmem>>, vector<1x4x8x64xf32>
    %81 = vector.shape_cast %80 : vector<1x4x8x64xf32> to vector<4x8x64xf32>
    %82 = vector.shape_cast %79 : vector<4x8x64xf32> to vector<1x4x8x64xf32>
    tpu.vector_store %arg9[%c0_82, %c4, %c1_83, %c8_84], %82 {strides = array<i32>} : memref<4x8x10x80xf32, #tpu.memory_space<vmem>>, vector<1x4x8x64xf32>,
    %83 = vector.extract_strided_slice %57 {offsets = [0, 320], sizes = [32, 64], strides = [1, 1]} : vector<32x512xf32> to vector<32x64xf32>
    %84 = vector.shape_cast %83 : vector<32x64xf32> to vector<4x8x64xf32>
    %c1_85 = arith.constant 1 : index
    %c4_86 = arith.constant 4 : index
    %c1_87 = arith.constant 1 : index
    %c8_88 = arith.constant 8 : index
    %85 = vector.load %arg9[%c1_85, %c4_86, %c1_87, %c8_88] : memref<4x8x10x80xf32, #tpu.memory_space<vmem>>, vector<1x4x8x64xf32>
    %86 = vector.shape_cast %85 : vector<1x4x8x64xf32> to vector<4x8x64xf32>
    %87 = vector.shape_cast %84 : vector<4x8x64xf32> to vector<1x4x8x64xf32>
    tpu.vector_store %arg9[%c1_85, %c4_86, %c1_87, %c8_88], %87 {strides = array<i32>} : memref<4x8x10x80xf32, #tpu.memory_space<vmem>>, vector<1x4x8x64xf32>,
    %88 = vector.extract_strided_slice %57 {offsets = [0, 384], sizes = [32, 64], strides = [1, 1]} : vector<32x512xf32> to vector<32x64xf32>
    %89 = vector.shape_cast %88 : vector<32x64xf32> to vector<4x8x64xf32>
    %c2_89 = arith.constant 2 : index
    %c4_90 = arith.constant 4 : index
    %c1_91 = arith.constant 1 : index
    %c8_92 = arith.constant 8 : index
    %90 = vector.load %arg9[%c2_89, %c4_90, %c1_91, %c8_92] : memref<4x8x10x80xf32, #tpu.memory_space<vmem>>, vector<1x4x8x64xf32>
    %91 = vector.shape_cast %90 : vector<1x4x8x64xf32> to vector<4x8x64xf32>
    %92 = vector.shape_cast %89 : vector<4x8x64xf32> to vector<1x4x8x64xf32>
    tpu.vector_store %arg9[%c2_89, %c4_90, %c1_91, %c8_92], %92 {strides = array<i32>} : memref<4x8x10x80xf32, #tpu.memory_space<vmem>>, vector<1x4x8x64xf32>,
    %93 = vector.extract_strided_slice %57 {offsets = [0, 448], sizes = [32, 64], strides = [1, 1]} : vector<32x512xf32> to vector<32x64xf32>
    %94 = vector.shape_cast %93 : vector<32x64xf32> to vector<4x8x64xf32>
    %c3_93 = arith.constant 3 : index
    %c4_94 = arith.constant 4 : index
    %c1_95 = arith.constant 1 : index
    %c8_96 = arith.constant 8 : index
    %95 = vector.load %arg9[%c3_93, %c4_94, %c1_95, %c8_96] : memref<4x8x10x80xf32, #tpu.memory_space<vmem>>, vector<1x4x8x64xf32>
    %96 = vector.shape_cast %95 : vector<1x4x8x64xf32> to vector<4x8x64xf32>
    %97 = vector.shape_cast %94 : vector<4x8x64xf32> to vector<1x4x8x64xf32>
    tpu.vector_store %arg9[%c3_93, %c4_94, %c1_95, %c8_96], %97 {strides = array<i32>} : memref<4x8x10x80xf32, #tpu.memory_space<vmem>>, vector<1x4x8x64xf32>,
    %cst_97 = arith.constant 0.000000e+00 : f32
    %98 = vector.broadcast %cst_97 : f32 to vector<64x256xf32>
    %c3_98 = arith.constant 3 : index
    %c0_99 = arith.constant 0 : index
    %c0_100 = arith.constant 0 : index
    %c0_101 = arith.constant 0 : index
    %99 = vector.load %arg9[%c3_98, %c0_99, %c0_100, %c0_101] : memref<4x8x10x80xf32, #tpu.memory_space<vmem>>, vector<1x8x8x64xf32>
    %100 = vector.shape_cast %99 : vector<1x8x8x64xf32> to vector<8x8x64xf32>
    %c2_102 = arith.constant 2 : index
    %c0_103 = arith.constant 0 : index
    %c0_104 = arith.constant 0 : index
    %c8_105 = arith.constant 8 : index
    %101 = vector.load %arg9[%c2_102, %c0_103, %c0_104, %c8_105] : memref<4x8x10x80xf32, #tpu.memory_space<vmem>>, vector<1x8x8x64xf32>
    %102 = vector.shape_cast %101 : vector<1x8x8x64xf32> to vector<8x8x64xf32>
    %c3_106 = arith.constant 3 : index
    %c0_107 = arith.constant 0 : index
    %c0_108 = arith.constant 0 : index
    %c8_109 = arith.constant 8 : index
    %103 = vector.load %arg9[%c3_106, %c0_107, %c0_108, %c8_109] : memref<4x8x10x80xf32, #tpu.memory_space<vmem>>, vector<1x8x8x64xf32>
    %104 = vector.shape_cast %103 : vector<1x8x8x64xf32> to vector<8x8x64xf32>
    %c2_110 = arith.constant 2 : index
    %c0_111 = arith.constant 0 : index
    %c0_112 = arith.constant 0 : index
    %c16 = arith.constant 16 : index
    %105 = vector.load %arg9[%c2_110, %c0_111, %c0_112, %c16] : memref<4x8x10x80xf32, #tpu.memory_space<vmem>>, vector<1x8x8x64xf32>
    %106 = vector.shape_cast %105 : vector<1x8x8x64xf32> to vector<8x8x64xf32>
    %107 = tpu.concatenate %100, %102, %104, %106 in 2 : vector<8x8x64xf32>, vector<8x8x64xf32>, vector<8x8x64xf32>, vector<8x8x64xf32> -> vector<8x8x256xf32>
    %108 = vector.shape_cast %107 : vector<8x8x256xf32> to vector<64x256xf32>
    %109 = arith.truncf %108 : vector<64x256xf32> to vector<64x256xbf16>
    %c0_113 = arith.constant 0 : index
    %c0_114 = arith.constant 0 : index
    %110 = vector.load %arg4[%c0_113, %c0_114] : memref<1024x256xbf16, #tpu.memory_space<vmem>>, vector<256x256xbf16>
    %cst_115 = arith.constant dense<0.000000e+00> : vector<64x256xf32>
    %111 = tpu.matmul %109, %110, %cst_115 {dimension_numbers = #tpu.dot_dimension_numbers<[1], [0], [0], [1], [0, 0, 1, 1], [], []>} : vector<64x256xbf16>, vector<256x256xbf16>, vector<64x256xf32> -> vector<64x256xf32>
    %112 = arith.addf %98, %111 : vector<64x256xf32>
    %c1_116 = arith.constant 1 : index
    %c0_117 = arith.constant 0 : index
    %c1_118 = arith.constant 1 : index
    %c0_119 = arith.constant 0 : index
    %113 = vector.load %arg9[%c1_116, %c0_117, %c1_118, %c0_119] : memref<4x8x10x80xf32, #tpu.memory_space<vmem>>, vector<1x8x8x64xf32>
    %114 = vector.shape_cast %113 : vector<1x8x8x64xf32> to vector<8x8x64xf32>
    %c0_120 = arith.constant 0 : index
    %c0_121 = arith.constant 0 : index
    %c1_122 = arith.constant 1 : index
    %c8_123 = arith.constant 8 : index
    %115 = vector.load %arg9[%c0_120, %c0_121, %c1_122, %c8_123] : memref<4x8x10x80xf32, #tpu.memory_space<vmem>>, vector<1x8x8x64xf32>
    %116 = vector.shape_cast %115 : vector<1x8x8x64xf32> to vector<8x8x64xf32>
    %c1_124 = arith.constant 1 : index
    %c0_125 = arith.constant 0 : index
    %c1_126 = arith.constant 1 : index
    %c8_127 = arith.constant 8 : index
    %117 = vector.load %arg9[%c1_124, %c0_125, %c1_126, %c8_127] : memref<4x8x10x80xf32, #tpu.memory_space<vmem>>, vector<1x8x8x64xf32>
    %118 = vector.shape_cast %117 : vector<1x8x8x64xf32> to vector<8x8x64xf32>
    %c0_128 = arith.constant 0 : index
    %c0_129 = arith.constant 0 : index
    %c1_130 = arith.constant 1 : index
    %c16_131 = arith.constant 16 : index
    %119 = vector.load %arg9[%c0_128, %c0_129, %c1_130, %c16_131] : memref<4x8x10x80xf32, #tpu.memory_space<vmem>>, vector<1x8x8x64xf32>
    %120 = vector.shape_cast %119 : vector<1x8x8x64xf32> to vector<8x8x64xf32>
    %121 = tpu.concatenate %114, %116, %118, %120 in 2 : vector<8x8x64xf32>, vector<8x8x64xf32>, vector<8x8x64xf32>, vector<8x8x64xf32> -> vector<8x8x256xf32>
    %122 = vector.shape_cast %121 : vector<8x8x256xf32> to vector<64x256xf32>
    %123 = arith.truncf %122 : vector<64x256xf32> to vector<64x256xbf16>
    %c256 = arith.constant 256 : index
    %c0_132 = arith.constant 0 : index
    %124 = vector.load %arg4[%c256, %c0_132] : memref<1024x256xbf16, #tpu.memory_space<vmem>>, vector<256x256xbf16>
    %cst_133 = arith.constant dense<0.000000e+00> : vector<64x256xf32>
    %125 = tpu.matmul %123, %124, %cst_133 {dimension_numbers = #tpu.dot_dimension_numbers<[1], [0], [0], [1], [0, 0, 1, 1], [], []>} : vector<64x256xbf16>, vector<256x256xbf16>, vector<64x256xf32> -> vector<64x256xf32>
    %126 = arith.addf %112, %125 : vector<64x256xf32>
    %c3_134 = arith.constant 3 : index
    %c0_135 = arith.constant 0 : index
    %c1_136 = arith.constant 1 : index
    %c0_137 = arith.constant 0 : index
    %127 = vector.load %arg9[%c3_134, %c0_135, %c1_136, %c0_137] : memref<4x8x10x80xf32, #tpu.memory_space<vmem>>, vector<1x8x8x64xf32>
    %128 = vector.shape_cast %127 : vector<1x8x8x64xf32> to vector<8x8x64xf32>
    %c2_138 = arith.constant 2 : index
    %c0_139 = arith.constant 0 : index
    %c1_140 = arith.constant 1 : index
    %c8_141 = arith.constant 8 : index
    %129 = vector.load %arg9[%c2_138, %c0_139, %c1_140, %c8_141] : memref<4x8x10x80xf32, #tpu.memory_space<vmem>>, vector<1x8x8x64xf32>
    %130 = vector.shape_cast %129 : vector<1x8x8x64xf32> to vector<8x8x64xf32>
    %c3_142 = arith.constant 3 : index
    %c0_143 = arith.constant 0 : index
    %c1_144 = arith.constant 1 : index
    %c8_145 = arith.constant 8 : index
    %131 = vector.load %arg9[%c3_142, %c0_143, %c1_144, %c8_145] : memref<4x8x10x80xf32, #tpu.memory_space<vmem>>, vector<1x8x8x64xf32>
    %132 = vector.shape_cast %131 : vector<1x8x8x64xf32> to vector<8x8x64xf32>
    %c2_146 = arith.constant 2 : index
    %c0_147 = arith.constant 0 : index
    %c1_148 = arith.constant 1 : index
    %c16_149 = arith.constant 16 : index
    %133 = vector.load %arg9[%c2_146, %c0_147, %c1_148, %c16_149] : memref<4x8x10x80xf32, #tpu.memory_space<vmem>>, vector<1x8x8x64xf32>
    %134 = vector.shape_cast %133 : vector<1x8x8x64xf32> to vector<8x8x64xf32>
    %135 = tpu.concatenate %128, %130, %132, %134 in 2 : vector<8x8x64xf32>, vector<8x8x64xf32>, vector<8x8x64xf32>, vector<8x8x64xf32> -> vector<8x8x256xf32>
    %136 = vector.shape_cast %135 : vector<8x8x256xf32> to vector<64x256xf32>
    %137 = arith.truncf %136 : vector<64x256xf32> to vector<64x256xbf16>
    %c512 = arith.constant 512 : index
    %c0_150 = arith.constant 0 : index
    %138 = vector.load %arg4[%c512, %c0_150] : memref<1024x256xbf16, #tpu.memory_space<vmem>>, vector<256x256xbf16>
    %cst_151 = arith.constant dense<0.000000e+00> : vector<64x256xf32>
    %139 = tpu.matmul %137, %138, %cst_151 {dimension_numbers = #tpu.dot_dimension_numbers<[1], [0], [0], [1], [0, 0, 1, 1], [], []>} : vector<64x256xbf16>, vector<256x256xbf16>, vector<64x256xf32> -> vector<64x256xf32>
    %140 = arith.addf %126, %139 : vector<64x256xf32>
    %c1_152 = arith.constant 1 : index
    %c0_153 = arith.constant 0 : index
    %c2_154 = arith.constant 2 : index
    %c0_155 = arith.constant 0 : index
    %141 = vector.load %arg9[%c1_152, %c0_153, %c2_154, %c0_155] : memref<4x8x10x80xf32, #tpu.memory_space<vmem>>, vector<1x8x8x64xf32>
    %142 = vector.shape_cast %141 : vector<1x8x8x64xf32> to vector<8x8x64xf32>
    %c0_156 = arith.constant 0 : index
    %c0_157 = arith.constant 0 : index
    %c2_158 = arith.constant 2 : index
    %c8_159 = arith.constant 8 : index
    %143 = vector.load %arg9[%c0_156, %c0_157, %c2_158, %c8_159] : memref<4x8x10x80xf32, #tpu.memory_space<vmem>>, vector<1x8x8x64xf32>
    %144 = vector.shape_cast %143 : vector<1x8x8x64xf32> to vector<8x8x64xf32>
    %c1_160 = arith.constant 1 : index
    %c0_161 = arith.constant 0 : index
    %c2_162 = arith.constant 2 : index
    %c8_163 = arith.constant 8 : index
    %145 = vector.load %arg9[%c1_160, %c0_161, %c2_162, %c8_163] : memref<4x8x10x80xf32, #tpu.memory_space<vmem>>, vector<1x8x8x64xf32>
    %146 = vector.shape_cast %145 : vector<1x8x8x64xf32> to vector<8x8x64xf32>
    %c0_164 = arith.constant 0 : index
    %c0_165 = arith.constant 0 : index
    %c2_166 = arith.constant 2 : index
    %c16_167 = arith.constant 16 : index
    %147 = vector.load %arg9[%c0_164, %c0_165, %c2_166, %c16_167] : memref<4x8x10x80xf32, #tpu.memory_space<vmem>>, vector<1x8x8x64xf32>
    %148 = vector.shape_cast %147 : vector<1x8x8x64xf32> to vector<8x8x64xf32>
    %149 = tpu.concatenate %142, %144, %146, %148 in 2 : vector<8x8x64xf32>, vector<8x8x64xf32>, vector<8x8x64xf32>, vector<8x8x64xf32> -> vector<8x8x256xf32>
    %150 = vector.shape_cast %149 : vector<8x8x256xf32> to vector<64x256xf32>
    %151 = arith.truncf %150 : vector<64x256xf32> to vector<64x256xbf16>
    %c768 = arith.constant 768 : index
    %c0_168 = arith.constant 0 : index
    %152 = vector.load %arg4[%c768, %c0_168] : memref<1024x256xbf16, #tpu.memory_space<vmem>>, vector<256x256xbf16>
    %cst_169 = arith.constant dense<0.000000e+00> : vector<64x256xf32>
    %153 = tpu.matmul %151, %152, %cst_169 {dimension_numbers = #tpu.dot_dimension_numbers<[1], [0], [0], [1], [0, 0, 1, 1], [], []>} : vector<64x256xbf16>, vector<256x256xbf16>, vector<64x256xf32> -> vector<64x256xf32>
    %154 = arith.addf %140, %153 : vector<64x256xf32>
    %c0_170 = arith.constant 0 : index
    %c0_171 = arith.constant 0 : index
    %155 = vector.load %arg5[%c0_170, %c0_171] : memref<1x256xf32, #tpu.memory_space<vmem>>, vector<1x256xf32>
    %156 = vector.broadcast %155 : vector<1x256xf32> to vector<64x256xf32>
    %157 = arith.addf %154, %156 : vector<64x256xf32>
    %c0_172 = arith.constant 0 : index
    %158 = memref.load %arg6[%c0_172] : memref<1xf32, #tpu.memory_space<smem>>
    %cst_173 = arith.constant 0.000000e+00 : f32
    %159 = vector.broadcast %cst_173 : f32 to vector<64x256xf32>
    %160 = arith.cmpf ogt, %157, %159 : vector<64x256xf32>
    %161 = vector.broadcast %158 : f32 to vector<64x256xf32>
    %162 = arith.mulf %161, %157 : vector<64x256xf32>
    %163 = arith.select %160, %157, %162 : vector<64x256xi1>, vector<64x256xf32>
    %cst_174 = arith.constant dense<0.000000e+00> : vector<256xf32>
    %164 = vector.multi_reduction <add>, %163, %cst_174 [0] : vector<64x256xf32> to vector<256xf32>
    %165 = vector.shape_cast %164 : vector<256xf32> to vector<1x256xf32>
    %166 = arith.mulf %163, %163 : vector<64x256xf32>
    %cst_175 = arith.constant dense<0.000000e+00> : vector<256xf32>
    %167 = vector.multi_reduction <add>, %166, %cst_175 [0] : vector<64x256xf32> to vector<256xf32>
    %168 = vector.shape_cast %167 : vector<256xf32> to vector<1x256xf32>
    %169 = tpu.concatenate %165, %168 in 0 : vector<1x256xf32>, vector<1x256xf32> -> vector<2x256xf32>
    %170 = vector.shape_cast %169 : vector<2x256xf32> to vector<1x2x256xf32>
    %c0_176 = arith.constant 0 : index
    %c0_177 = arith.constant 0 : index
    %c0_178 = arith.constant 0 : index
    %171 = vector.load %arg8[%c0_176, %c0_177, %c0_178] : memref<1x2x256xf32, #tpu.memory_space<vmem>>, vector<1x2x256xf32>
    tpu.vector_store %arg8[%c0_176, %c0_177, %c0_178], %170 {strides = array<i32>} : memref<1x2x256xf32, #tpu.memory_space<vmem>>, vector<1x2x256xf32>,
    %172 = vector.shape_cast %163 : vector<64x256xf32> to vector<8x8x256xf32>
    %173 = arith.truncf %172 : vector<8x8x256xf32> to vector<8x8x256xbf16>
    %c0_179 = arith.constant 0 : index
    %c0_180 = arith.constant 0 : index
    %c0_181 = arith.constant 0 : index
    %174 = vector.load %arg7[%c0_179, %c0_180, %c0_181] : memref<8x8x256xbf16, #tpu.memory_space<vmem>>, vector<8x8x256xbf16>
    tpu.vector_store %arg7[%c0_179, %c0_180, %c0_181], %173 {strides = array<i32>} : memref<8x8x256xbf16, #tpu.memory_space<vmem>>, vector<8x8x256xbf16>,
    return
  }
  func.func @transform_0(%arg0: i32) -> (i32, i32, i32) {
    %c0_i32 = arith.constant 0 : i32
    %c0_i32_0 = arith.constant 0 : i32
    %c0_i32_1 = arith.constant 0 : i32
    return %arg0, %c0_i32, %c0_i32_0 : i32, i32, i32
  }
  func.func @transform_1(%arg0: i32) -> (i32, i32) {
    %c0_i32 = arith.constant 0 : i32
    %c0_i32_0 = arith.constant 0 : i32
    %c0_i32_1 = arith.constant 0 : i32
    return %c0_i32, %c0_i32_0 : i32, i32
  }
  func.func @transform_2(%arg0: i32) -> (i32, i32) {
    %c0_i32 = arith.constant 0 : i32
    %c0_i32_0 = arith.constant 0 : i32
    %c0_i32_1 = arith.constant 0 : i32
    return %c0_i32, %c0_i32_0 : i32, i32
  }
  func.func @transform_3(%arg0: i32) -> (i32, i32) {
    %c0_i32 = arith.constant 0 : i32
    %c0_i32_0 = arith.constant 0 : i32
    %c0_i32_1 = arith.constant 0 : i32
    return %c0_i32, %c0_i32_0 : i32, i32
  }
  func.func @transform_4(%arg0: i32) -> (i32, i32) {
    %c0_i32 = arith.constant 0 : i32
    %c0_i32_0 = arith.constant 0 : i32
    %c0_i32_1 = arith.constant 0 : i32
    return %c0_i32, %c0_i32_0 : i32, i32
  }
  func.func @transform_5(%arg0: i32) -> i32 {
    %c0_i32 = arith.constant 0 : i32
    %c0_i32_0 = arith.constant 0 : i32
    return %c0_i32 : i32
  }
  func.func @transform_6(%arg0: i32) -> (i32, i32, i32) {
    %c0_i32 = arith.constant 0 : i32
    %c0_i32_0 = arith.constant 0 : i32
    %c0_i32_1 = arith.constant 0 : i32
    return %arg0, %c0_i32, %c0_i32_0 : i32, i32, i32
  }
  func.func @transform_7(%arg0: i32) -> (i32, i32, i32) {
    %c0_i32 = arith.constant 0 : i32
    %c0_i32_0 = arith.constant 0 : i32
    %c0_i32_1 = arith.constant 0 : i32
    return %arg0, %c0_i32, %c0_i32_0 : i32, i32, i32
  }
}

module attributes {stable_mosaic.version = 11 : i64} {
  func.func @_bnconv2_kernel(%arg0: i32, %arg1: memref<8x8x256xbf16, #tpu.memory_space<vmem>>, %arg2: memref<1x256xf32, #tpu.memory_space<vmem>>, %arg3: memref<1x256xf32, #tpu.memory_space<vmem>>, %arg4: memref<1024x256xbf16, #tpu.memory_space<vmem>>, %arg5: memref<1x256xf32, #tpu.memory_space<vmem>>, %arg6: memref<1xf32, #tpu.memory_space<smem>>, %arg7: memref<8x8x256xf32, #tpu.memory_space<vmem>>, %arg8: memref<1x2x256xf32, #tpu.memory_space<vmem>>, %arg9: memref<4x8x10x80xf32, #tpu.memory_space<vmem>>) attributes {dimension_semantics = [#tpu.dimension_semantics<parallel>], iteration_bounds = array<i64: 2>, scalar_prefetch = 0 : i64, scratch_operands = 1 : i64, tpu.core_type = #tpu.core_type<tc>, window_params = [{transform_indices = @transform_0, window_bounds = array<i64: 8, 8, 256>}, {pipeline_mode = #tpu.pipeline_mode<synchronous>, transform_indices = @transform_1, window_bounds = array<i64: 1, 256>}, {pipeline_mode = #tpu.pipeline_mode<synchronous>, transform_indices = @transform_2, window_bounds = array<i64: 1, 256>}, {pipeline_mode = #tpu.pipeline_mode<synchronous>, transform_indices = @transform_3, window_bounds = array<i64: 1024, 256>}, {pipeline_mode = #tpu.pipeline_mode<synchronous>, transform_indices = @transform_4, window_bounds = array<i64: 1, 256>}, {transform_indices = @transform_5, window_bounds = array<i64: 1>}, {transform_indices = @transform_6, window_bounds = array<i64: 8, 8, 256>}, {transform_indices = @transform_7, window_bounds = array<i64: 1, 2, 256>}]} {
    %cst = arith.constant 0.000000e+00 : f32
    %0 = vector.broadcast %cst : f32 to vector<8x1x80xf32>
    %cst_0 = arith.constant 0.000000e+00 : f32
    %1 = vector.broadcast %cst_0 : f32 to vector<8x10x8xf32>
    %c0 = arith.constant 0 : index
    %c0_1 = arith.constant 0 : index
    %c0_2 = arith.constant 0 : index
    %c0_3 = arith.constant 0 : index
    %2 = vector.load %arg9[%c0, %c0_1, %c0_2, %c0_3] : memref<4x8x10x80xf32, #tpu.memory_space<vmem>>, vector<1x8x1x80xf32>
    %3 = vector.shape_cast %2 : vector<1x8x1x80xf32> to vector<8x1x80xf32>
    %4 = vector.shape_cast %0 : vector<8x1x80xf32> to vector<1x8x1x80xf32>
    tpu.vector_store %arg9[%c0, %c0_1, %c0_2, %c0_3], %4 {strides = array<i32>} : memref<4x8x10x80xf32, #tpu.memory_space<vmem>>, vector<1x8x1x80xf32>,
    %c0_4 = arith.constant 0 : index
    %c0_5 = arith.constant 0 : index
    %c9 = arith.constant 9 : index
    %c0_6 = arith.constant 0 : index
    %5 = vector.load %arg9[%c0_4, %c0_5, %c9, %c0_6] : memref<4x8x10x80xf32, #tpu.memory_space<vmem>>, vector<1x8x1x80xf32>
    %6 = vector.shape_cast %5 : vector<1x8x1x80xf32> to vector<8x1x80xf32>
    %7 = vector.shape_cast %0 : vector<8x1x80xf32> to vector<1x8x1x80xf32>
    tpu.vector_store %arg9[%c0_4, %c0_5, %c9, %c0_6], %7 {strides = array<i32>} : memref<4x8x10x80xf32, #tpu.memory_space<vmem>>, vector<1x8x1x80xf32>,
    %c0_7 = arith.constant 0 : index
    %c0_8 = arith.constant 0 : index
    %c0_9 = arith.constant 0 : index
    %c0_10 = arith.constant 0 : index
    %8 = vector.load %arg9[%c0_7, %c0_8, %c0_9, %c0_10] : memref<4x8x10x80xf32, #tpu.memory_space<vmem>>, vector<1x8x10x8xf32>
    %9 = vector.shape_cast %8 : vector<1x8x10x8xf32> to vector<8x10x8xf32>
    %10 = vector.shape_cast %1 : vector<8x10x8xf32> to vector<1x8x10x8xf32>
    tpu.vector_store %arg9[%c0_7, %c0_8, %c0_9, %c0_10], %10 {strides = array<i32>} : memref<4x8x10x80xf32, #tpu.memory_space<vmem>>, vector<1x8x10x8xf32>,
    %c0_11 = arith.constant 0 : index
    %c0_12 = arith.constant 0 : index
    %c0_13 = arith.constant 0 : index
    %c72 = arith.constant 72 : index
    %11 = vector.load %arg9[%c0_11, %c0_12, %c0_13, %c72] : memref<4x8x10x80xf32, #tpu.memory_space<vmem>>, vector<1x8x10x8xf32>
    %12 = vector.shape_cast %11 : vector<1x8x10x8xf32> to vector<8x10x8xf32>
    %13 = vector.shape_cast %1 : vector<8x10x8xf32> to vector<1x8x10x8xf32>
    tpu.vector_store %arg9[%c0_11, %c0_12, %c0_13, %c72], %13 {strides = array<i32>} : memref<4x8x10x80xf32, #tpu.memory_space<vmem>>, vector<1x8x10x8xf32>,
    %c1 = arith.constant 1 : index
    %c0_14 = arith.constant 0 : index
    %c0_15 = arith.constant 0 : index
    %c0_16 = arith.constant 0 : index
    %14 = vector.load %arg9[%c1, %c0_14, %c0_15, %c0_16] : memref<4x8x10x80xf32, #tpu.memory_space<vmem>>, vector<1x8x1x80xf32>
    %15 = vector.shape_cast %14 : vector<1x8x1x80xf32> to vector<8x1x80xf32>
    %16 = vector.shape_cast %0 : vector<8x1x80xf32> to vector<1x8x1x80xf32>
    tpu.vector_store %arg9[%c1, %c0_14, %c0_15, %c0_16], %16 {strides = array<i32>} : memref<4x8x10x80xf32, #tpu.memory_space<vmem>>, vector<1x8x1x80xf32>,
    %c1_17 = arith.constant 1 : index
    %c0_18 = arith.constant 0 : index
    %c9_19 = arith.constant 9 : index
    %c0_20 = arith.constant 0 : index
    %17 = vector.load %arg9[%c1_17, %c0_18, %c9_19, %c0_20] : memref<4x8x10x80xf32, #tpu.memory_space<vmem>>, vector<1x8x1x80xf32>
    %18 = vector.shape_cast %17 : vector<1x8x1x80xf32> to vector<8x1x80xf32>
    %19 = vector.shape_cast %0 : vector<8x1x80xf32> to vector<1x8x1x80xf32>
    tpu.vector_store %arg9[%c1_17, %c0_18, %c9_19, %c0_20], %19 {strides = array<i32>} : memref<4x8x10x80xf32, #tpu.memory_space<vmem>>, vector<1x8x1x80xf32>,
    %c1_21 = arith.constant 1 : index
    %c0_22 = arith.constant 0 : index
    %c0_23 = arith.constant 0 : index
    %c0_24 = arith.constant 0 : index
    %20 = vector.load %arg9[%c1_21, %c0_22, %c0_23, %c0_24] : memref<4x8x10x80xf32, #tpu.memory_space<vmem>>, vector<1x8x10x8xf32>
    %21 = vector.shape_cast %20 : vector<1x8x10x8xf32> to vector<8x10x8xf32>
    %22 = vector.shape_cast %1 : vector<8x10x8xf32> to vector<1x8x10x8xf32>
    tpu.vector_store %arg9[%c1_21, %c0_22, %c0_23, %c0_24], %22 {strides = array<i32>} : memref<4x8x10x80xf32, #tpu.memory_space<vmem>>, vector<1x8x10x8xf32>,
    %c1_25 = arith.constant 1 : index
    %c0_26 = arith.constant 0 : index
    %c0_27 = arith.constant 0 : index
    %c72_28 = arith.constant 72 : index
    %23 = vector.load %arg9[%c1_25, %c0_26, %c0_27, %c72_28] : memref<4x8x10x80xf32, #tpu.memory_space<vmem>>, vector<1x8x10x8xf32>
    %24 = vector.shape_cast %23 : vector<1x8x10x8xf32> to vector<8x10x8xf32>
    %25 = vector.shape_cast %1 : vector<8x10x8xf32> to vector<1x8x10x8xf32>
    tpu.vector_store %arg9[%c1_25, %c0_26, %c0_27, %c72_28], %25 {strides = array<i32>} : memref<4x8x10x80xf32, #tpu.memory_space<vmem>>, vector<1x8x10x8xf32>,
    %c2 = arith.constant 2 : index
    %c0_29 = arith.constant 0 : index
    %c0_30 = arith.constant 0 : index
    %c0_31 = arith.constant 0 : index
    %26 = vector.load %arg9[%c2, %c0_29, %c0_30, %c0_31] : memref<4x8x10x80xf32, #tpu.memory_space<vmem>>, vector<1x8x1x80xf32>
    %27 = vector.shape_cast %26 : vector<1x8x1x80xf32> to vector<8x1x80xf32>
    %28 = vector.shape_cast %0 : vector<8x1x80xf32> to vector<1x8x1x80xf32>
    tpu.vector_store %arg9[%c2, %c0_29, %c0_30, %c0_31], %28 {strides = array<i32>} : memref<4x8x10x80xf32, #tpu.memory_space<vmem>>, vector<1x8x1x80xf32>,
    %c2_32 = arith.constant 2 : index
    %c0_33 = arith.constant 0 : index
    %c9_34 = arith.constant 9 : index
    %c0_35 = arith.constant 0 : index
    %29 = vector.load %arg9[%c2_32, %c0_33, %c9_34, %c0_35] : memref<4x8x10x80xf32, #tpu.memory_space<vmem>>, vector<1x8x1x80xf32>
    %30 = vector.shape_cast %29 : vector<1x8x1x80xf32> to vector<8x1x80xf32>
    %31 = vector.shape_cast %0 : vector<8x1x80xf32> to vector<1x8x1x80xf32>
    tpu.vector_store %arg9[%c2_32, %c0_33, %c9_34, %c0_35], %31 {strides = array<i32>} : memref<4x8x10x80xf32, #tpu.memory_space<vmem>>, vector<1x8x1x80xf32>,
    %c2_36 = arith.constant 2 : index
    %c0_37 = arith.constant 0 : index
    %c0_38 = arith.constant 0 : index
    %c0_39 = arith.constant 0 : index
    %32 = vector.load %arg9[%c2_36, %c0_37, %c0_38, %c0_39] : memref<4x8x10x80xf32, #tpu.memory_space<vmem>>, vector<1x8x10x8xf32>
    %33 = vector.shape_cast %32 : vector<1x8x10x8xf32> to vector<8x10x8xf32>
    %34 = vector.shape_cast %1 : vector<8x10x8xf32> to vector<1x8x10x8xf32>
    tpu.vector_store %arg9[%c2_36, %c0_37, %c0_38, %c0_39], %34 {strides = array<i32>} : memref<4x8x10x80xf32, #tpu.memory_space<vmem>>, vector<1x8x10x8xf32>,
    %c2_40 = arith.constant 2 : index
    %c0_41 = arith.constant 0 : index
    %c0_42 = arith.constant 0 : index
    %c72_43 = arith.constant 72 : index
    %35 = vector.load %arg9[%c2_40, %c0_41, %c0_42, %c72_43] : memref<4x8x10x80xf32, #tpu.memory_space<vmem>>, vector<1x8x10x8xf32>
    %36 = vector.shape_cast %35 : vector<1x8x10x8xf32> to vector<8x10x8xf32>
    %37 = vector.shape_cast %1 : vector<8x10x8xf32> to vector<1x8x10x8xf32>
    tpu.vector_store %arg9[%c2_40, %c0_41, %c0_42, %c72_43], %37 {strides = array<i32>} : memref<4x8x10x80xf32, #tpu.memory_space<vmem>>, vector<1x8x10x8xf32>,
    %c3 = arith.constant 3 : index
    %c0_44 = arith.constant 0 : index
    %c0_45 = arith.constant 0 : index
    %c0_46 = arith.constant 0 : index
    %38 = vector.load %arg9[%c3, %c0_44, %c0_45, %c0_46] : memref<4x8x10x80xf32, #tpu.memory_space<vmem>>, vector<1x8x1x80xf32>
    %39 = vector.shape_cast %38 : vector<1x8x1x80xf32> to vector<8x1x80xf32>
    %40 = vector.shape_cast %0 : vector<8x1x80xf32> to vector<1x8x1x80xf32>
    tpu.vector_store %arg9[%c3, %c0_44, %c0_45, %c0_46], %40 {strides = array<i32>} : memref<4x8x10x80xf32, #tpu.memory_space<vmem>>, vector<1x8x1x80xf32>,
    %c3_47 = arith.constant 3 : index
    %c0_48 = arith.constant 0 : index
    %c9_49 = arith.constant 9 : index
    %c0_50 = arith.constant 0 : index
    %41 = vector.load %arg9[%c3_47, %c0_48, %c9_49, %c0_50] : memref<4x8x10x80xf32, #tpu.memory_space<vmem>>, vector<1x8x1x80xf32>
    %42 = vector.shape_cast %41 : vector<1x8x1x80xf32> to vector<8x1x80xf32>
    %43 = vector.shape_cast %0 : vector<8x1x80xf32> to vector<1x8x1x80xf32>
    tpu.vector_store %arg9[%c3_47, %c0_48, %c9_49, %c0_50], %43 {strides = array<i32>} : memref<4x8x10x80xf32, #tpu.memory_space<vmem>>, vector<1x8x1x80xf32>,
    %c3_51 = arith.constant 3 : index
    %c0_52 = arith.constant 0 : index
    %c0_53 = arith.constant 0 : index
    %c0_54 = arith.constant 0 : index
    %44 = vector.load %arg9[%c3_51, %c0_52, %c0_53, %c0_54] : memref<4x8x10x80xf32, #tpu.memory_space<vmem>>, vector<1x8x10x8xf32>
    %45 = vector.shape_cast %44 : vector<1x8x10x8xf32> to vector<8x10x8xf32>
    %46 = vector.shape_cast %1 : vector<8x10x8xf32> to vector<1x8x10x8xf32>
    tpu.vector_store %arg9[%c3_51, %c0_52, %c0_53, %c0_54], %46 {strides = array<i32>} : memref<4x8x10x80xf32, #tpu.memory_space<vmem>>, vector<1x8x10x8xf32>,
    %c3_55 = arith.constant 3 : index
    %c0_56 = arith.constant 0 : index
    %c0_57 = arith.constant 0 : index
    %c72_58 = arith.constant 72 : index
    %47 = vector.load %arg9[%c3_55, %c0_56, %c0_57, %c72_58] : memref<4x8x10x80xf32, #tpu.memory_space<vmem>>, vector<1x8x10x8xf32>
    %48 = vector.shape_cast %47 : vector<1x8x10x8xf32> to vector<8x10x8xf32>
    %49 = vector.shape_cast %1 : vector<8x10x8xf32> to vector<1x8x10x8xf32>
    tpu.vector_store %arg9[%c3_55, %c0_56, %c0_57, %c72_58], %49 {strides = array<i32>} : memref<4x8x10x80xf32, #tpu.memory_space<vmem>>, vector<1x8x10x8xf32>,
    %c0_59 = arith.constant 0 : index
    %c0_60 = arith.constant 0 : index
    %c0_61 = arith.constant 0 : index
    %50 = vector.load %arg1[%c0_59, %c0_60, %c0_61] : memref<8x8x256xbf16, #tpu.memory_space<vmem>>, vector<8x8x256xbf16>
    %51 = arith.extf %50 : vector<8x8x256xbf16> to vector<8x8x256xf32>
    %c0_62 = arith.constant 0 : index
    %c0_63 = arith.constant 0 : index
    %52 = vector.load %arg2[%c0_62, %c0_63] : memref<1x256xf32, #tpu.memory_space<vmem>>, vector<1x256xf32>
    %53 = vector.shape_cast %52 : vector<1x256xf32> to vector<1x1x256xf32>
    %54 = vector.broadcast %53 : vector<1x1x256xf32> to vector<8x8x256xf32>
    %55 = arith.mulf %51, %54 : vector<8x8x256xf32>
    %c0_64 = arith.constant 0 : index
    %c0_65 = arith.constant 0 : index
    %56 = vector.load %arg3[%c0_64, %c0_65] : memref<1x256xf32, #tpu.memory_space<vmem>>, vector<1x256xf32>
    %57 = vector.shape_cast %56 : vector<1x256xf32> to vector<1x1x256xf32>
    %58 = vector.broadcast %57 : vector<1x1x256xf32> to vector<8x8x256xf32>
    %59 = arith.addf %55, %58 : vector<8x8x256xf32>
    %60 = vector.extract_strided_slice %59 {offsets = [0, 0, 0], sizes = [8, 8, 64], strides = [1, 1, 1]} : vector<8x8x256xf32> to vector<8x8x64xf32>
    %c0_66 = arith.constant 0 : index
    %c0_67 = arith.constant 0 : index
    %c1_68 = arith.constant 1 : index
    %c8 = arith.constant 8 : index
    %61 = vector.load %arg9[%c0_66, %c0_67, %c1_68, %c8] : memref<4x8x10x80xf32, #tpu.memory_space<vmem>>, vector<1x8x8x64xf32>
    %62 = vector.shape_cast %61 : vector<1x8x8x64xf32> to vector<8x8x64xf32>
    %63 = vector.shape_cast %60 : vector<8x8x64xf32> to vector<1x8x8x64xf32>
    tpu.vector_store %arg9[%c0_66, %c0_67, %c1_68, %c8], %63 {strides = array<i32>} : memref<4x8x10x80xf32, #tpu.memory_space<vmem>>, vector<1x8x8x64xf32>,
    %64 = vector.extract_strided_slice %59 {offsets = [0, 0, 64], sizes = [8, 8, 64], strides = [1, 1, 1]} : vector<8x8x256xf32> to vector<8x8x64xf32>
    %c1_69 = arith.constant 1 : index
    %c0_70 = arith.constant 0 : index
    %c1_71 = arith.constant 1 : index
    %c8_72 = arith.constant 8 : index
    %65 = vector.load %arg9[%c1_69, %c0_70, %c1_71, %c8_72] : memref<4x8x10x80xf32, #tpu.memory_space<vmem>>, vector<1x8x8x64xf32>
    %66 = vector.shape_cast %65 : vector<1x8x8x64xf32> to vector<8x8x64xf32>
    %67 = vector.shape_cast %64 : vector<8x8x64xf32> to vector<1x8x8x64xf32>
    tpu.vector_store %arg9[%c1_69, %c0_70, %c1_71, %c8_72], %67 {strides = array<i32>} : memref<4x8x10x80xf32, #tpu.memory_space<vmem>>, vector<1x8x8x64xf32>,
    %68 = vector.extract_strided_slice %59 {offsets = [0, 0, 128], sizes = [8, 8, 64], strides = [1, 1, 1]} : vector<8x8x256xf32> to vector<8x8x64xf32>
    %c2_73 = arith.constant 2 : index
    %c0_74 = arith.constant 0 : index
    %c1_75 = arith.constant 1 : index
    %c8_76 = arith.constant 8 : index
    %69 = vector.load %arg9[%c2_73, %c0_74, %c1_75, %c8_76] : memref<4x8x10x80xf32, #tpu.memory_space<vmem>>, vector<1x8x8x64xf32>
    %70 = vector.shape_cast %69 : vector<1x8x8x64xf32> to vector<8x8x64xf32>
    %71 = vector.shape_cast %68 : vector<8x8x64xf32> to vector<1x8x8x64xf32>
    tpu.vector_store %arg9[%c2_73, %c0_74, %c1_75, %c8_76], %71 {strides = array<i32>} : memref<4x8x10x80xf32, #tpu.memory_space<vmem>>, vector<1x8x8x64xf32>,
    %72 = vector.extract_strided_slice %59 {offsets = [0, 0, 192], sizes = [8, 8, 64], strides = [1, 1, 1]} : vector<8x8x256xf32> to vector<8x8x64xf32>
    %c3_77 = arith.constant 3 : index
    %c0_78 = arith.constant 0 : index
    %c1_79 = arith.constant 1 : index
    %c8_80 = arith.constant 8 : index
    %73 = vector.load %arg9[%c3_77, %c0_78, %c1_79, %c8_80] : memref<4x8x10x80xf32, #tpu.memory_space<vmem>>, vector<1x8x8x64xf32>
    %74 = vector.shape_cast %73 : vector<1x8x8x64xf32> to vector<8x8x64xf32>
    %75 = vector.shape_cast %72 : vector<8x8x64xf32> to vector<1x8x8x64xf32>
    tpu.vector_store %arg9[%c3_77, %c0_78, %c1_79, %c8_80], %75 {strides = array<i32>} : memref<4x8x10x80xf32, #tpu.memory_space<vmem>>, vector<1x8x8x64xf32>,
    %cst_81 = arith.constant 0.000000e+00 : f32
    %76 = vector.broadcast %cst_81 : f32 to vector<64x256xf32>
    %c3_82 = arith.constant 3 : index
    %c0_83 = arith.constant 0 : index
    %c0_84 = arith.constant 0 : index
    %c0_85 = arith.constant 0 : index
    %77 = vector.load %arg9[%c3_82, %c0_83, %c0_84, %c0_85] : memref<4x8x10x80xf32, #tpu.memory_space<vmem>>, vector<1x8x8x64xf32>
    %78 = vector.shape_cast %77 : vector<1x8x8x64xf32> to vector<8x8x64xf32>
    %c2_86 = arith.constant 2 : index
    %c0_87 = arith.constant 0 : index
    %c0_88 = arith.constant 0 : index
    %c8_89 = arith.constant 8 : index
    %79 = vector.load %arg9[%c2_86, %c0_87, %c0_88, %c8_89] : memref<4x8x10x80xf32, #tpu.memory_space<vmem>>, vector<1x8x8x64xf32>
    %80 = vector.shape_cast %79 : vector<1x8x8x64xf32> to vector<8x8x64xf32>
    %c3_90 = arith.constant 3 : index
    %c0_91 = arith.constant 0 : index
    %c0_92 = arith.constant 0 : index
    %c8_93 = arith.constant 8 : index
    %81 = vector.load %arg9[%c3_90, %c0_91, %c0_92, %c8_93] : memref<4x8x10x80xf32, #tpu.memory_space<vmem>>, vector<1x8x8x64xf32>
    %82 = vector.shape_cast %81 : vector<1x8x8x64xf32> to vector<8x8x64xf32>
    %c2_94 = arith.constant 2 : index
    %c0_95 = arith.constant 0 : index
    %c0_96 = arith.constant 0 : index
    %c16 = arith.constant 16 : index
    %83 = vector.load %arg9[%c2_94, %c0_95, %c0_96, %c16] : memref<4x8x10x80xf32, #tpu.memory_space<vmem>>, vector<1x8x8x64xf32>
    %84 = vector.shape_cast %83 : vector<1x8x8x64xf32> to vector<8x8x64xf32>
    %85 = tpu.concatenate %78, %80, %82, %84 in 2 : vector<8x8x64xf32>, vector<8x8x64xf32>, vector<8x8x64xf32>, vector<8x8x64xf32> -> vector<8x8x256xf32>
    %86 = vector.shape_cast %85 : vector<8x8x256xf32> to vector<64x256xf32>
    %87 = arith.truncf %86 : vector<64x256xf32> to vector<64x256xbf16>
    %c0_97 = arith.constant 0 : index
    %c0_98 = arith.constant 0 : index
    %88 = vector.load %arg4[%c0_97, %c0_98] : memref<1024x256xbf16, #tpu.memory_space<vmem>>, vector<256x256xbf16>
    %cst_99 = arith.constant dense<0.000000e+00> : vector<64x256xf32>
    %89 = tpu.matmul %87, %88, %cst_99 {dimension_numbers = #tpu.dot_dimension_numbers<[1], [0], [0], [1], [0, 0, 1, 1], [], []>} : vector<64x256xbf16>, vector<256x256xbf16>, vector<64x256xf32> -> vector<64x256xf32>
    %90 = arith.addf %76, %89 : vector<64x256xf32>
    %c1_100 = arith.constant 1 : index
    %c0_101 = arith.constant 0 : index
    %c1_102 = arith.constant 1 : index
    %c0_103 = arith.constant 0 : index
    %91 = vector.load %arg9[%c1_100, %c0_101, %c1_102, %c0_103] : memref<4x8x10x80xf32, #tpu.memory_space<vmem>>, vector<1x8x8x64xf32>
    %92 = vector.shape_cast %91 : vector<1x8x8x64xf32> to vector<8x8x64xf32>
    %c0_104 = arith.constant 0 : index
    %c0_105 = arith.constant 0 : index
    %c1_106 = arith.constant 1 : index
    %c8_107 = arith.constant 8 : index
    %93 = vector.load %arg9[%c0_104, %c0_105, %c1_106, %c8_107] : memref<4x8x10x80xf32, #tpu.memory_space<vmem>>, vector<1x8x8x64xf32>
    %94 = vector.shape_cast %93 : vector<1x8x8x64xf32> to vector<8x8x64xf32>
    %c1_108 = arith.constant 1 : index
    %c0_109 = arith.constant 0 : index
    %c1_110 = arith.constant 1 : index
    %c8_111 = arith.constant 8 : index
    %95 = vector.load %arg9[%c1_108, %c0_109, %c1_110, %c8_111] : memref<4x8x10x80xf32, #tpu.memory_space<vmem>>, vector<1x8x8x64xf32>
    %96 = vector.shape_cast %95 : vector<1x8x8x64xf32> to vector<8x8x64xf32>
    %c0_112 = arith.constant 0 : index
    %c0_113 = arith.constant 0 : index
    %c1_114 = arith.constant 1 : index
    %c16_115 = arith.constant 16 : index
    %97 = vector.load %arg9[%c0_112, %c0_113, %c1_114, %c16_115] : memref<4x8x10x80xf32, #tpu.memory_space<vmem>>, vector<1x8x8x64xf32>
    %98 = vector.shape_cast %97 : vector<1x8x8x64xf32> to vector<8x8x64xf32>
    %99 = tpu.concatenate %92, %94, %96, %98 in 2 : vector<8x8x64xf32>, vector<8x8x64xf32>, vector<8x8x64xf32>, vector<8x8x64xf32> -> vector<8x8x256xf32>
    %100 = vector.shape_cast %99 : vector<8x8x256xf32> to vector<64x256xf32>
    %101 = arith.truncf %100 : vector<64x256xf32> to vector<64x256xbf16>
    %c256 = arith.constant 256 : index
    %c0_116 = arith.constant 0 : index
    %102 = vector.load %arg4[%c256, %c0_116] : memref<1024x256xbf16, #tpu.memory_space<vmem>>, vector<256x256xbf16>
    %cst_117 = arith.constant dense<0.000000e+00> : vector<64x256xf32>
    %103 = tpu.matmul %101, %102, %cst_117 {dimension_numbers = #tpu.dot_dimension_numbers<[1], [0], [0], [1], [0, 0, 1, 1], [], []>} : vector<64x256xbf16>, vector<256x256xbf16>, vector<64x256xf32> -> vector<64x256xf32>
    %104 = arith.addf %90, %103 : vector<64x256xf32>
    %c3_118 = arith.constant 3 : index
    %c0_119 = arith.constant 0 : index
    %c1_120 = arith.constant 1 : index
    %c0_121 = arith.constant 0 : index
    %105 = vector.load %arg9[%c3_118, %c0_119, %c1_120, %c0_121] : memref<4x8x10x80xf32, #tpu.memory_space<vmem>>, vector<1x8x8x64xf32>
    %106 = vector.shape_cast %105 : vector<1x8x8x64xf32> to vector<8x8x64xf32>
    %c2_122 = arith.constant 2 : index
    %c0_123 = arith.constant 0 : index
    %c1_124 = arith.constant 1 : index
    %c8_125 = arith.constant 8 : index
    %107 = vector.load %arg9[%c2_122, %c0_123, %c1_124, %c8_125] : memref<4x8x10x80xf32, #tpu.memory_space<vmem>>, vector<1x8x8x64xf32>
    %108 = vector.shape_cast %107 : vector<1x8x8x64xf32> to vector<8x8x64xf32>
    %c3_126 = arith.constant 3 : index
    %c0_127 = arith.constant 0 : index
    %c1_128 = arith.constant 1 : index
    %c8_129 = arith.constant 8 : index
    %109 = vector.load %arg9[%c3_126, %c0_127, %c1_128, %c8_129] : memref<4x8x10x80xf32, #tpu.memory_space<vmem>>, vector<1x8x8x64xf32>
    %110 = vector.shape_cast %109 : vector<1x8x8x64xf32> to vector<8x8x64xf32>
    %c2_130 = arith.constant 2 : index
    %c0_131 = arith.constant 0 : index
    %c1_132 = arith.constant 1 : index
    %c16_133 = arith.constant 16 : index
    %111 = vector.load %arg9[%c2_130, %c0_131, %c1_132, %c16_133] : memref<4x8x10x80xf32, #tpu.memory_space<vmem>>, vector<1x8x8x64xf32>
    %112 = vector.shape_cast %111 : vector<1x8x8x64xf32> to vector<8x8x64xf32>
    %113 = tpu.concatenate %106, %108, %110, %112 in 2 : vector<8x8x64xf32>, vector<8x8x64xf32>, vector<8x8x64xf32>, vector<8x8x64xf32> -> vector<8x8x256xf32>
    %114 = vector.shape_cast %113 : vector<8x8x256xf32> to vector<64x256xf32>
    %115 = arith.truncf %114 : vector<64x256xf32> to vector<64x256xbf16>
    %c512 = arith.constant 512 : index
    %c0_134 = arith.constant 0 : index
    %116 = vector.load %arg4[%c512, %c0_134] : memref<1024x256xbf16, #tpu.memory_space<vmem>>, vector<256x256xbf16>
    %cst_135 = arith.constant dense<0.000000e+00> : vector<64x256xf32>
    %117 = tpu.matmul %115, %116, %cst_135 {dimension_numbers = #tpu.dot_dimension_numbers<[1], [0], [0], [1], [0, 0, 1, 1], [], []>} : vector<64x256xbf16>, vector<256x256xbf16>, vector<64x256xf32> -> vector<64x256xf32>
    %118 = arith.addf %104, %117 : vector<64x256xf32>
    %c1_136 = arith.constant 1 : index
    %c0_137 = arith.constant 0 : index
    %c2_138 = arith.constant 2 : index
    %c0_139 = arith.constant 0 : index
    %119 = vector.load %arg9[%c1_136, %c0_137, %c2_138, %c0_139] : memref<4x8x10x80xf32, #tpu.memory_space<vmem>>, vector<1x8x8x64xf32>
    %120 = vector.shape_cast %119 : vector<1x8x8x64xf32> to vector<8x8x64xf32>
    %c0_140 = arith.constant 0 : index
    %c0_141 = arith.constant 0 : index
    %c2_142 = arith.constant 2 : index
    %c8_143 = arith.constant 8 : index
    %121 = vector.load %arg9[%c0_140, %c0_141, %c2_142, %c8_143] : memref<4x8x10x80xf32, #tpu.memory_space<vmem>>, vector<1x8x8x64xf32>
    %122 = vector.shape_cast %121 : vector<1x8x8x64xf32> to vector<8x8x64xf32>
    %c1_144 = arith.constant 1 : index
    %c0_145 = arith.constant 0 : index
    %c2_146 = arith.constant 2 : index
    %c8_147 = arith.constant 8 : index
    %123 = vector.load %arg9[%c1_144, %c0_145, %c2_146, %c8_147] : memref<4x8x10x80xf32, #tpu.memory_space<vmem>>, vector<1x8x8x64xf32>
    %124 = vector.shape_cast %123 : vector<1x8x8x64xf32> to vector<8x8x64xf32>
    %c0_148 = arith.constant 0 : index
    %c0_149 = arith.constant 0 : index
    %c2_150 = arith.constant 2 : index
    %c16_151 = arith.constant 16 : index
    %125 = vector.load %arg9[%c0_148, %c0_149, %c2_150, %c16_151] : memref<4x8x10x80xf32, #tpu.memory_space<vmem>>, vector<1x8x8x64xf32>
    %126 = vector.shape_cast %125 : vector<1x8x8x64xf32> to vector<8x8x64xf32>
    %127 = tpu.concatenate %120, %122, %124, %126 in 2 : vector<8x8x64xf32>, vector<8x8x64xf32>, vector<8x8x64xf32>, vector<8x8x64xf32> -> vector<8x8x256xf32>
    %128 = vector.shape_cast %127 : vector<8x8x256xf32> to vector<64x256xf32>
    %129 = arith.truncf %128 : vector<64x256xf32> to vector<64x256xbf16>
    %c768 = arith.constant 768 : index
    %c0_152 = arith.constant 0 : index
    %130 = vector.load %arg4[%c768, %c0_152] : memref<1024x256xbf16, #tpu.memory_space<vmem>>, vector<256x256xbf16>
    %cst_153 = arith.constant dense<0.000000e+00> : vector<64x256xf32>
    %131 = tpu.matmul %129, %130, %cst_153 {dimension_numbers = #tpu.dot_dimension_numbers<[1], [0], [0], [1], [0, 0, 1, 1], [], []>} : vector<64x256xbf16>, vector<256x256xbf16>, vector<64x256xf32> -> vector<64x256xf32>
    %132 = arith.addf %118, %131 : vector<64x256xf32>
    %c0_154 = arith.constant 0 : index
    %c0_155 = arith.constant 0 : index
    %133 = vector.load %arg5[%c0_154, %c0_155] : memref<1x256xf32, #tpu.memory_space<vmem>>, vector<1x256xf32>
    %134 = vector.broadcast %133 : vector<1x256xf32> to vector<64x256xf32>
    %135 = arith.addf %132, %134 : vector<64x256xf32>
    %c0_156 = arith.constant 0 : index
    %136 = memref.load %arg6[%c0_156] : memref<1xf32, #tpu.memory_space<smem>>
    %cst_157 = arith.constant 0.000000e+00 : f32
    %137 = vector.broadcast %cst_157 : f32 to vector<64x256xf32>
    %138 = arith.cmpf ogt, %135, %137 : vector<64x256xf32>
    %139 = vector.broadcast %136 : f32 to vector<64x256xf32>
    %140 = arith.mulf %139, %135 : vector<64x256xf32>
    %141 = arith.select %138, %135, %140 : vector<64x256xi1>, vector<64x256xf32>
    %cst_158 = arith.constant dense<0.000000e+00> : vector<256xf32>
    %142 = vector.multi_reduction <add>, %141, %cst_158 [0] : vector<64x256xf32> to vector<256xf32>
    %143 = vector.shape_cast %142 : vector<256xf32> to vector<1x256xf32>
    %144 = arith.mulf %141, %141 : vector<64x256xf32>
    %cst_159 = arith.constant dense<0.000000e+00> : vector<256xf32>
    %145 = vector.multi_reduction <add>, %144, %cst_159 [0] : vector<64x256xf32> to vector<256xf32>
    %146 = vector.shape_cast %145 : vector<256xf32> to vector<1x256xf32>
    %147 = tpu.concatenate %143, %146 in 0 : vector<1x256xf32>, vector<1x256xf32> -> vector<2x256xf32>
    %148 = vector.shape_cast %147 : vector<2x256xf32> to vector<1x2x256xf32>
    %c0_160 = arith.constant 0 : index
    %c0_161 = arith.constant 0 : index
    %c0_162 = arith.constant 0 : index
    %149 = vector.load %arg8[%c0_160, %c0_161, %c0_162] : memref<1x2x256xf32, #tpu.memory_space<vmem>>, vector<1x2x256xf32>
    tpu.vector_store %arg8[%c0_160, %c0_161, %c0_162], %148 {strides = array<i32>} : memref<1x2x256xf32, #tpu.memory_space<vmem>>, vector<1x2x256xf32>,
    %150 = vector.shape_cast %141 : vector<64x256xf32> to vector<8x8x256xf32>
    %c0_163 = arith.constant 0 : index
    %c0_164 = arith.constant 0 : index
    %c0_165 = arith.constant 0 : index
    %151 = vector.load %arg7[%c0_163, %c0_164, %c0_165] : memref<8x8x256xf32, #tpu.memory_space<vmem>>, vector<8x8x256xf32>
    tpu.vector_store %arg7[%c0_163, %c0_164, %c0_165], %150 {strides = array<i32>} : memref<8x8x256xf32, #tpu.memory_space<vmem>>, vector<8x8x256xf32>,
    return
  }
  func.func @transform_0(%arg0: i32) -> (i32, i32, i32) {
    %c0_i32 = arith.constant 0 : i32
    %c0_i32_0 = arith.constant 0 : i32
    %c0_i32_1 = arith.constant 0 : i32
    return %arg0, %c0_i32, %c0_i32_0 : i32, i32, i32
  }
  func.func @transform_1(%arg0: i32) -> (i32, i32) {
    %c0_i32 = arith.constant 0 : i32
    %c0_i32_0 = arith.constant 0 : i32
    %c0_i32_1 = arith.constant 0 : i32
    return %c0_i32, %c0_i32_0 : i32, i32
  }
  func.func @transform_2(%arg0: i32) -> (i32, i32) {
    %c0_i32 = arith.constant 0 : i32
    %c0_i32_0 = arith.constant 0 : i32
    %c0_i32_1 = arith.constant 0 : i32
    return %c0_i32, %c0_i32_0 : i32, i32
  }
  func.func @transform_3(%arg0: i32) -> (i32, i32) {
    %c0_i32 = arith.constant 0 : i32
    %c0_i32_0 = arith.constant 0 : i32
    %c0_i32_1 = arith.constant 0 : i32
    return %c0_i32, %c0_i32_0 : i32, i32
  }
  func.func @transform_4(%arg0: i32) -> (i32, i32) {
    %c0_i32 = arith.constant 0 : i32
    %c0_i32_0 = arith.constant 0 : i32
    %c0_i32_1 = arith.constant 0 : i32
    return %c0_i32, %c0_i32_0 : i32, i32
  }
  func.func @transform_5(%arg0: i32) -> i32 {
    %c0_i32 = arith.constant 0 : i32
    %c0_i32_0 = arith.constant 0 : i32
    return %c0_i32 : i32
  }
  func.func @transform_6(%arg0: i32) -> (i32, i32, i32) {
    %c0_i32 = arith.constant 0 : i32
    %c0_i32_0 = arith.constant 0 : i32
    %c0_i32_1 = arith.constant 0 : i32
    return %arg0, %c0_i32, %c0_i32_0 : i32, i32, i32
  }
  func.func @transform_7(%arg0: i32) -> (i32, i32, i32) {
    %c0_i32 = arith.constant 0 : i32
    %c0_i32_0 = arith.constant 0 : i32
    %c0_i32_1 = arith.constant 0 : i32
    return %arg0, %c0_i32, %c0_i32_0 : i32, i32, i32
  }
}

</mosaic_0001>

<bundles_post_ra>
// kernel: tile.28
= control target key start
LH: loop header
LB: loop body
LE: loop exit
PB: predicated region body
PF: predicated region fallthrough
CT: control target
= control target key end

     0   :  { %s64_s0 = inlined_call_operand.vmem [shape: f32[8], index: 0, kind: input, shape index: {}]   ;;  %s65_s1 = inlined_call_operand.vmem [shape: f32[64,8], index: 1, kind: output, shape index: {}]  }
   0x1   :  { %v4_v0 = vld [vmem:[%s64_s0] ss:$0 sm:$0xff] }
   0x2   :  { %5 = vst [vmem:[%s65_s1] sm:$0xff] %v4_v0  ;;  %20 = vst [vmem:[%s65_s1 + $0x8] sm:$0xff] %v4_v0 }
   0x3   :  { %21 = vst [vmem:[%s65_s1 + $0x10] sm:$0xff] %v4_v0  ;;  %22 = vst [vmem:[%s65_s1 + $0x18] sm:$0xff] %v4_v0 }
   0x4   :  { %23 = vst [vmem:[%s65_s1 + $0x20] sm:$0xff] %v4_v0  ;;  %24 = vst [vmem:[%s65_s1 + $0x28] sm:$0xff] %v4_v0 }
   0x5   :  { %25 = vst [vmem:[%s65_s1 + $0x30] sm:$0xff] %v4_v0  ;;  %26 = vst [vmem:[%s65_s1 + $0x38] sm:$0xff] %v4_v0 }

// kernel: tile.29
= control target key start
LH: loop header
LB: loop body
LE: loop exit
PB: predicated region body
PF: predicated region fallthrough
CT: control target
= control target key end

     0   :  { %vm6_vm0 = vcmask 1043458   ;;  %s11_s6 = smov 3  ;;  %s14_s7 = smov 12  ;;  %vm8_vm1 = vcmask 64512   ;;  %vm20_vm2 = vcmask 1048512   ;;  %vm32_vm3 = vcmask 982912   ;;  %s412_s0 = inlined_call_operand.vmem [shape: f32[64,8], index: 0, kind: input, shape index: {}]   ;;  %s413_s1 = inlined_call_operand.vmem [shape: f32[1,512], index: 1, kind: output, shape index: {}]  }
   0x1   :  { %v215_v0 = vld [vmem:[%s412_s0 + $0xf] ss:$16 sm:%s11_s6]   ;;  %s35_s12 = smov 3  ;;  %s38_s15 = smov 12  ;;  %vm44_vm4 = vcmask 917312   ;;  %vm56_vm5 = vcmask 851712  }
   0x2   :  { %v216_v1 = vld [vmem:[%s412_s0 + $0xf] ss:$16 sm:%s14_s7]   ;;  %v219_v3 = vld [vmem:[%s412_s0 + $0xd] ss:$16 sm:%s35_s12]   ;;  %s263_s16 = smov 120   ;;  %s23_s19 = smov 3 }
   0x3   :  { %v17_v2 = vsel %vm6_vm0, %v216_v1, %v215_v0  ;;  %v220_v4 = vld [vmem:[%s412_s0 + $0xd] ss:$16 sm:%s38_s15]   ;;  %s26_s20 = smov 12  ;;  %v217_v6 = vld [vmem:[%s412_s0 + $0xe] ss:$16 sm:%s23_s19]   ;;  %s47_s25 = smov 3 }
   0x4   :  { %18 = vrot.lane.b32.xlu0 %v17_v2, %s263_s16  ;;  %v41_v5 = vsel %vm6_vm0, %v220_v4, %v219_v3  ;;  %v218_v7 = vld [vmem:[%s412_s0 + $0xe] ss:$16 sm:%s26_s20]   ;;  %s264_s26 = smov 104   ;;  %s50_s29 = smov 12  ;;  %vm68_vm6 = vcmask 786112   ;;  %vm80_vm7 = vcmask 720512  }
   0x5   :  { %42 = vrot.lane.b32.xlu1 %v41_v5, %s264_s26  ;;  %v29_v8 = vsel %vm6_vm0, %v218_v7, %v217_v6  ;;  %v221_v9 = vld [vmem:[%s412_s0 + $0xc] ss:$16 sm:%s47_s25]   ;;  %s59_s3 = smov 3  ;;  %s62_s4 = smov 12  ;;  %vm92_vm8 = vcmask 654912   ;;  %vm104_vm9 = vcmask 589312  }
   0x6   :  { %v222_v10 = vld [vmem:[%s412_s0 + $0xc] ss:$16 sm:%s50_s29]   ;;  %s265_s5 = smov 112   ;;  %v223_v12 = vld [vmem:[%s412_s0 + $0xb] ss:$16 sm:%s59_s3]   ;;  %s71_s8 = smov 3 }
   0x7   :  { %v53_v11 = vsel %vm6_vm0, %v222_v10, %v221_v9  ;;  %v224_v13 = vld [vmem:[%s412_s0 + $0xb] ss:$16 sm:%s62_s4]   ;;  %v225_v14 = vld [vmem:[%s412_s0 + $0xa] ss:$16 sm:%s71_s8]   ;;  %s74_s13 = smov 12  ;;  %s266_s14 = smov 96  }
   0x8   :  { %30 = vrot.lane.b32.xlu0 %v29_v8, %s265_s5  ;;  %v65_v15 = vsel %vm6_vm0, %v224_v13, %v223_v12  ;;  %v226_v16 = vld [vmem:[%s412_s0 + $0xa] ss:$16 sm:%s74_s13]   ;;  %s83_s17 = smov 3  ;;  %s86_s18 = smov 12  ;;  %vm116_vm10 = vcmask 523712   ;;  %vm128_vm11 = vcmask 458112  }
   0x9   :  { %54 = vrot.lane.b32.xlu1 %v53_v11, %s266_s14  ;;  %v77_v17 = vsel %vm6_vm0, %v226_v16, %v225_v14  ;;  %v227_v18 = vld [vmem:[%s412_s0 + $0x9] ss:$16 sm:%s83_s17]   ;;  %s95_s23 = smov 3  ;;  %s267_s24 = smov 88   ;;  %vm140_vm12 = vcmask 392512   ;;  %vm152_vm13 = vcmask 326912  }
   0xa   :  { %v228_v19 = vld [vmem:[%s412_s0 + $0x9] ss:$16 sm:%s86_s18]   ;;  %v229_v20 = vld [vmem:[%s412_s0 + $0x8] ss:$16 sm:%s95_s23]   ;;  %s98_s27 = smov 12  ;;  %s107_s30 = smov 3 }
   0xb   :  { %v89_v21 = vsel %vm6_vm0, %v228_v19, %v227_v18  ;;  %v230_v22 = vld [vmem:[%s412_s0 + $0x8] ss:$16 sm:%s98_s27]   ;;  %s110_s2 = smov 12  ;;  %s268_s3 = smov 80   ;;  %v231_v23 = vld [vmem:[%s412_s0 + $0x7] ss:$16 sm:%s107_s30]  }
   0xc   :  { %66 = vrot.lane.b32.xlu0 %v65_v15, %s267_s24  ;;  %s119_s6 = smov 3  ;;  %v101_v24 = vsel %vm6_vm0, %v230_v22, %v229_v20  ;;  %v232_v25 = vld [vmem:[%s412_s0 + $0x7] ss:$16 sm:%s110_s2]   ;;  %s122_s11 = smov 12  ;;  %vm164_vm14 = vcmask 261312   ;;  %vm176_vm15 = vcmask 195712  }
   0xd   :  { %78 = vrot.lane.b32.xlu1 %v77_v17, %s268_s3  ;;  %v233_v26 = vld [vmem:[%s412_s0 + $0x6] ss:$16 sm:%s119_s6]   ;;  %s269_s12 = smov 72   ;;  %s131_s15 = smov 3  ;;  %v113_v28 = vsel %vm6_vm0, %v232_v25, %v231_v23 }
   0xe   :  { %v234_v27 = vld [vmem:[%s412_s0 + $0x6] ss:$16 sm:%s122_s11]   ;;  %s134_s16 = smov 12  ;;  %v235_v29 = vld [vmem:[%s412_s0 + $0x5] ss:$16 sm:%s131_s15]   ;;  %s143_s19 = smov 3 }
   0xf   :  { %s270_s20 = smov 64   ;;  %v236_v30 = vld [vmem:[%s412_s0 + $0x5] ss:$16 sm:%s134_s16]   ;;  %s146_s23 = smov 12  ;;  %v125_v31 = vsel %vm6_vm0, %v234_v27, %v233_v26  ;;  %v237_v32 = vld [vmem:[%s412_s0 + $0x4] ss:$16 sm:%s143_s19]  }
  0x10   :  { %90 = vrot.lane.b32.xlu0 %v89_v21, %s269_s12  ;;  %s155_s26 = smov 3  ;;  %s158_s27 = smov 12  ;;  %v238_v33 = vld [vmem:[%s412_s0 + $0x4] ss:$16 sm:%s146_s23]   ;;  %v137_v34 = vsel %vm6_vm0, %v236_v30, %v235_v29 }
  0x11   :  { %102 = vrot.lane.b32.xlu1 %v101_v24, %s270_s20  ;;  %s271_s28 = smov 56   ;;  %s167_s2 = smov 3  ;;  %v239_v35 = vld [vmem:[%s412_s0 + $0x3] ss:$16 sm:%s155_s26]   ;;  %v149_v37 = vsel %vm6_vm0, %v238_v33, %v237_v32 }
  0x12   :  { %s170_s5 = smov 12  ;;  %s272_s6 = smov 48   ;;  %v240_v36 = vld [vmem:[%s412_s0 + $0x3] ss:$16 sm:%s158_s27]   ;;  %v241_v38 = vld [vmem:[%s412_s0 + $0x2] ss:$16 sm:%s167_s2]  }
  0x13   :  { %s179_s9 = smov 3  ;;  %v242_v39 = vld [vmem:[%s412_s0 + $0x2] ss:$16 sm:%s170_s5]   ;;  %s182_s14 = smov 12  ;;  %v161_v41 = vsel %vm6_vm0, %v240_v36, %v239_v35 }
  0x14   :  { %114 = vrot.lane.b32.xlu0 %v113_v28, %s271_s28  ;;  %s2_s15 = smov 3  ;;  %s273_s16 = smov 40   ;;  %v243_v42 = vld [vmem:[%s412_s0 + $0x1] ss:$16 sm:%s179_s9]   ;;  %v173_v46 = vsel %vm6_vm0, %v242_v39, %v241_v38 }
  0x15   :  { %126 = vrot.lane.b32.xlu1 %v125_v31, %s272_s6  ;;  %v3_v40 = vld [vmem:[%s412_s0] ss:$16 sm:%s2_s15]   ;;  %s4_s19 = smov 12  ;;  %s274_s24 = smov 32  }
  0x16   :  { %v5_v43 = vld [vmem:[%s412_s0] ss:$16 sm:%s4_s19]   ;;  %v244_v44 = vld [vmem:[%s412_s0 + $0x1] ss:$16 sm:%s182_s14]   ;;  %s275_s0 = smov 24   ;;  %s276_s27 = smov 16  }
  0x17   :  { %v7_v45 = vsel %vm6_vm0, %v5_v43, %v3_v40  ;;  %v185_v47 = vsel %vm6_vm0, %v244_v44, %v243_v42  ;;  %s277_s28 = smov 8   ;;  %vm188_vm0 = vcmask 130112  }
  0x18   :  { %138 = vrot.lane.b32.xlu0 %v137_v34, %s273_s16  ;;  %9 = vst.msk [vmem:[#allocation0] ss:$8 sm:$0xf] %vm8_vm1, %v7_v45  }
  0x19   :  { %150 = vrot.lane.b32.xlu1 %v149_v37, %s274_s24 }
  0x1c   :  { %162 = vrot.lane.b32.xlu0 %v161_v41, %s275_s0 }
  0x1d   :  { %174 = vrot.lane.b32.xlu1 %v173_v46, %s276_s27 }
  0x20   :  { %186 = vrot.lane.b32.xlu0 %v185_v47, %s277_s28 }
  0x76   :  { %v19_v48 = vpop.permute.xlu0 %18  }
  0x77   :  { %21 = vst.msk [vmem:[#allocation0] ss:$8 sm:$0xf] %vm20_vm2, %v19_v48   ;;  %v43_v49 = vpop.permute.xlu1 %42  }
  0x7a   :  { %v31_v50 = vpop.permute.xlu0 %30  }
  0x7b   :  { %33 = vst.msk [vmem:[#allocation0] ss:$8 sm:$0xf] %vm32_vm3, %v31_v50   ;;  %v55_v51 = vpop.permute.xlu1 %54  }
  0x7c   :  { %45 = vst.msk [vmem:[#allocation0] ss:$8 sm:$0xf] %vm44_vm4, %v43_v49  }
  0x7d   :  { %57 = vst.msk [vmem:[#allocation0] ss:$8 sm:$0xf] %vm56_vm5, %v55_v51  }
  0x7e   :  { %v67_v52 = vpop.permute.xlu0 %66  }
  0x7f   :  { %69 = vst.msk [vmem:[#allocation0] ss:$8 sm:$0xf] %vm68_vm6, %v67_v52   ;;  %v79_v53 = vpop.permute.xlu1 %78  }
  0x80   :  { %81 = vst.msk [vmem:[#allocation0] ss:$8 sm:$0xf] %vm80_vm7, %v79_v53  }
  0x82   :  { %v91_v54 = vpop.permute.xlu0 %90  }
  0x83   :  { %93 = vst.msk [vmem:[#allocation0] ss:$8 sm:$0xf] %vm92_vm8, %v91_v54   ;;  %v103_v55 = vpop.permute.xlu1 %102  }
  0x84   :  { %105 = vst.msk [vmem:[#allocation0] ss:$8 sm:$0xf] %vm104_vm9, %v103_v55  }
  0x86   :  { %v115_v56 = vpop.permute.xlu0 %114  }
  0x87   :  { %117 = vst.msk [vmem:[#allocation0] ss:$8 sm:$0xf] %vm116_vm10, %v115_v56   ;;  %v127_v57 = vpop.permute.xlu1 %126  }
  0x88   :  { %129 = vst.msk [vmem:[#allocation0] ss:$8 sm:$0xf] %vm128_vm11, %v127_v57  }
  0x8a   :  { %v139_v58 = vpop.permute.xlu0 %138  }
  0x8b   :  { %141 = vst.msk [vmem:[#allocation0] ss:$8 sm:$0xf] %vm140_vm12, %v139_v58   ;;  %v151_v59 = vpop.permute.xlu1 %150  }
  0x8c   :  { %153 = vst.msk [vmem:[#allocation0] ss:$8 sm:$0xf] %vm152_vm13, %v151_v59  }
  0x8e   :  { %v163_v60 = vpop.permute.xlu0 %162  }
  0x8f   :  { %165 = vst.msk [vmem:[#allocation0] ss:$8 sm:$0xf] %vm164_vm14, %v163_v60   ;;  %v175_v61 = vpop.permute.xlu1 %174  }
  0x90   :  { %177 = vst.msk [vmem:[#allocation0] ss:$8 sm:$0xf] %vm176_vm15, %v175_v61  }
  0x92   :  { %v187_v62 = vpop.permute.xlu0 %186  }
  0x93   :  { %189 = vst.msk [vmem:[#allocation0] ss:$8 sm:$0xf] %vm188_vm0, %v187_v62  }
  0x9a   :  { %v193_v63 = vld [vmem:[#allocation0] sm:$0x1]  ;;  %v197_v0 = vld [vmem:[#allocation0 + $0x8] sm:$0x1]  ;;  %v202_v1 = vld [vmem:[#allocation0 + $0x10] sm:$0x1] }
  0x9b   :  { %195 = vst [vmem:[%s413_s1] sm:$0x1] %v193_v63  ;;  %245 = vst [vmem:[%s413_s1 + $0x1] sm:$0x1] %v197_v0  ;;  %v208_v2 = vld [vmem:[#allocation0 + $0x18] sm:$0x1] }
  0x9c   :  { %246 = vst [vmem:[%s413_s1 + $0x2] sm:$0x1] %v202_v1  ;;  %247 = vst [vmem:[%s413_s1 + $0x3] sm:$0x1] %v208_v2 }

// kernel: tile.33
= control target key start
LH: loop header
LB: loop body
LE: loop exit
PB: predicated region body
PF: predicated region fallthrough
CT: control target
= control target key end

     0   :  { %s40_s0 = inlined_call_operand.vmem [shape: f32[8], index: 0, kind: input, shape index: {}]   ;;  %s41_s1 = inlined_call_operand.vmem [shape: f32[32,8], index: 1, kind: output, shape index: {}]  }
   0x1   :  { %v4_v0 = vld [vmem:[%s40_s0] ss:$0 sm:$0xff] }
   0x2   :  { %5 = vst [vmem:[%s41_s1] sm:$0xff] %v4_v0  ;;  %12 = vst [vmem:[%s41_s1 + $0x8] sm:$0xff] %v4_v0 }
   0x3   :  { %13 = vst [vmem:[%s41_s1 + $0x10] sm:$0xff] %v4_v0  ;;  %14 = vst [vmem:[%s41_s1 + $0x18] sm:$0xff] %v4_v0 }

// kernel: tile.34
= control target key start
LH: loop header
LB: loop body
LE: loop exit
PB: predicated region body
PF: predicated region fallthrough
CT: control target
= control target key end

     0   :  { %s7_s6 = smov 3  ;;  %s21_s9 = smov 3  ;;  %vm4_vm0 = vcmask 64512   ;;  %vm11_vm1 = vcmask 1048512   ;;  %vm18_vm2 = vcmask 982912   ;;  %vm25_vm3 = vcmask 917312   ;;  %s232_s0 = inlined_call_operand.vmem [shape: f32[32,8], index: 0, kind: input, shape index: {}]   ;;  %s233_s1 = inlined_call_operand.vmem [shape: f32[1,256], index: 1, kind: output, shape index: {}]  }
   0x1   :  { %v122_v0 = vld [vmem:[%s232_s0 + $0xf] ss:$16 sm:%s7_s6]   ;;  %s153_s10 = smov 120   ;;  %v124_v1 = vld [vmem:[%s232_s0 + $0xd] ss:$16 sm:%s21_s9]   ;;  %s14_s13 = smov 3 }
   0x2   :  { %9 = vrot.lane.b32.xlu0 %v122_v0, %s153_s10  ;;  %s154_s14 = smov 104   ;;  %v123_v2 = vld [vmem:[%s232_s0 + $0xe] ss:$16 sm:%s14_s13]   ;;  %s28_s17 = smov 3  ;;  %vm32_vm4 = vcmask 851712   ;;  %vm39_vm5 = vcmask 786112  }
   0x3   :  { %23 = vrot.lane.b32.xlu1 %v124_v1, %s154_s14  ;;  %v125_v3 = vld [vmem:[%s232_s0 + $0xc] ss:$16 sm:%s28_s17]   ;;  %s35_s20 = smov 3  ;;  %s42_s21 = smov 3  ;;  %vm46_vm6 = vcmask 720512   ;;  %vm53_vm7 = vcmask 654912  }
   0x4   :  { %s155_s22 = smov 112   ;;  %s156_s23 = smov 96   ;;  %v126_v4 = vld [vmem:[%s232_s0 + $0xb] ss:$16 sm:%s35_s20]   ;;  %v127_v5 = vld [vmem:[%s232_s0 + $0xa] ss:$16 sm:%s42_s21]  }
   0x5   :  { %s49_s28 = smov 3  ;;  %s56_s29 = smov 3  ;;  %vm60_vm8 = vcmask 589312   ;;  %vm67_vm9 = vcmask 523712   ;;  %vm74_vm10 = vcmask 458112   ;;  %vm81_vm11 = vcmask 392512  }
   0x6   :  { %16 = vrot.lane.b32.xlu0 %v123_v2, %s155_s22  ;;  %s157_s30 = smov 88   ;;  %s158_s2 = smov 80   ;;  %v128_v6 = vld [vmem:[%s232_s0 + $0x9] ss:$16 sm:%s49_s28]   ;;  %vm88_vm12 = vcmask 326912   ;;  %vm95_vm13 = vcmask 261312  }
   0x7   :  { %30 = vrot.lane.b32.xlu1 %v125_v3, %s156_s23  ;;  %v129_v7 = vld [vmem:[%s232_s0 + $0x8] ss:$16 sm:%s56_s29]   ;;  %s63_s7 = smov 3  ;;  %s70_s8 = smov 3  ;;  %vm102_vm14 = vcmask 195712   ;;  %vm109_vm15 = vcmask 130112  }
   0x8   :  { %s159_s9 = smov 72   ;;  %s160_s10 = smov 64   ;;  %v130_v8 = vld [vmem:[%s232_s0 + $0x7] ss:$16 sm:%s63_s7]   ;;  %v131_v9 = vld [vmem:[%s232_s0 + $0x6] ss:$16 sm:%s70_s8]  }
   0x9   :  { %s2_s13 = smov 3  ;;  %s77_s16 = smov 3 }
   0xa   :  { %37 = vrot.lane.b32.xlu0 %v126_v4, %s157_s30  ;;  %v3_v10 = vld [vmem:[%s232_s0] ss:$16 sm:%s2_s13]   ;;  %s84_s19 = smov 3  ;;  %s161_s20 = smov 56  }
   0xb   :  { %44 = vrot.lane.b32.xlu1 %v127_v5, %s158_s2  ;;  %5 = vst.msk [vmem:[#allocation0] ss:$8 sm:$0x3] %vm4_vm0, %v3_v10   ;;  %s162_s21 = smov 48   ;;  %v132_v11 = vld [vmem:[%s232_s0 + $0x5] ss:$16 sm:%s77_s16]  }
   0xc   :  { %v133_v12 = vld [vmem:[%s232_s0 + $0x4] ss:$16 sm:%s84_s19]   ;;  %s91_s26 = smov 3  ;;  %s98_s27 = smov 3 }
   0xd   :  { %s163_s28 = smov 40   ;;  %s164_s29 = smov 32   ;;  %v134_v13 = vld [vmem:[%s232_s0 + $0x3] ss:$16 sm:%s91_s26]   ;;  %v135_v14 = vld [vmem:[%s232_s0 + $0x2] ss:$16 sm:%s98_s27]  }
   0xe   :  { %51 = vrot.lane.b32.xlu0 %v128_v6, %s159_s9  ;;  %s105_s5 = smov 3  ;;  %s165_s6 = smov 24  }
   0xf   :  { %58 = vrot.lane.b32.xlu1 %v129_v7, %s160_s10  ;;  %s166_s7 = smov 16   ;;  %v136_v15 = vld [vmem:[%s232_s0 + $0x1] ss:$16 sm:%s105_s5]   ;;  %s167_s0 = smov 8  }
  0x12   :  { %65 = vrot.lane.b32.xlu0 %v130_v8, %s161_s20 }
  0x13   :  { %72 = vrot.lane.b32.xlu1 %v131_v9, %s162_s21 }
  0x16   :  { %79 = vrot.lane.b32.xlu0 %v132_v11, %s163_s28 }
  0x17   :  { %86 = vrot.lane.b32.xlu1 %v133_v12, %s164_s29 }
  0x1a   :  { %93 = vrot.lane.b32.xlu0 %v134_v13, %s165_s6 }
  0x1b   :  { %100 = vrot.lane.b32.xlu1 %v135_v14, %s166_s7 }
  0x1e   :  { %107 = vrot.lane.b32.xlu0 %v136_v15, %s167_s0 }
  0x74   :  { %v10_v16 = vpop.permute.xlu0 %9  }
  0x75   :  { %12 = vst.msk [vmem:[#allocation0] ss:$8 sm:$0x3] %vm11_vm1, %v10_v16   ;;  %v24_v17 = vpop.permute.xlu1 %23  }
  0x78   :  { %v17_v18 = vpop.permute.xlu0 %16  }
  0x79   :  { %19 = vst.msk [vmem:[#allocation0] ss:$8 sm:$0x3] %vm18_vm2, %v17_v18   ;;  %v31_v19 = vpop.permute.xlu1 %30  }
  0x7a   :  { %26 = vst.msk [vmem:[#allocation0] ss:$8 sm:$0x3] %vm25_vm3, %v24_v17  }
  0x7b   :  { %33 = vst.msk [vmem:[#allocation0] ss:$8 sm:$0x3] %vm32_vm4, %v31_v19  }
  0x7c   :  { %v38_v20 = vpop.permute.xlu0 %37  }
  0x7d   :  { %40 = vst.msk [vmem:[#allocation0] ss:$8 sm:$0x3] %vm39_vm5, %v38_v20   ;;  %v45_v21 = vpop.permute.xlu1 %44  }
  0x7e   :  { %47 = vst.msk [vmem:[#allocation0] ss:$8 sm:$0x3] %vm46_vm6, %v45_v21  }
  0x80   :  { %v52_v22 = vpop.permute.xlu0 %51  }
  0x81   :  { %54 = vst.msk [vmem:[#allocation0] ss:$8 sm:$0x3] %vm53_vm7, %v52_v22   ;;  %v59_v23 = vpop.permute.xlu1 %58  }
  0x82   :  { %61 = vst.msk [vmem:[#allocation0] ss:$8 sm:$0x3] %vm60_vm8, %v59_v23  }
  0x84   :  { %v66_v24 = vpop.permute.xlu0 %65  }
  0x85   :  { %68 = vst.msk [vmem:[#allocation0] ss:$8 sm:$0x3] %vm67_vm9, %v66_v24   ;;  %v73_v25 = vpop.permute.xlu1 %72  }
  0x86   :  { %75 = vst.msk [vmem:[#allocation0] ss:$8 sm:$0x3] %vm74_vm10, %v73_v25  }
  0x88   :  { %v80_v26 = vpop.permute.xlu0 %79  }
  0x89   :  { %82 = vst.msk [vmem:[#allocation0] ss:$8 sm:$0x3] %vm81_vm11, %v80_v26   ;;  %v87_v27 = vpop.permute.xlu1 %86  }
  0x8a   :  { %89 = vst.msk [vmem:[#allocation0] ss:$8 sm:$0x3] %vm88_vm12, %v87_v27  }
  0x8c   :  { %v94_v28 = vpop.permute.xlu0 %93  }
  0x8d   :  { %96 = vst.msk [vmem:[#allocation0] ss:$8 sm:$0x3] %vm95_vm13, %v94_v28   ;;  %v101_v29 = vpop.permute.xlu1 %100  }
  0x8e   :  { %103 = vst.msk [vmem:[#allocation0] ss:$8 sm:$0x3] %vm102_vm14, %v101_v29  }
  0x90   :  { %v108_v30 = vpop.permute.xlu0 %107  }
  0x91   :  { %110 = vst.msk [vmem:[#allocation0] ss:$8 sm:$0x3] %vm109_vm15, %v108_v30  }
  0x98   :  { %v114_v31 = vld [vmem:[#allocation0] sm:$0x1]  ;;  %v118_v32 = vld [vmem:[#allocation0 + $0x8] sm:$0x1] }
  0x99   :  { %116 = vst [vmem:[%s233_s1] sm:$0x1] %v114_v31  ;;  %137 = vst [vmem:[%s233_s1 + $0x1] sm:$0x1] %v118_v32 }

// kernel: unet_up_block.2
= control target key start
LH: loop header
LB: loop body
LE: loop exit
PB: predicated region body
PF: predicated region fallthrough
CT: control target
= control target key end

     0   :  { %s3504_s26 = smov 0   ;;  %s4675_s0 = inlined_call_operand.vmem [shape: f32[8,8,32], index: 0, kind: input, shape index: {}]   ;;  %s4676_s1 = inlined_call_operand.vmem [shape: bf16[32,512], index: 1, kind: input, shape index: {}]   ;;  %s4677_s2 = inlined_call_operand.vmem [shape: f32[1,512], index: 2, kind: input, shape index: {}]   ;;  %s4678_s3 = inlined_call_operand.vmem [shape: bf16[1024,256], index: 3, kind: input, shape index: {}]   ;;  %s4679_s4 = inlined_call_operand.vmem [shape: f32[1,256], index: 4, kind: input, shape index: {}]   ;;  %s4680_s5 = inlined_call_operand.<no memory space> [shape: f32[1], index: 5, kind: input, shape index: {}]   ;;  %s4681_s6 = inlined_call_operand.vmem [shape: bf16[16,8,256], index: 6, kind: output, shape index: {0}]   ;;  %s4682_s7 = inlined_call_operand.vmem [shape: f32[2,2,256], index: 7, kind: output, shape index: {1}]  }
   0x1   :  { %13 = sst [smem:[#allocation3]] %s4680_s5 }
   0x2 LB: > { %s3510_s27 = sadd.s32 4294967295, %s3452_s26   ;;  %p2770_p0 = scmp.ge.s32.totalorder %s3452_s26, 1  ;;  %s3452_s26 = sphi %s3504_s26, %s19_s26  }
   0x3   : > { %p242_p1 = scmp.lt.s32.totalorder %s3452_s26, 3 }
   0x5   : > { %p243_p2 = pnand %p2770_p0, %p242_p1 }
   0x6   : > { %v3242_v0 = vld [vmem:[%s4676_s1 + $0x4] ss:$16 sps:$4 sm:$0xff] (!%p243_p2)   ;;  %s2771_s5 = sshll.u32 (!%p243_p2), %s3510_s27, 2  ;;  %v3244_v1 = vld [vmem:[%s4676_s1] ss:$16 sps:$4 sm:$0xff] (!%p243_p2)   ;;  %v3454_v2 = vmov (!%p243_p2), 0   ;;  %v515_v16 = vlaneseq (!%p243_p2) }
   0x7   : > { %246 = sbr.rel (%p243_p2) target bundleno = 837 (0x345), region = 44  ;;  %614 = vmatprep.mubr.bf16.mxu0 (!%p243_p2), %v3454_v2  ;;  %p281_p3 = scmp.lt.s32.totalorder (!%p243_p2), %s2771_s5, 7  ;;  %667 = vmatprep.mubr.bf16.mxu1 (!%p243_p2), %v3454_v2  ;;  %v3245_v3 = vld [vmem:[%s4676_s1 + $0x24] ss:$16 sps:$4 sm:$0xff] (!%p243_p2)   ;;  %v3247_v4 = vld [vmem:[%s4676_s1 + $0x20] ss:$16 sps:$4 sm:$0xff] (!%p243_p2)  }
   0x8   : > { %582 = vmatprep.subr.bf16.mxu0 (!%p243_p2), %v3242_v0  ;;  %v3248_v5 = vld [vmem:[%s4676_s1 + $0xc] ss:$16 sps:$4 sm:$0xff] (!%p243_p2)   ;;  %v3250_v6 = vld [vmem:[%s4676_s1 + $0x8] ss:$16 sps:$4 sm:$0xff] (!%p243_p2)   ;;  %vm575_vm0 = vcmask (!%p243_p2), 261120   ;;  %vm299_vm1 = vcmask (!%p243_p2), 647168  }
   0x9   : > { %583 = vmatpush1.bf16.msra.mxu0 (!%p243_p2), %v3244_v1  ;;  %v3251_v7 = vld [vmem:[%s4676_s1 + $0x2c] ss:$16 sps:$4 sm:$0xff] (!%p243_p2)   ;;  %635 = vmatprep.subr.bf16.mxu1 (!%p243_p2), %v3248_v5  ;;  %v3253_v8 = vld [vmem:[%s4676_s1 + $0x28] ss:$16 sps:$4 sm:$0xff] (!%p243_p2)   ;;  %vm316_vm2 = vcmask (!%p243_p2), 64512   ;;  %vm318_vm3 = vcmask (!%p243_p2), 58368  }
   0xa   : > { %584 = vmatprep.subr.bf16.mxu0 (!%p243_p2), %v3245_v3  ;;  %636 = vmatpush1.bf16.msra.mxu1 (!%p243_p2), %v3250_v6  ;;  %vm334_vm4 = vcmask (!%p243_p2), 654912   ;;  %vm336_vm5 = vcmask (!%p243_p2), 648768   ;;  %v3455_v15 = vmov (!%p243_p2), 0.0   ;;  %v3862_v17 = vshrl.u32 (!%p243_p2), %v515_v16, 7  ;;  %v513_v19 = vld [vmem:[%s4677_s2] sm:$0xf] (!%p243_p2) }
   0xb   : > { %637 = vmatprep.subr.bf16.mxu1 (!%p243_p2), %v3251_v7  ;;  %361 = vst.msk [vmem:[#allocation2 + $0x89] sm:$0x1] (!%p243_p2), %vm299_vm1, %v3455_v15  ;;  %308 = vst.msk [vmem:[#allocation2 + $0x9] sm:$0x1] (!%p243_p2), %vm299_vm1, %v3455_v15  ;;  %s3456_s29 = smov (!%p243_p2), 72   ;;  %vm704_vm6 = vcmask (!%p243_p2), 588864  }
   0xc   : > { %309 = vst.msk [vmem:[#allocation2 + $0x19] sm:$0x1] (!%p243_p2), %vm299_vm1, %v3455_v15  ;;  %310 = vst.msk [vmem:[#allocation2 + $0x29] sm:$0x1] (!%p243_p2), %vm299_vm1, %v3455_v15  ;;  %v517_v18 = vsub.s32 (!%p243_p2), 0, %v3862_v17  ;;  %v521_v21 = vsub.s32 (!%p243_p2), 1, %v3862_v17 }
   0xd   : > { %585 = vmatpush1.bf16.msra.mxu0 (!%p243_p2), %v3247_v4  ;;  %311 = vst.msk [vmem:[#allocation2 + $0x39] sm:$0x1] (!%p243_p2), %vm299_vm1, %v3455_v15  ;;  %312 = vst.msk [vmem:[#allocation2 + $0x49] sm:$0x1] (!%p243_p2), %vm299_vm1, %v3455_v15  ;;  %v525_v36 = vsub.s32 (!%p243_p2), 2, %v3862_v17  ;;  %v529_v46 = vsub.s32 (!%p243_p2), 3, %v3862_v17 }
   0xe   : > { %s4684_s5 = smov (!%p281_p3, %s2771_s5), 7  ;;  %638 = vmatpush1.bf16.msra.mxu1 %v3253_v8  ;;  %313 = vst.msk [vmem:[#allocation2 + $0x59] sm:$0x1] %vm299_vm1, %v3455_v15  ;;  %314 = vst.msk [vmem:[#allocation2 + $0x69] sm:$0x1] %vm299_vm1, %v3455_v15  ;;  %v518_v20 = vrot.slane %v513_v19, %v517_v18  ;;  %v522_v24 = vrot.slane %v513_v19, %v521_v21  ;;  %s3458_s23 = smov 120  }
   0xf   : > { %s2772_s19 = sshll.u32 %s4684_s5, 3  ;;  %315 = vst.msk [vmem:[#allocation2 + $0x79] sm:$0x1] %vm299_vm1, %v3455_v15  ;;  %362 = vst.msk [vmem:[#allocation2 + $0x99] sm:$0x1] %vm299_vm1, %v3455_v15  ;;  %s3457_s5 = smov 8   ;;  %v526_v42 = vrot.slane %v513_v19, %v525_v36  ;;  %v530_v48 = vrot.slane %v513_v19, %v529_v46 }
  0x10   : > { %s284_s24 = scalar_lea.vmem %s4675_s0, %s2772_s19  ;;  %363 = vst.msk [vmem:[#allocation2 + $0xa9] sm:$0x1] %vm299_vm1, %v3455_v15  ;;  %364 = vst.msk [vmem:[#allocation2 + $0xb9] sm:$0x1] %vm299_vm1, %v3455_v15  ;;  %v3254_v59 = vld [vmem:[%s4678_s3 + $0x100] ss:$8 sps:$4 sm:$0xff]  }
  0x11   : > { %v499_v9 = vld [vmem:[%s284_s24] sm:$0xff]  ;;  %v500_v10 = vld [vmem:[%s284_s24 + $0x8] sm:$0xff]  ;;  %v501_v12 = vld [vmem:[%s284_s24 + $0x10] sm:$0xff]  ;;  %365 = vst.msk [vmem:[#allocation2 + $0xc9] sm:$0x1] %vm299_vm1, %v3455_v15  ;;  %s3460_s9 = smov 56  }
  0x12   : > { %v503_v11 = vpack.c.bf16 %v500_v10, %v499_v9  ;;  %v502_v13 = vld [vmem:[%s284_s24 + $0x18] sm:$0xff]  ;;  %366 = vst.msk [vmem:[#allocation2 + $0xd9] sm:$0x1] %vm299_vm1, %v3455_v15  ;;  %367 = vst.msk [vmem:[#allocation2 + $0xe9] sm:$0x1] %vm299_vm1, %v3455_v15  ;;  %vm941_vm7 = vcmask 523264  }
  0x13   : > { %v504_v14 = vpack.c.bf16 %v502_v13, %v501_v12  ;;  %368 = vst.msk [vmem:[#allocation2 + $0xf9] sm:$0x1] %vm299_vm1, %v3455_v15  ;;  %402 = vst.msk [vmem:[#allocation2 + $0x100] sm:$0x1] %vm299_vm1, %v3455_v15  ;;  %v3256_v60 = vld [vmem:[%s4678_s3 + $0x104] ss:$8 sps:$4 sm:$0xff]  }
  0x14   : > { %2786 = vmatmul.mubr.msk.bf16.vlgmr.msra.gmra.mrb[0].mxu0 %vm575_vm0, %v503_v11  ;;  %2788 = vmatmul.mubr.msk.bf16.vlgmr.msra.gmra.mrb[0].mxu1 %vm575_vm0, %v503_v11  ;;  %403 = vst.msk [vmem:[#allocation2 + $0x110] sm:$0x1] %vm299_vm1, %v3455_v15  ;;  %404 = vst.msk [vmem:[#allocation2 + $0x120] sm:$0x1] %vm299_vm1, %v3455_v15  ;;  %v3257_v61 = vld [vmem:[%s4678_s3 + $0x200] ss:$8 sps:$4 sm:$0xff]  }
  0x15   : > { %624 = vmatprep.mubr.bf16.mxu0 %v3454_v2  ;;  %677 = vmatprep.mubr.bf16.mxu1 %v3454_v2  ;;  %405 = vst.msk [vmem:[#allocation2 + $0x130] sm:$0x1] %vm299_vm1, %v3455_v15  ;;  %406 = vst.msk [vmem:[#allocation2 + $0x140] sm:$0x1] %vm299_vm1, %v3455_v15  ;;  %v3259_v62 = vld [vmem:[%s4678_s3 + $0x204] ss:$8 sps:$4 sm:$0xff]  }
  0x16   : > { %407 = vst.msk [vmem:[#allocation2 + $0x150] sm:$0x1] %vm299_vm1, %v3455_v15  ;;  %408 = vst.msk [vmem:[#allocation2 + $0x160] sm:$0x1] %vm299_vm1, %v3455_v15  ;;  %1318 = vmatprep.subr.bf16.mxu1 %v3256_v60  ;;  %1944 = vmatprep.subr.bf16.mxu0 %v3259_v62  ;;  %v3260_v63 = vld [vmem:[%s4678_s3 + $0x110] ss:$8 sps:$4 sm:$0xff]  }
  0x17   : > { %409 = vst.msk [vmem:[#allocation2 + $0x170] sm:$0x1] %vm299_vm1, %v3455_v15  ;;  %451 = vst.msk [vmem:[#allocation2 + $0x180] sm:$0x1] %vm299_vm1, %v3455_v15  ;;  %1319 = vmatpush1.bf16.msra.mxu1 %v3254_v59  ;;  %1945 = vmatpush1.bf16.msra.mxu0 %v3257_v61  ;;  %v3262_v0 = vld [vmem:[%s4678_s3 + $0x114] ss:$8 sps:$4 sm:$0xff]  }
  0x18   : > { %452 = vst.msk [vmem:[#allocation2 + $0x190] sm:$0x1] %vm299_vm1, %v3455_v15  ;;  %453 = vst.msk [vmem:[#allocation2 + $0x1a0] sm:$0x1] %vm299_vm1, %v3455_v15  ;;  %v3263_v1 = vld [vmem:[%s4678_s3 + $0x210] ss:$8 sps:$4 sm:$0xff]   ;;  %1320 = vmatprep.subr.bf16.mxu1 %v3262_v0 }
  0x19   : > { %454 = vst.msk [vmem:[#allocation2 + $0x1b0] sm:$0x1] %vm299_vm1, %v3455_v15  ;;  %455 = vst.msk [vmem:[#allocation2 + $0x1c0] sm:$0x1] %vm299_vm1, %v3455_v15  ;;  %v3265_v2 = vld [vmem:[%s4678_s3 + $0x214] ss:$8 sps:$4 sm:$0xff]  }
  0x1a   : > { %456 = vst.msk [vmem:[#allocation2 + $0x1d0] sm:$0x1] %vm299_vm1, %v3455_v15  ;;  %457 = vst.msk [vmem:[#allocation2 + $0x1e0] sm:$0x1] %vm299_vm1, %v3455_v15  ;;  %1946 = vmatprep.subr.bf16.mxu0 %v3265_v2  ;;  %v3266_v3 = vld [vmem:[%s4678_s3 + $0x120] ss:$8 sps:$4 sm:$0xff]  }
  0x1b   : > { %458 = vst.msk [vmem:[#allocation2 + $0x1f0] sm:$0x1] %vm299_vm1, %v3455_v15  ;;  %1321 = vmatpush1.bf16.msra.mxu1 %v3260_v63  ;;  %1947 = vmatpush1.bf16.msra.mxu0 %v3263_v1  ;;  %v3268_v4 = vld [vmem:[%s4678_s3 + $0x124] ss:$8 sps:$4 sm:$0xff]   ;;  %v3269_v5 = vld [vmem:[%s4678_s3 + $0x220] ss:$8 sps:$4 sm:$0xff]  }
  0x1c   : > { %2787 = vmatmul.mubr.msk.bf16.gmra.mrb[4].mxu0 %vm575_vm0, %v504_v14  ;;  %2789 = vmatmul.mubr.msk.bf16.gmra.mrb[4].mxu1 %vm575_vm0, %v504_v14  ;;  %369 = vst.msk [vmem:[#allocation2 + $0x80] sm:$0xff] %vm316_vm2, %v3455_v15  ;;  %317 = vst.msk [vmem:[#allocation2] sm:$0xff] %vm316_vm2, %v3455_v15  ;;  %v3271_v6 = vld [vmem:[%s4678_s3 + $0x224] ss:$8 sps:$4 sm:$0xff]   ;;  %v3272_v7 = vld [vmem:[%s4678_s3 + $0x130] ss:$8 sps:$4 sm:$0xff]  }
  0x1d   : > { %370 = vst.msk [vmem:[#allocation2 + $0x88] sm:$0x3] %vm318_vm3, %v3455_v15  ;;  %319 = vst.msk [vmem:[#allocation2 + $0x8] sm:$0x3] %vm318_vm3, %v3455_v15  ;;  %1322 = vmatprep.subr.bf16.mxu1 %v3268_v4  ;;  %1948 = vmatprep.subr.bf16.mxu0 %v3271_v6  ;;  %v3274_v8 = vld [vmem:[%s4678_s3 + $0x134] ss:$8 sps:$4 sm:$0xff]  }
  0x1e   : > { %320 = vst.msk [vmem:[#allocation2 + $0x10] sm:$0xff] %vm316_vm2, %v3455_v15  ;;  %322 = vst.msk [vmem:[#allocation2 + $0x20] sm:$0xff] %vm316_vm2, %v3455_v15  ;;  %v3275_v9 = vld [vmem:[%s4678_s3 + $0x230] ss:$8 sps:$4 sm:$0xff]   ;;  %v3277_v10 = vld [vmem:[%s4678_s3 + $0x234] ss:$8 sps:$4 sm:$0xff]  }
  0x1f   : > { %321 = vst.msk [vmem:[#allocation2 + $0x18] sm:$0x3] %vm318_vm3, %v3455_v15  ;;  %323 = vst.msk [vmem:[#allocation2 + $0x28] sm:$0x3] %vm318_vm3, %v3455_v15  ;;  %1323 = vmatpush1.bf16.msra.mxu1 %v3266_v3  ;;  %1949 = vmatpush1.bf16.msra.mxu0 %v3269_v5  ;;  %v3278_v11 = vld [vmem:[%s4678_s3 + $0x140] ss:$8 sps:$4 sm:$0xff]  }
  0x20   : > { %324 = vst.msk [vmem:[#allocation2 + $0x30] sm:$0xff] %vm316_vm2, %v3455_v15  ;;  %326 = vst.msk [vmem:[#allocation2 + $0x40] sm:$0xff] %vm316_vm2, %v3455_v15  ;;  %1324 = vmatprep.subr.bf16.mxu1 %v3274_v8  ;;  %1950 = vmatprep.subr.bf16.mxu0 %v3277_v10  ;;  %v3280_v12 = vld [vmem:[%s4678_s3 + $0x144] ss:$8 sps:$4 sm:$0xff]   ;;  %v3281_v13 = vld [vmem:[%s4678_s3 + $0x240] ss:$8 sps:$4 sm:$0xff]  }
  0x21   : > { %325 = vst.msk [vmem:[#allocation2 + $0x38] sm:$0x3] %vm318_vm3, %v3455_v15  ;;  %327 = vst.msk [vmem:[#allocation2 + $0x48] sm:$0x3] %vm318_vm3, %v3455_v15  ;;  %v3283_v14 = vld [vmem:[%s4678_s3 + $0x244] ss:$8 sps:$4 sm:$0xff]  }
  0x22   : > { %328 = vst.msk [vmem:[#allocation2 + $0x50] sm:$0xff] %vm316_vm2, %v3455_v15  ;;  %330 = vst.msk [vmem:[#allocation2 + $0x60] sm:$0xff] %vm316_vm2, %v3455_v15  ;;  %v3286_v16 = vld [vmem:[%s4678_s3 + $0x154] ss:$8 sps:$4 sm:$0xff]   ;;  %v3287_v19 = vld [vmem:[%s4678_s3 + $0x250] ss:$8 sps:$4 sm:$0xff]  }
  0x23   : > { %329 = vst.msk [vmem:[#allocation2 + $0x58] sm:$0x3] %vm318_vm3, %v3455_v15  ;;  %331 = vst.msk [vmem:[#allocation2 + $0x68] sm:$0x3] %vm318_vm3, %v3455_v15  ;;  %1325 = vmatpush1.bf16.msra.mxu1 %v3272_v7  ;;  %1951 = vmatpush1.bf16.msra.mxu0 %v3275_v9  ;;  %v3311_v36 = vld [vmem:[%s4678_s3 + $0x290] ss:$8 sps:$4 sm:$0xff]  }
  0x24   : > { %332 = vst.msk [vmem:[#allocation2 + $0x70] sm:$0xff] %vm316_vm2, %v3455_v15  ;;  %371 = vst.msk [vmem:[#allocation2 + $0x90] sm:$0xff] %vm316_vm2, %v3455_v15  ;;  %1326 = vmatprep.subr.bf16.mxu1 %v3280_v12  ;;  %1952 = vmatprep.subr.bf16.mxu0 %v3283_v14  ;;  %v3340_v60 = vld [vmem:[%s4678_s3 + $0x1e4] ss:$8 sps:$4 sm:$0xff]   ;;  %v3338_v61 = vld [vmem:[%s4678_s3 + $0x1e0] ss:$8 sps:$4 sm:$0xff]  }
  0x25   : > { %333 = vst.msk [vmem:[#allocation2 + $0x78] sm:$0x3] %vm318_vm3, %v3455_v15  ;;  %372 = vst.msk [vmem:[#allocation2 + $0x98] sm:$0x3] %vm318_vm3, %v3455_v15  ;;  %v3343_v62 = vld [vmem:[%s4678_s3 + $0x2e4] ss:$8 sps:$4 sm:$0xff]  }
  0x26   : > { %373 = vst.msk [vmem:[#allocation2 + $0xa0] sm:$0xff] %vm316_vm2, %v3455_v15  ;;  %375 = vst.msk [vmem:[#allocation2 + $0xb0] sm:$0xff] %vm316_vm2, %v3455_v15  ;;  %v3341_v63 = vld [vmem:[%s4678_s3 + $0x2e0] ss:$8 sps:$4 sm:$0xff]   ;;  %v3346_v5 = vld [vmem:[%s4678_s3 + $0x1f4] ss:$8 sps:$4 sm:$0xff]  }
  0x27   : > { %374 = vst.msk [vmem:[#allocation2 + $0xa8] sm:$0x3] %vm318_vm3, %v3455_v15  ;;  %376 = vst.msk [vmem:[#allocation2 + $0xb8] sm:$0x3] %vm318_vm3, %v3455_v15  ;;  %1327 = vmatpush1.bf16.msra.mxu1 %v3278_v11  ;;  %1953 = vmatpush1.bf16.msra.mxu0 %v3281_v13  ;;  %v3344_v6 = vld [vmem:[%s4678_s3 + $0x1f0] ss:$8 sps:$4 sm:$0xff]  }
  0x28   : > { %377 = vst.msk [vmem:[#allocation2 + $0xc0] sm:$0xff] %vm316_vm2, %v3455_v15  ;;  %379 = vst.msk [vmem:[#allocation2 + $0xd0] sm:$0xff] %vm316_vm2, %v3455_v15  ;;  %1328 = vmatprep.subr.bf16.mxu1 %v3286_v16  ;;  %v3349_v7 = vld [vmem:[%s4678_s3 + $0x2f4] ss:$8 sps:$4 sm:$0xff]   ;;  %v3347_v8 = vld [vmem:[%s4678_s3 + $0x2f0] ss:$8 sps:$4 sm:$0xff]  }
  0x29   : > { %378 = vst.msk [vmem:[#allocation2 + $0xc8] sm:$0x3] %vm318_vm3, %v3455_v15  ;;  %380 = vst.msk [vmem:[#allocation2 + $0xd8] sm:$0x3] %vm318_vm3, %v3455_v15  ;;  %v3352_v14 = vld [vmem:[%s4678_s3 + $0x4] ss:$8 sps:$4 sm:$0xff]  }
  0x2a   : > { %381 = vst.msk [vmem:[#allocation2 + $0xe0] sm:$0xff] %vm316_vm2, %v3455_v15  ;;  %383 = vst.msk [vmem:[#allocation2 + $0xf0] sm:$0xff] %vm316_vm2, %v3455_v15  ;;  %s2470_s24 = sld [smem:[#allocation3]]  ;;  %s2773_s25 = sshll.u32 %s3510_s27, 3 }
  0x2b   : > { %382 = vst.msk [vmem:[#allocation2 + $0xe8] sm:$0x3] %vm318_vm3, %v3455_v15  ;;  %384 = vst.msk [vmem:[#allocation2 + $0xf8] sm:$0x3] %vm318_vm3, %v3455_v15  ;;  %p287_p4 = scmp.lt.s32.totalorder %s2773_s25, 15  ;;  %p293_p5 = scmp.lt.s32.totalorder %s3510_s27, 1 }
  0x2c   : > { %418 = vst.msk [vmem:[#allocation2 + $0x100] sm:$0xff] %vm316_vm2, %v3455_v15  ;;  %420 = vst.msk [vmem:[#allocation2 + $0x110] sm:$0xff] %vm316_vm2, %v3455_v15 }
  0x2d   : > { %419 = vst.msk [vmem:[#allocation2 + $0x108] sm:$0x3] %vm318_vm3, %v3455_v15  ;;  %421 = vst.msk [vmem:[#allocation2 + $0x118] sm:$0x3] %vm318_vm3, %v3455_v15  ;;  %s4686_s25 = smov (!%p287_p4, %s2773_s25), 15  ;;  %s4688_s27 = smov (!%p293_p5, %s3510_s27), 1 }
  0x2e   : > { %422 = vst.msk [vmem:[#allocation2 + $0x120] sm:$0xff] %vm316_vm2, %v3455_v15  ;;  %424 = vst.msk [vmem:[#allocation2 + $0x130] sm:$0xff] %vm316_vm2, %v3455_v15  ;;  %s2930_s10 = sshll.u32 %s4688_s27, 2 }
  0x2f   : > { %423 = vst.msk [vmem:[#allocation2 + $0x128] sm:$0x3] %vm318_vm3, %v3455_v15  ;;  %425 = vst.msk [vmem:[#allocation2 + $0x138] sm:$0x3] %vm318_vm3, %v3455_v15  ;;  %s297_s13 = scalar_lea.vmem %s4682_s7, %s2930_s10 }
  0x30   : > { %426 = vst.msk [vmem:[#allocation2 + $0x140] sm:$0xff] %vm316_vm2, %v3455_v15  ;;  %428 = vst.msk [vmem:[#allocation2 + $0x150] sm:$0xff] %vm316_vm2, %v3455_v15 }
  0x31   : > { %427 = vst.msk [vmem:[#allocation2 + $0x148] sm:$0x3] %vm318_vm3, %v3455_v15  ;;  %429 = vst.msk [vmem:[#allocation2 + $0x158] sm:$0x3] %vm318_vm3, %v3455_v15 }
  0x32   : > { %430 = vst.msk [vmem:[#allocation2 + $0x160] sm:$0xff] %vm316_vm2, %v3455_v15  ;;  %432 = vst.msk [vmem:[#allocation2 + $0x170] sm:$0xff] %vm316_vm2, %v3455_v15 }
  0x33   : > { %431 = vst.msk [vmem:[#allocation2 + $0x168] sm:$0x3] %vm318_vm3, %v3455_v15  ;;  %433 = vst.msk [vmem:[#allocation2 + $0x178] sm:$0x3] %vm318_vm3, %v3455_v15 }
  0x34   : > { %467 = vst.msk [vmem:[#allocation2 + $0x180] sm:$0xff] %vm316_vm2, %v3455_v15  ;;  %469 = vst.msk [vmem:[#allocation2 + $0x190] sm:$0xff] %vm316_vm2, %v3455_v15 }
  0x35   : > { %468 = vst.msk [vmem:[#allocation2 + $0x188] sm:$0x3] %vm318_vm3, %v3455_v15  ;;  %470 = vst.msk [vmem:[#allocation2 + $0x198] sm:$0x3] %vm318_vm3, %v3455_v15 }
  0x36   : > { %471 = vst.msk [vmem:[#allocation2 + $0x1a0] sm:$0xff] %vm316_vm2, %v3455_v15  ;;  %473 = vst.msk [vmem:[#allocation2 + $0x1b0] sm:$0xff] %vm316_vm2, %v3455_v15 }
  0x37   : > { %472 = vst.msk [vmem:[#allocation2 + $0x1a8] sm:$0x3] %vm318_vm3, %v3455_v15  ;;  %474 = vst.msk [vmem:[#allocation2 + $0x1b8] sm:$0x3] %vm318_vm3, %v3455_v15 }
  0x38   : > { %475 = vst.msk [vmem:[#allocation2 + $0x1c0] sm:$0xff] %vm316_vm2, %v3455_v15  ;;  %477 = vst.msk [vmem:[#allocation2 + $0x1d0] sm:$0xff] %vm316_vm2, %v3455_v15 }
  0x39   : > { %476 = vst.msk [vmem:[#allocation2 + $0x1c8] sm:$0x3] %vm318_vm3, %v3455_v15  ;;  %478 = vst.msk [vmem:[#allocation2 + $0x1d8] sm:$0x3] %vm318_vm3, %v3455_v15 }
  0x3a   : > { %479 = vst.msk [vmem:[#allocation2 + $0x1e0] sm:$0xff] %vm316_vm2, %v3455_v15  ;;  %481 = vst.msk [vmem:[#allocation2 + $0x1f0] sm:$0xff] %vm316_vm2, %v3455_v15 }
  0x3b   : > { %480 = vst.msk [vmem:[#allocation2 + $0x1e8] sm:$0x3] %vm318_vm3, %v3455_v15  ;;  %482 = vst.msk [vmem:[#allocation2 + $0x1f8] sm:$0x3] %vm318_vm3, %v3455_v15 }
  0x3c   : > { %385 = vst.msk [vmem:[#allocation2 + $0x80] sm:$0xff] %vm334_vm4, %v3455_v15  ;;  %335 = vst.msk [vmem:[#allocation2] sm:$0xff] %vm334_vm4, %v3455_v15 }
  0x3d   : > { %386 = vst.msk [vmem:[#allocation2 + $0x88] sm:$0x3] %vm336_vm5, %v3455_v15  ;;  %337 = vst.msk [vmem:[#allocation2 + $0x8] sm:$0x3] %vm336_vm5, %v3455_v15 }
  0x3e   : > { %387 = vst.msk [vmem:[#allocation2 + $0x90] sm:$0xff] %vm334_vm4, %v3455_v15  ;;  %338 = vst.msk [vmem:[#allocation2 + $0x10] sm:$0xff] %vm334_vm4, %v3455_v15 }
  0x3f   : > { %388 = vst.msk [vmem:[#allocation2 + $0x98] sm:$0x3] %vm336_vm5, %v3455_v15  ;;  %339 = vst.msk [vmem:[#allocation2 + $0x18] sm:$0x3] %vm336_vm5, %v3455_v15 }
  0x40   : > { %340 = vst.msk [vmem:[#allocation2 + $0x20] sm:$0xff] %vm334_vm4, %v3455_v15  ;;  %342 = vst.msk [vmem:[#allocation2 + $0x30] sm:$0xff] %vm334_vm4, %v3455_v15 }
  0x41   : > { %341 = vst.msk [vmem:[#allocation2 + $0x28] sm:$0x3] %vm336_vm5, %v3455_v15  ;;  %343 = vst.msk [vmem:[#allocation2 + $0x38] sm:$0x3] %vm336_vm5, %v3455_v15 }
  0x42   : > { %344 = vst.msk [vmem:[#allocation2 + $0x40] sm:$0xff] %vm334_vm4, %v3455_v15  ;;  %346 = vst.msk [vmem:[#allocation2 + $0x50] sm:$0xff] %vm334_vm4, %v3455_v15 }
  0x43   : > { %345 = vst.msk [vmem:[#allocation2 + $0x48] sm:$0x3] %vm336_vm5, %v3455_v15  ;;  %347 = vst.msk [vmem:[#allocation2 + $0x58] sm:$0x3] %vm336_vm5, %v3455_v15 }
  0x44   : > { %348 = vst.msk [vmem:[#allocation2 + $0x60] sm:$0xff] %vm334_vm4, %v3455_v15  ;;  %350 = vst.msk [vmem:[#allocation2 + $0x70] sm:$0xff] %vm334_vm4, %v3455_v15 }
  0x45   : > { %349 = vst.msk [vmem:[#allocation2 + $0x68] sm:$0x3] %vm336_vm5, %v3455_v15  ;;  %351 = vst.msk [vmem:[#allocation2 + $0x78] sm:$0x3] %vm336_vm5, %v3455_v15 }
  0x46   : > { %389 = vst.msk [vmem:[#allocation2 + $0xa0] sm:$0xff] %vm334_vm4, %v3455_v15  ;;  %391 = vst.msk [vmem:[#allocation2 + $0xb0] sm:$0xff] %vm334_vm4, %v3455_v15 }
  0x47   : > { %390 = vst.msk [vmem:[#allocation2 + $0xa8] sm:$0x3] %vm336_vm5, %v3455_v15  ;;  %392 = vst.msk [vmem:[#allocation2 + $0xb8] sm:$0x3] %vm336_vm5, %v3455_v15 }
  0x48   : > { %393 = vst.msk [vmem:[#allocation2 + $0xc0] sm:$0xff] %vm334_vm4, %v3455_v15  ;;  %395 = vst.msk [vmem:[#allocation2 + $0xd0] sm:$0xff] %vm334_vm4, %v3455_v15 }
  0x49   : > { %394 = vst.msk [vmem:[#allocation2 + $0xc8] sm:$0x3] %vm336_vm5, %v3455_v15  ;;  %396 = vst.msk [vmem:[#allocation2 + $0xd8] sm:$0x3] %vm336_vm5, %v3455_v15 }
  0x4a   : > { %397 = vst.msk [vmem:[#allocation2 + $0xe0] sm:$0xff] %vm334_vm4, %v3455_v15  ;;  %399 = vst.msk [vmem:[#allocation2 + $0xf0] sm:$0xff] %vm334_vm4, %v3455_v15 }
  0x4b   : > { %398 = vst.msk [vmem:[#allocation2 + $0xe8] sm:$0x3] %vm336_vm5, %v3455_v15  ;;  %400 = vst.msk [vmem:[#allocation2 + $0xf8] sm:$0x3] %vm336_vm5, %v3455_v15 }
  0x4c   : > { %434 = vst.msk [vmem:[#allocation2 + $0x100] sm:$0xff] %vm334_vm4, %v3455_v15  ;;  %436 = vst.msk [vmem:[#allocation2 + $0x110] sm:$0xff] %vm334_vm4, %v3455_v15 }
  0x4d   : > { %435 = vst.msk [vmem:[#allocation2 + $0x108] sm:$0x3] %vm336_vm5, %v3455_v15  ;;  %437 = vst.msk [vmem:[#allocation2 + $0x118] sm:$0x3] %vm336_vm5, %v3455_v15 }
  0x4e   : > { %438 = vst.msk [vmem:[#allocation2 + $0x120] sm:$0xff] %vm334_vm4, %v3455_v15  ;;  %440 = vst.msk [vmem:[#allocation2 + $0x130] sm:$0xff] %vm334_vm4, %v3455_v15 }
  0x4f   : > { %439 = vst.msk [vmem:[#allocation2 + $0x128] sm:$0x3] %vm336_vm5, %v3455_v15  ;;  %441 = vst.msk [vmem:[#allocation2 + $0x138] sm:$0x3] %vm336_vm5, %v3455_v15 }
  0x50   : > { %442 = vst.msk [vmem:[#allocation2 + $0x140] sm:$0xff] %vm334_vm4, %v3455_v15  ;;  %444 = vst.msk [vmem:[#allocation2 + $0x150] sm:$0xff] %vm334_vm4, %v3455_v15 }
  0x51   : > { %443 = vst.msk [vmem:[#allocation2 + $0x148] sm:$0x3] %vm336_vm5, %v3455_v15  ;;  %445 = vst.msk [vmem:[#allocation2 + $0x158] sm:$0x3] %vm336_vm5, %v3455_v15 }
  0x52   : > { %446 = vst.msk [vmem:[#allocation2 + $0x160] sm:$0xff] %vm334_vm4, %v3455_v15  ;;  %448 = vst.msk [vmem:[#allocation2 + $0x170] sm:$0xff] %vm334_vm4, %v3455_v15 }
  0x53   : > { %447 = vst.msk [vmem:[#allocation2 + $0x168] sm:$0x3] %vm336_vm5, %v3455_v15  ;;  %449 = vst.msk [vmem:[#allocation2 + $0x178] sm:$0x3] %vm336_vm5, %v3455_v15 }
  0x54   : > { %483 = vst.msk [vmem:[#allocation2 + $0x180] sm:$0xff] %vm334_vm4, %v3455_v15  ;;  %485 = vst.msk [vmem:[#allocation2 + $0x190] sm:$0xff] %vm334_vm4, %v3455_v15 }
  0x55   : > { %484 = vst.msk [vmem:[#allocation2 + $0x188] sm:$0x3] %vm336_vm5, %v3455_v15  ;;  %486 = vst.msk [vmem:[#allocation2 + $0x198] sm:$0x3] %vm336_vm5, %v3455_v15 }
  0x56   : > { %487 = vst.msk [vmem:[#allocation2 + $0x1a0] sm:$0xff] %vm334_vm4, %v3455_v15  ;;  %489 = vst.msk [vmem:[#allocation2 + $0x1b0] sm:$0xff] %vm334_vm4, %v3455_v15 }
  0x57   : > { %488 = vst.msk [vmem:[#allocation2 + $0x1a8] sm:$0x3] %vm336_vm5, %v3455_v15  ;;  %490 = vst.msk [vmem:[#allocation2 + $0x1b8] sm:$0x3] %vm336_vm5, %v3455_v15 }
  0x58   : > { %491 = vst.msk [vmem:[#allocation2 + $0x1c0] sm:$0xff] %vm334_vm4, %v3455_v15  ;;  %493 = vst.msk [vmem:[#allocation2 + $0x1d0] sm:$0xff] %vm334_vm4, %v3455_v15 }
  0x59   : > { %492 = vst.msk [vmem:[#allocation2 + $0x1c8] sm:$0x3] %vm336_vm5, %v3455_v15  ;;  %494 = vst.msk [vmem:[#allocation2 + $0x1d8] sm:$0x3] %vm336_vm5, %v3455_v15 }
  0x5a   : > { %495 = vst.msk [vmem:[#allocation2 + $0x1e0] sm:$0xff] %vm334_vm4, %v3455_v15  ;;  %497 = vst.msk [vmem:[#allocation2 + $0x1f0] sm:$0xff] %vm334_vm4, %v3455_v15 }
  0x5b   : > { %496 = vst.msk [vmem:[#allocation2 + $0x1e8] sm:$0x3] %vm336_vm5, %v3455_v15  ;;  %498 = vst.msk [vmem:[#allocation2 + $0x1f8] sm:$0x3] %vm336_vm5, %v3455_v15  ;;  %v3284_v15 = vld [vmem:[%s4678_s3 + $0x150] ss:$8 sps:$4 sm:$0xff]  }
  0x5c   : > { %1329 = vmatpush1.bf16.msra.mxu1 %v3284_v15 }
  0xe7   : > { %v616_v22 = vpop.f32.mrb[0].mxu0  ;;  %v669_v28 = vpop.f32.mrb[0].mxu1 }
  0xe8   : > { %v617_v23 = vadd.f32 %v616_v22, %v518_v20  ;;  %v618_v25 = vpop.f32.mrb[1].mxu0  ;;  %v671_v29 = vpop.f32.mrb[1].mxu1  ;;  %v670_v45 = vadd.f32 %v669_v28, %v526_v42  ;;  %v3290_v22 = vld [vmem:[%s4678_s3 + $0x160] ss:$8 sps:$4 sm:$0xff]   ;;  %v3299_v28 = vld [vmem:[%s4678_s3 + $0x270] ss:$8 sps:$4 sm:$0xff]  }
  0xe9   : > { %v620_v26 = vpop.f32.mrb[2].mxu0  ;;  %v619_v30 = vadd.f32 %v618_v25, %v522_v24  ;;  %v673_v32 = vpop.f32.mrb[2].mxu1  ;;  %v672_v49 = vadd.f32 %v671_v29, %v530_v48  ;;  %v3295_v25 = vld [vmem:[%s4678_s3 + $0x264] ss:$8 sps:$4 sm:$0xff]   ;;  %v3301_v29 = vld [vmem:[%s4678_s3 + $0x274] ss:$8 sps:$4 sm:$0xff]  }
  0xea   : > { %v622_v27 = vpop.f32.mrb[3].mxu0  ;;  %709 = vrot.lane.b32.xlu1 %v617_v23, %s3456_s29  ;;  %692 = vrot.lane.b32.xlu0 %v617_v23, %s3457_s5  ;;  %v621_v31 = vadd.f32 %v620_v26, %v518_v20  ;;  %v675_v33 = vpop.f32.mrb[3].mxu1  ;;  %v674_v47 = vadd.f32 %v673_v32, %v526_v42  ;;  %v3292_v23 = vld [vmem:[%s4678_s3 + $0x164] ss:$8 sps:$4 sm:$0xff]   ;;  %v3296_v26 = vld [vmem:[%s4678_s3 + $0x170] ss:$8 sps:$4 sm:$0xff]  }
  0xeb   : > { %v623_v35 = vadd.f32 %v622_v27, %v522_v24  ;;  %v676_v50 = vadd.f32 %v675_v33, %v530_v48  ;;  %1330 = vmatprep.subr.bf16.mxu1 %v3292_v23  ;;  %v3298_v27 = vld [vmem:[%s4678_s3 + $0x174] ss:$8 sps:$4 sm:$0xff]   ;;  %v3305_v32 = vld [vmem:[%s4678_s3 + $0x280] ss:$8 sps:$4 sm:$0xff]   ;;  %v3307_v33 = vld [vmem:[%s4678_s3 + $0x284] ss:$8 sps:$4 sm:$0xff]  }
  0xec   : > { %1331 = vmatpush1.bf16.msra.mxu1 %v3290_v22 }
  0xed   : > { %1332 = vmatprep.subr.bf16.mxu1 %v3298_v27 }
  0xee   : > { %711 = vrot.lane.b32.xlu1 %v621_v31, %s3456_s29  ;;  %729 = vrot.lane.b32.xlu0 %v619_v30, %s3457_s5 }
  0xef   : > { %v626_v34 = vpop.f32.mrb[4].mxu0  ;;  %v679_v40 = vpop.f32.mrb[4].mxu1 }
  0xf0   : > { %v628_v37 = vpop.f32.mrb[5].mxu0  ;;  %v681_v41 = vpop.f32.mrb[5].mxu1  ;;  %v627_v51 = vadd.f32 %v626_v34, %v518_v20  ;;  %v680_v55 = vadd.f32 %v679_v40, %v526_v42  ;;  %1333 = vmatpush1.bf16.msra.mxu1 %v3296_v26  ;;  %v3308_v34 = vld [vmem:[%s4678_s3 + $0x190] ss:$8 sps:$4 sm:$0xff]   ;;  %v3317_v40 = vld [vmem:[%s4678_s3 + $0x2a0] ss:$8 sps:$4 sm:$0xff]  }
  0xf1   : > { %v630_v38 = vpop.f32.mrb[6].mxu0  ;;  %v683_v43 = vpop.f32.mrb[6].mxu1  ;;  %v629_v53 = vadd.f32 %v628_v37, %v522_v24  ;;  %v682_v57 = vadd.f32 %v681_v41, %v530_v48  ;;  %v3313_v37 = vld [vmem:[%s4678_s3 + $0x294] ss:$8 sps:$4 sm:$0xff]   ;;  %v3319_v41 = vld [vmem:[%s4678_s3 + $0x2a4] ss:$8 sps:$4 sm:$0xff]  }
  0xf2   : > { %731 = vrot.lane.b32.xlu1 %v623_v35, %s3457_s5  ;;  %694 = vrot.lane.b32.xlu0 %v621_v31, %s3457_s5  ;;  %v632_v39 = vpop.f32.mrb[7].mxu0  ;;  %v685_v44 = vpop.f32.mrb[7].mxu1  ;;  %v631_v52 = vadd.f32 %v630_v38, %v518_v20  ;;  %v684_v56 = vadd.f32 %v683_v43, %v526_v42  ;;  %v3289_v20 = vld [vmem:[%s4678_s3 + $0x254] ss:$8 sps:$4 sm:$0xff]   ;;  %v3304_v31 = vld [vmem:[%s4678_s3 + $0x184] ss:$8 sps:$4 sm:$0xff]  }
  0xf3   : > { %v633_v54 = vadd.f32 %v632_v39, %v522_v24  ;;  %v686_v58 = vadd.f32 %v685_v44, %v530_v48  ;;  %1954 = vmatprep.subr.bf16.mxu0 %v3289_v20  ;;  %v3293_v24 = vld [vmem:[%s4678_s3 + $0x260] ss:$8 sps:$4 sm:$0xff]   ;;  %1334 = vmatprep.subr.bf16.mxu1 %v3304_v31  ;;  %v3316_v39 = vld [vmem:[%s4678_s3 + $0x1a4] ss:$8 sps:$4 sm:$0xff]   ;;  %v3320_v42 = vld [vmem:[%s4678_s3 + $0x1b0] ss:$8 sps:$4 sm:$0xff]  }
  0xf4   : > { %1955 = vmatpush1.bf16.msra.mxu0 %v3287_v19  ;;  %v3314_v38 = vld [vmem:[%s4678_s3 + $0x1a0] ss:$8 sps:$4 sm:$0xff]   ;;  %v3322_v43 = vld [vmem:[%s4678_s3 + $0x1b4] ss:$8 sps:$4 sm:$0xff]   ;;  %v3323_v44 = vld [vmem:[%s4678_s3 + $0x2b0] ss:$8 sps:$4 sm:$0xff]  }
  0xf5   : > { %1956 = vmatprep.subr.bf16.mxu0 %v3295_v25  ;;  %v3328_v48 = vld [vmem:[%s4678_s3 + $0x1c4] ss:$8 sps:$4 sm:$0xff]  }
  0xf6   : > { %747 = vrot.lane.b32.xlu1 %v623_v35, %s3456_s29  ;;  %745 = vrot.lane.b32.xlu0 %v619_v30, %s3456_s29  ;;  %v3302_v30 = vld [vmem:[%s4678_s3 + $0x180] ss:$8 sps:$4 sm:$0xff]   ;;  %v3310_v35 = vld [vmem:[%s4678_s3 + $0x194] ss:$8 sps:$4 sm:$0xff]  }
  0xf7   : > { %1335 = vmatpush1.bf16.msra.mxu1 %v3302_v30  ;;  %v3361_v30 = vld [vmem:[%s4678_s3 + $0x304] ss:$8 sps:$4 sm:$0xff]  }
  0xf8   : > { %1957 = vmatpush1.bf16.msra.mxu0 %v3293_v24  ;;  %1336 = vmatprep.subr.bf16.mxu1 %v3310_v35 }
  0xf9   : > { %1958 = vmatprep.subr.bf16.mxu0 %v3301_v29 }
  0xfa   : > { %767 = vrot.lane.b32.xlu1 %v674_v47, %s3457_s5  ;;  %765 = vrot.lane.b32.xlu0 %v670_v45, %s3457_s5 }
  0xfb   : > { %1337 = vmatpush1.bf16.msra.mxu1 %v3308_v34 }
  0xfc   : > { %1959 = vmatpush1.bf16.msra.mxu0 %v3299_v28  ;;  %1338 = vmatprep.subr.bf16.mxu1 %v3316_v39 }
  0xfd   : > { %1960 = vmatprep.subr.bf16.mxu0 %v3307_v33 }
  0xfe   : > { %784 = vrot.lane.b32.xlu1 %v674_v47, %s3456_s29  ;;  %782 = vrot.lane.b32.xlu0 %v670_v45, %s3456_s29  ;;  %v3325_v45 = vld [vmem:[%s4678_s3 + $0x2b4] ss:$8 sps:$4 sm:$0xff]  }
  0xff   : > { %1339 = vmatpush1.bf16.msra.mxu1 %v3314_v38 }
 0x100   : > { %1961 = vmatpush1.bf16.msra.mxu0 %v3305_v32  ;;  %1340 = vmatprep.subr.bf16.mxu1 %v3322_v43 }
 0x101   : > { %1962 = vmatprep.subr.bf16.mxu0 %v3313_v37 }
 0x102   : > { %805 = vrot.lane.b32.xlu1 %v676_v50, %s3457_s5  ;;  %803 = vrot.lane.b32.xlu0 %v672_v49, %s3457_s5 }
 0x103   : > { %1341 = vmatpush1.bf16.msra.mxu1 %v3320_v42 }
 0x104   : > { %1963 = vmatpush1.bf16.msra.mxu0 %v3311_v36  ;;  %1342 = vmatprep.subr.bf16.mxu1 %v3328_v48 }
 0x105   : > { %1964 = vmatprep.subr.bf16.mxu0 %v3319_v41 }
 0x106   : > { %822 = vrot.lane.b32.xlu1 %v676_v50, %s3456_s29  ;;  %820 = vrot.lane.b32.xlu0 %v672_v49, %s3456_s29  ;;  %v3326_v49 = vld [vmem:[%s4678_s3 + $0x1c0] ss:$8 sps:$4 sm:$0xff]  }
 0x107   : > { %v3329_v50 = vld [vmem:[%s4678_s3 + $0x2c0] ss:$8 sps:$4 sm:$0xff]   ;;  %1343 = vmatpush1.bf16.msra.mxu1 %v3326_v49 }
 0x108   : > { %1965 = vmatpush1.bf16.msra.mxu0 %v3317_v40 }
 0x109   : > { %1966 = vmatprep.subr.bf16.mxu0 %v3325_v45 }
 0x10a   : > { %698 = vrot.lane.b32.xlu1 %v631_v52, %s3457_s5  ;;  %696 = vrot.lane.b32.xlu0 %v627_v51, %s3457_s5 }
 0x10c   : > { %1967 = vmatpush1.bf16.msra.mxu0 %v3323_v44 }
 0x10e   : > { %715 = vrot.lane.b32.xlu1 %v631_v52, %s3456_s29  ;;  %713 = vrot.lane.b32.xlu0 %v627_v51, %s3456_s29  ;;  %v3331_v51 = vld [vmem:[%s4678_s3 + $0x2c4] ss:$8 sps:$4 sm:$0xff]  }
 0x10f   : > { %1968 = vmatprep.subr.bf16.mxu0 %v3331_v51 }
 0x110   : > { %1969 = vmatpush1.bf16.msra.mxu0 %v3329_v50 }
 0x112   : > { %735 = vrot.lane.b32.xlu1 %v633_v54, %s3457_s5  ;;  %733 = vrot.lane.b32.xlu0 %v629_v53, %s3457_s5 }
 0x116   : > { %751 = vrot.lane.b32.xlu1 %v633_v54, %s3456_s29  ;;  %749 = vrot.lane.b32.xlu0 %v629_v53, %s3456_s29  ;;  %v3334_v54 = vld [vmem:[%s4678_s3 + $0x1d4] ss:$8 sps:$4 sm:$0xff]  }
 0x117   : > { %1344 = vmatprep.subr.bf16.mxu1 %v3334_v54 }
 0x11a   : > { %771 = vrot.lane.b32.xlu1 %v684_v56, %s3457_s5  ;;  %769 = vrot.lane.b32.xlu0 %v680_v55, %s3457_s5 }
 0x11e   : > { %788 = vrot.lane.b32.xlu1 %v684_v56, %s3456_s29  ;;  %786 = vrot.lane.b32.xlu0 %v680_v55, %s3456_s29  ;;  %v3332_v55 = vld [vmem:[%s4678_s3 + $0x1d0] ss:$8 sps:$4 sm:$0xff]  }
 0x11f   : > { %v3335_v56 = vld [vmem:[%s4678_s3 + $0x2d0] ss:$8 sps:$4 sm:$0xff]   ;;  %1345 = vmatpush1.bf16.msra.mxu1 %v3332_v55 }
 0x120   : > { %1346 = vmatprep.subr.bf16.mxu1 %v3340_v60 }
 0x122   : > { %809 = vrot.lane.b32.xlu1 %v686_v58, %s3457_s5  ;;  %807 = vrot.lane.b32.xlu0 %v682_v57, %s3457_s5  ;;  %s3459_s5 = smov 48  }
 0x123   : > { %1347 = vmatpush1.bf16.msra.mxu1 %v3338_v61 }
 0x124   : > { %1348 = vmatprep.subr.bf16.mxu1 %v3346_v5 }
 0x126   : > { %826 = vrot.lane.b32.xlu1 %v686_v58, %s3456_s29  ;;  %824 = vrot.lane.b32.xlu0 %v682_v57, %s3456_s29  ;;  %v3337_v57 = vld [vmem:[%s4678_s3 + $0x2d4] ss:$8 sps:$4 sm:$0xff]  }
 0x127   : > { %1970 = vmatprep.subr.bf16.mxu0 %v3337_v57  ;;  %1349 = vmatpush1.bf16.msra.mxu1 %v3344_v6 }
 0x128   : > { %1971 = vmatpush1.bf16.msra.mxu0 %v3335_v56  ;;  %1551 = vmatprep.subr.bf16.mxu1 %v3352_v14 }
 0x129   : > { %1972 = vmatprep.subr.bf16.mxu0 %v3343_v62 }
 0x12c   : > { %1973 = vmatpush1.bf16.msra.mxu0 %v3341_v63 }
 0x12d   : > { %1974 = vmatprep.subr.bf16.mxu0 %v3349_v7 }
 0x130   : > { %1975 = vmatpush1.bf16.msra.mxu0 %v3347_v8 }
 0x131   : > { %2353 = vmatprep.subr.bf16.mxu0 %v3361_v30 }
 0x15c   : > { %v710_v46 = vpop.permute.xlu1 %709  ;;  %v693_v47 = vpop.permute.xlu0 %692 }
 0x15d   : > { %721 = vst.msk [vmem:[#allocation2 + $0x81] sm:$0xff] %vm704_vm6, %v710_v46  ;;  %705 = vst.msk [vmem:[#allocation2 + $0x1] sm:$0xff] %vm704_vm6, %v693_v47 }
 0x160   : > { %v712_v52 = vpop.permute.xlu1 %711  ;;  %v730_v53 = vpop.permute.xlu0 %729 }
 0x161   : > { %722 = vst.msk [vmem:[#allocation2 + $0x91] sm:$0xff] %vm704_vm6, %v712_v52  ;;  %741 = vst.msk [vmem:[#allocation2 + $0x101] sm:$0xff] %vm704_vm6, %v730_v53 }
 0x164   : > { %v732_v58 = vpop.permute.xlu1 %731  ;;  %v695_v59 = vpop.permute.xlu0 %694  ;;  %v4093_v2 = vld [vmem:[#allocation2 + $0x81] sm:$0xff] }
 0x165   : > { %742 = vst.msk [vmem:[#allocation2 + $0x111] sm:$0xff] %vm704_vm6, %v732_v58  ;;  %706 = vst.msk [vmem:[#allocation2 + $0x11] sm:$0xff] %vm704_vm6, %v695_v59  ;;  %v1006_v11 = vld [vmem:[#allocation2 + $0x1] sm:$0xff] }
 0x166   : > { %v4211_v30 = vld [vmem:[#allocation2 + $0x82] sm:$0xff] }
 0x168   : > { %v748_v0 = vpop.permute.xlu1 %747  ;;  %v746_v1 = vpop.permute.xlu0 %745  ;;  %v4095_v3 = vld [vmem:[#allocation2 + $0x91] sm:$0xff]  ;;  %v1632_v20 = vld [vmem:[#allocation2 + $0x101] sm:$0xff] }
 0x169   : > { %758 = vst.msk [vmem:[#allocation2 + $0x191] sm:$0xff] %vm704_vm6, %v748_v0  ;;  %757 = vst.msk [vmem:[#allocation2 + $0x181] sm:$0xff] %vm704_vm6, %v746_v1  ;;  %v3002_v4 = vpack.i.bf16 %v4095_v3, %v4093_v2  ;;  %v845_v7 = vld [vmem:[#allocation2 + $0x100] sm:$0xff] }
 0x16b   : > { %3003 = vrot.lane.b32.xlu0 %v3002_v4, %s3458_s23 }
 0x16c   : > { %v768_v9 = vpop.permute.xlu1 %767  ;;  %v766_v10 = vpop.permute.xlu0 %765  ;;  %v1007_v12 = vld [vmem:[#allocation2 + $0x11] sm:$0xff] }
 0x16d   : > { %779 = vst.msk [vmem:[#allocation2 + $0x51] sm:$0xff] %vm704_vm6, %v768_v9  ;;  %778 = vst.msk [vmem:[#allocation2 + $0x41] sm:$0xff] %vm704_vm6, %v766_v10  ;;  %v3007_v13 = vpack.i.bf16 %v1007_v12, %v1006_v11  ;;  %v1633_v15 = vld [vmem:[#allocation2 + $0x111] sm:$0xff] }
 0x16e   : > { %v3022_v24 = vpack.i.bf16 %v1633_v15, %v1632_v20  ;;  %v846_v4 = vld [vmem:[#allocation2 + $0x110] sm:$0xff] }
 0x16f   : > { %3008 = vrot.lane.b32.xlu1 %v3007_v13, %s3459_s5  ;;  %v3102_v10 = vpack.i.bf16 %v846_v4, %v845_v7  ;;  %v2042_v12 = vld [vmem:[#allocation2 + $0x12] sm:$0xff] }
 0x170   : > { %v785_v16 = vpop.permute.xlu1 %784  ;;  %v783_v19 = vpop.permute.xlu0 %782  ;;  %v4120_v22 = vld [vmem:[#allocation2 + $0x181] sm:$0xff]  ;;  %v4122_v23 = vld [vmem:[#allocation2 + $0x191] sm:$0xff] }
 0x171   : > { %796 = vst.msk [vmem:[#allocation2 + $0xd1] sm:$0xff] %vm704_vm6, %v785_v16  ;;  %795 = vst.msk [vmem:[#allocation2 + $0xc1] sm:$0xff] %vm704_vm6, %v783_v19  ;;  %v3012_v25 = vpack.i.bf16 %v4122_v23, %v4120_v22 }
 0x173   : > { %3023 = vrot.lane.b32.xlu1 %v3022_v24, %s3459_s5  ;;  %3013 = vrot.lane.b32.xlu0 %v3012_v25, %s3458_s23 }
 0x174   : > { %v806_v26 = vpop.permute.xlu1 %805  ;;  %v804_v27 = vpop.permute.xlu0 %803  ;;  %v1010_v28 = vld [vmem:[#allocation2 + $0x41] sm:$0xff]  ;;  %v1011_v29 = vld [vmem:[#allocation2 + $0x51] sm:$0xff] }
 0x175   : > { %817 = vst.msk [vmem:[#allocation2 + $0x151] sm:$0xff] %vm704_vm6, %v806_v26  ;;  %816 = vst.msk [vmem:[#allocation2 + $0x141] sm:$0xff] %vm704_vm6, %v804_v27  ;;  %v3037_v35 = vpack.i.bf16 %v1011_v29, %v1010_v28  ;;  %v4199_v26 = vld [vmem:[#allocation2 + $0x180] sm:$0xff]  ;;  %v4201_v27 = vld [vmem:[#allocation2 + $0x190] sm:$0xff] }
 0x176   : > { %v3097_v28 = vpack.i.bf16 %v4201_v27, %v4199_v26  ;;  %v4207_v29 = vld [vmem:[#allocation2 + $0x92] sm:$0xff] }
 0x177   : > { %3028 = vrot.lane.b32.xlu1 %v3022_v24, %s3460_s9  ;;  %3018 = vrot.lane.b32.xlu0 %v3007_v13, %s3460_s9  ;;  %v2041_v13 = vld [vmem:[#allocation2 + $0x2] sm:$0xff]  ;;  %v2046_v4 = vld [vmem:[#allocation2 + $0x52] sm:$0xff] }
 0x178   : > { %v823_v31 = vpop.permute.xlu1 %822  ;;  %v821_v32 = vpop.permute.xlu0 %820  ;;  %v4137_v33 = vld [vmem:[#allocation2 + $0xc1] sm:$0xff]  ;;  %v4139_v34 = vld [vmem:[#allocation2 + $0xd1] sm:$0xff]  ;;  %v3112_v14 = vpack.i.bf16 %v2042_v12, %v2041_v13 }
 0x179   : > { %834 = vst.msk [vmem:[#allocation2 + $0x1d1] sm:$0xff] %vm704_vm6, %v823_v31  ;;  %833 = vst.msk [vmem:[#allocation2 + $0x1c1] sm:$0xff] %vm704_vm6, %v821_v32  ;;  %v3032_v36 = vpack.i.bf16 %v4139_v34, %v4137_v33  ;;  %v3107_v31 = vpack.i.bf16 %v4207_v29, %v4211_v30 }
 0x17b   : > { %3038 = vrot.lane.b32.xlu1 %v3037_v35, %s3459_s5  ;;  %3033 = vrot.lane.b32.xlu0 %v3032_v36, %s3458_s23 }
 0x17c   : > { %v699_v37 = vpop.permute.xlu1 %698  ;;  %v697_v38 = vpop.permute.xlu0 %696  ;;  %v1636_v39 = vld [vmem:[#allocation2 + $0x141] sm:$0xff]  ;;  %v1637_v40 = vld [vmem:[#allocation2 + $0x151] sm:$0xff] }
 0x17d   : > { %708 = vst.msk [vmem:[#allocation2 + $0x31] sm:$0xff] %vm704_vm6, %v699_v37  ;;  %707 = vst.msk [vmem:[#allocation2 + $0x21] sm:$0xff] %vm704_vm6, %v697_v38  ;;  %v3052_v41 = vpack.i.bf16 %v1637_v40, %v1636_v39 }
 0x17f   : > { %3043 = vrot.lane.b32.xlu0 %v3037_v35, %s3460_s9  ;;  %3053 = vrot.lane.b32.xlu1 %v3052_v41, %s3459_s5 }
 0x180   : > { %v716_v42 = vpop.permute.xlu1 %715  ;;  %v714_v43 = vpop.permute.xlu0 %713  ;;  %v4151_v44 = vld [vmem:[#allocation2 + $0x1c1] sm:$0xff]  ;;  %v4153_v45 = vld [vmem:[#allocation2 + $0x1d1] sm:$0xff] }
 0x181   : > { %724 = vst.msk [vmem:[#allocation2 + $0xb1] sm:$0xff] %vm704_vm6, %v716_v42  ;;  %723 = vst.msk [vmem:[#allocation2 + $0xa1] sm:$0xff] %vm704_vm6, %v714_v43  ;;  %v3047_v46 = vpack.i.bf16 %v4153_v45, %v4151_v44 }
 0x183   : > { %3058 = vrot.lane.b32.xlu1 %v3052_v41, %s3460_s9  ;;  %3048 = vrot.lane.b32.xlu0 %v3047_v46, %s3458_s23 }
 0x184   : > { %v736_v47 = vpop.permute.xlu1 %735  ;;  %v734_v48 = vpop.permute.xlu0 %733  ;;  %v1008_v49 = vld [vmem:[#allocation2 + $0x21] sm:$0xff]  ;;  %v1009_v50 = vld [vmem:[#allocation2 + $0x31] sm:$0xff] }
 0x185   : > { %744 = vst.msk [vmem:[#allocation2 + $0x131] sm:$0xff] %vm704_vm6, %v736_v47  ;;  %743 = vst.msk [vmem:[#allocation2 + $0x121] sm:$0xff] %vm704_vm6, %v734_v48  ;;  %v3067_v51 = vpack.i.bf16 %v1009_v50, %v1008_v49  ;;  %v2043_v32 = vld [vmem:[#allocation2 + $0x22] sm:$0xff]  ;;  %v2044_v35 = vld [vmem:[#allocation2 + $0x32] sm:$0xff] }
 0x186   : > { %v3147_v36 = vpack.i.bf16 %v2044_v35, %v2043_v32  ;;  %v4233_v48 = vld [vmem:[#allocation2 + $0x1c0] sm:$0xff]  ;;  %v4235_v49 = vld [vmem:[#allocation2 + $0x1d0] sm:$0xff] }
 0x187   : > { %3068 = vrot.lane.b32.xlu1 %v3067_v51, %s3459_s5  ;;  %v3167_v50 = vpack.i.bf16 %v4235_v49, %v4233_v48 }
 0x188   : > { %v752_v52 = vpop.permute.xlu1 %751  ;;  %v750_v53 = vpop.permute.xlu0 %749  ;;  %v4164_v54 = vld [vmem:[#allocation2 + $0xa1] sm:$0xff]  ;;  %v4166_v55 = vld [vmem:[#allocation2 + $0xb1] sm:$0xff] }
 0x189   : > { %760 = vst.msk [vmem:[#allocation2 + $0x1b1] sm:$0xff] %vm704_vm6, %v752_v52  ;;  %759 = vst.msk [vmem:[#allocation2 + $0x1a1] sm:$0xff] %vm704_vm6, %v750_v53  ;;  %v3062_v56 = vpack.i.bf16 %v4166_v55, %v4164_v54  ;;  %v4225_v43 = vld [vmem:[#allocation2 + $0xa2] sm:$0xff]  ;;  %v4227_v46 = vld [vmem:[#allocation2 + $0xb2] sm:$0xff] }
 0x18a   : > { %v3142_v47 = vpack.i.bf16 %v4227_v46, %v4225_v43  ;;  %v849_v52 = vld [vmem:[#allocation2 + $0x140] sm:$0xff]  ;;  %v850_v53 = vld [vmem:[#allocation2 + $0x150] sm:$0xff] }
 0x18b   : > { %3063 = vrot.lane.b32.xlu0 %v3062_v56, %s3458_s23  ;;  %v4243_v56 = vld [vmem:[#allocation2 + $0xd2] sm:$0xff] }
 0x18c   : > { %v772_v57 = vpop.permute.xlu1 %771  ;;  %v770_v58 = vpop.permute.xlu0 %769  ;;  %v1634_v15 = vld [vmem:[#allocation2 + $0x121] sm:$0xff]  ;;  %v1635_v16 = vld [vmem:[#allocation2 + $0x131] sm:$0xff] }
 0x18d   : > { %781 = vst.msk [vmem:[#allocation2 + $0x71] sm:$0xff] %vm704_vm6, %v772_v57  ;;  %780 = vst.msk [vmem:[#allocation2 + $0x61] sm:$0xff] %vm704_vm6, %v770_v58  ;;  %v3122_v24 = vpack.i.bf16 %v1635_v16, %v1634_v15  ;;  %v3172_v57 = vpack.i.bf16 %v850_v53, %v849_v52 }
 0x18f   : > { %3073 = vrot.lane.b32.xlu0 %v3067_v51, %s3460_s9  ;;  %v4241_v51 = vld [vmem:[#allocation2 + $0xc2] sm:$0xff] }
 0x190   : > { %v789_v59 = vpop.permute.xlu1 %788  ;;  %v787_v60 = vpop.permute.xlu0 %786  ;;  %v4191_v19 = vld [vmem:[#allocation2 + $0x1a1] sm:$0xff]  ;;  %v4193_v20 = vld [vmem:[#allocation2 + $0x1b1] sm:$0xff]  ;;  %v3177_v58 = vpack.i.bf16 %v4243_v56, %v4241_v51 }
 0x191   : > { %798 = vst.msk [vmem:[#allocation2 + $0xf1] sm:$0xff] %vm704_vm6, %v789_v59  ;;  %797 = vst.msk [vmem:[#allocation2 + $0xe1] sm:$0xff] %vm704_vm6, %v787_v60  ;;  %v3092_v25 = vpack.i.bf16 %v4193_v20, %v4191_v19  ;;  %v847_v59 = vld [vmem:[#allocation2 + $0x120] sm:$0xff]  ;;  %v848_v60 = vld [vmem:[#allocation2 + $0x130] sm:$0xff] }
 0x194   : > { %v810_v61 = vpop.permute.xlu1 %809  ;;  %v808_v62 = vpop.permute.xlu0 %807  ;;  %v1012_v63 = vld [vmem:[#allocation2 + $0x61] sm:$0xff]  ;;  %v1013_v0 = vld [vmem:[#allocation2 + $0x71] sm:$0xff] }
 0x195   : > { %819 = vst.msk [vmem:[#allocation2 + $0x171] sm:$0xff] %vm704_vm6, %v810_v61  ;;  %818 = vst.msk [vmem:[#allocation2 + $0x161] sm:$0xff] %vm704_vm6, %v808_v62  ;;  %v3082_v1 = vpack.i.bf16 %v1013_v0, %v1012_v63  ;;  %v4249_v61 = vld [vmem:[#allocation2 + $0x1a0] sm:$0xff]  ;;  %v4251_v62 = vld [vmem:[#allocation2 + $0x1b0] sm:$0xff]  ;;  %v3187_v63 = vpack.i.bf16 %v848_v60, %v847_v59 }
 0x196   : > { %v3182_v0 = vpack.i.bf16 %v4251_v62, %v4249_v61  ;;  %v2048_v7 = vld [vmem:[#allocation2 + $0x72] sm:$0xff] }
 0x197   : > { %3083 = vrot.lane.b32.xlu1 %v3082_v1, %s3459_s5 }
 0x198   : > { %v827_v5 = vpop.permute.xlu1 %826  ;;  %v825_v6 = vpop.permute.xlu0 %824  ;;  %v4181_v8 = vld [vmem:[#allocation2 + $0xe1] sm:$0xff]  ;;  %v4183_v9 = vld [vmem:[#allocation2 + $0xf1] sm:$0xff] }
 0x199   : > { %836 = vst.msk [vmem:[#allocation2 + $0x1f1] sm:$0xff] %vm704_vm6, %v827_v5  ;;  %835 = vst.msk [vmem:[#allocation2 + $0x1e1] sm:$0xff] %vm704_vm6, %v825_v6  ;;  %v3077_v11 = vpack.i.bf16 %v4183_v9, %v4181_v8  ;;  %v2047_v6 = vld [vmem:[#allocation2 + $0x62] sm:$0xff] }
 0x19a   : > { %v3217_v12 = vpack.i.bf16 %v2048_v7, %v2047_v6 }
 0x19b   : > { %3103 = vrot.lane.b32.xlu1 %v3102_v10, %s3459_s5  ;;  %3078 = vrot.lane.b32.xlu0 %v3077_v11, %s3458_s23  ;;  %v4263_v11 = vld [vmem:[#allocation2 + $0xf2] sm:$0xff] }
 0x19c   : > { %v1638_v37 = vld [vmem:[#allocation2 + $0x161] sm:$0xff]  ;;  %v1639_v38 = vld [vmem:[#allocation2 + $0x171] sm:$0xff] }
 0x19d   : > { %v3152_v41 = vpack.i.bf16 %v1639_v38, %v1638_v37  ;;  %v852_v15 = vld [vmem:[#allocation2 + $0x170] sm:$0xff] }
 0x19f   : > { %3113 = vrot.lane.b32.xlu1 %v3112_v14, %s3459_s5  ;;  %3088 = vrot.lane.b32.xlu0 %v3082_v1, %s3460_s9  ;;  %v2045_v1 = vld [vmem:[#allocation2 + $0x42] sm:$0xff] }
 0x1a0   : > { %v4217_v39 = vld [vmem:[#allocation2 + $0x1e1] sm:$0xff]  ;;  %v4219_v40 = vld [vmem:[#allocation2 + $0x1f1] sm:$0xff]  ;;  %v3192_v5 = vpack.i.bf16 %v2046_v4, %v2045_v1 }
 0x1a1   : > { %v3137_v42 = vpack.i.bf16 %v4219_v40, %v4217_v39  ;;  %v4269_v16 = vld [vmem:[#allocation2 + $0x1e0] sm:$0xff] }
 0x1a3   : > { %3123 = vrot.lane.b32.xlu1 %v3122_v24, %s3459_s5  ;;  %3093 = vrot.lane.b32.xlu0 %v3092_v25, %s3458_s23 }
 0x1a7   : > { %3128 = vrot.lane.b32.xlu1 %v3122_v24, %s3460_s9  ;;  %3098 = vrot.lane.b32.xlu0 %v3097_v28, %s3458_s23  ;;  %v4271_v24 = vld [vmem:[#allocation2 + $0x1f0] sm:$0xff] }
 0x1a8   : > { %v3222_v28 = vpack.i.bf16 %v4271_v24, %v4269_v16 }
 0x1ab   : > { %3133 = vrot.lane.b32.xlu1 %v3112_v14, %s3460_s9  ;;  %3108 = vrot.lane.b32.xlu0 %v3107_v31, %s3458_s23  ;;  %v851_v14 = vld [vmem:[#allocation2 + $0x160] sm:$0xff] }
 0x1ac   : > { %v3227_v25 = vpack.i.bf16 %v852_v15, %v851_v14 }
 0x1af   : > { %3148 = vrot.lane.b32.xlu1 %v3147_v36, %s3459_s5  ;;  %3118 = vrot.lane.b32.xlu0 %v3102_v10, %s3460_s9  ;;  %v4261_v10 = vld [vmem:[#allocation2 + $0xe2] sm:$0xff] }
 0x1b0   : > { %v3212_v13 = vpack.i.bf16 %v4263_v11, %v4261_v10 }
 0x1b3   : > { %3153 = vrot.lane.b32.xlu1 %v3152_v41, %s3459_s5  ;;  %3138 = vrot.lane.b32.xlu0 %v3137_v42, %s3458_s23 }
 0x1b7   : > { %3158 = vrot.lane.b32.xlu1 %v3152_v41, %s3460_s9  ;;  %3143 = vrot.lane.b32.xlu0 %v3142_v47, %s3458_s23 }
 0x1bb   : > { %3163 = vrot.lane.b32.xlu1 %v3147_v36, %s3460_s9  ;;  %3168 = vrot.lane.b32.xlu0 %v3167_v50, %s3458_s23 }
 0x1bf   : > { %3173 = vrot.lane.b32.xlu1 %v3172_v57, %s3459_s5  ;;  %3178 = vrot.lane.b32.xlu0 %v3177_v58, %s3458_s23 }
 0x1c3   : > { %3188 = vrot.lane.b32.xlu1 %v3187_v63, %s3459_s5  ;;  %3183 = vrot.lane.b32.xlu0 %v3182_v0, %s3458_s23 }
 0x1c7   : > { %3193 = vrot.lane.b32.xlu1 %v3192_v5, %s3459_s5  ;;  %3198 = vrot.lane.b32.xlu0 %v3187_v63, %s3460_s9 }
 0x1cb   : > { %3208 = vrot.lane.b32.xlu1 %v3192_v5, %s3460_s9  ;;  %3203 = vrot.lane.b32.xlu0 %v3172_v57, %s3460_s9 }
 0x1cf   : > { %3218 = vrot.lane.b32.xlu1 %v3217_v12, %s3459_s5  ;;  %3213 = vrot.lane.b32.xlu0 %v3212_v13, %s3458_s23 }
 0x1d3   : > { %3228 = vrot.lane.b32.xlu1 %v3227_v25, %s3459_s5  ;;  %3223 = vrot.lane.b32.xlu0 %v3222_v28, %s3458_s23  ;;  %v3350_v28 = vld [vmem:[%s4678_s3] ss:$8 sps:$4 sm:$0xff]   ;;  %s2929_s5 = sshll.u32 %s4686_s25, 3 }
 0x1d7   : > { %3238 = vrot.lane.b32.xlu1 %v3217_v12, %s3460_s9  ;;  %3233 = vrot.lane.b32.xlu0 %v3227_v25, %s3460_s9  ;;  %s4631_s9 = scalar_lea.vmem %s4681_s6, %s2929_s5 }
 0x1dd   : > { %v3004_v31 = vpop.permute.xlu0 %3003 }
 0x1de   : > { %v3006_v35 = vunpack.i.h.bf16 %v3004_v31  ;;  %v3005_v36 = vunpack.i.l.bf16 %v3004_v31  ;;  %v3359_v31 = vld [vmem:[%s4678_s3 + $0x300] ss:$8 sps:$4 sm:$0xff]  }
 0x1e1   : > { %v3009_v32 = vpop.permute.xlu1 %3008 }
 0x1e2   : > { %v3011_v37 = vunpack.i.h.bf16 %v3009_v32  ;;  %v3010_v38 = vunpack.i.l.bf16 %v3009_v32 }
 0x1e4   : > { %v1110_v41 = vsel %vm941_vm7, %v3005_v36, %v3010_v38  ;;  %v1111_v42 = vsel %vm941_vm7, %v3006_v35, %v3011_v37  ;;  %v3365_v37 = vld [vmem:[%s4678_s3 + $0x310] ss:$8 sps:$4 sm:$0xff]  }
 0x1e5   : > { %v3024_v47 = vpop.permute.xlu1 %3023  ;;  %v3014_v50 = vpop.permute.xlu0 %3013  ;;  %v1119_v52 = vpack.c.bf16 %v1111_v42, %v1110_v41  ;;  %v3358_v41 = vld [vmem:[%s4678_s3 + $0x24] ss:$8 sps:$4 sm:$0xff]  }
 0x1e6   : > { %v3026_v53 = vunpack.i.h.bf16 %v3024_v47  ;;  %v3025_v57 = vunpack.i.l.bf16 %v3024_v47  ;;  %v3016_v58 = vunpack.i.h.bf16 %v3014_v50  ;;  %v3015_v59 = vunpack.i.l.bf16 %v3014_v50  ;;  %v3373_v42 = vld [vmem:[%s4678_s3 + $0x324] ss:$8 sps:$4 sm:$0xff]   ;;  %v3356_v50 = vld [vmem:[%s4678_s3 + $0x20] ss:$8 sps:$4 sm:$0xff]  }
 0x1e7   : > { %1350 = vmatprep.mubr.bf16.mxu1 %v1119_v52  ;;  %v3371_v52 = vld [vmem:[%s4678_s3 + $0x320] ss:$8 sps:$4 sm:$0xff]  }
 0x1e8   : > { %v1736_v60 = vsel %vm941_vm7, %v3015_v59, %v3025_v57  ;;  %v1737_v63 = vsel %vm941_vm7, %v3016_v58, %v3026_v53  ;;  %v3364_v57 = vld [vmem:[%s4678_s3 + $0x34] ss:$8 sps:$4 sm:$0xff]   ;;  %v3362_v59 = vld [vmem:[%s4678_s3 + $0x30] ss:$8 sps:$4 sm:$0xff]  }
 0x1e9   : > { %v3029_v0 = vpop.permute.xlu1 %3028  ;;  %v3019_v1 = vpop.permute.xlu0 %3018  ;;  %v1745_v4 = vpack.c.bf16 %v1737_v63, %v1736_v60  ;;  %v3379_v58 = vld [vmem:[%s4678_s3 + $0x334] ss:$8 sps:$4 sm:$0xff]   ;;  %v3377_v60 = vld [vmem:[%s4678_s3 + $0x330] ss:$8 sps:$4 sm:$0xff]  }
 0x1ea   : > { %v3031_v5 = vunpack.i.h.bf16 %v3029_v0  ;;  %v3030_v6 = vunpack.i.l.bf16 %v3029_v0  ;;  %v3021_v7 = vunpack.i.h.bf16 %v3019_v1  ;;  %v3020_v12 = vunpack.i.l.bf16 %v3019_v1  ;;  %v3370_v0 = vld [vmem:[%s4678_s3 + $0x44] ss:$8 sps:$4 sm:$0xff]  }
 0x1eb   : > { %1976 = vmatprep.mubr.bf16.mxu0 %v1745_v4  ;;  %v3385_v1 = vld [vmem:[%s4678_s3 + $0x344] ss:$8 sps:$4 sm:$0xff]  }
 0x1ec   : > { %v1729_v13 = vsel %vm941_vm7, %v4122_v23, %v3031_v5  ;;  %v1728_v14 = vsel %vm941_vm7, %v4120_v22, %v3030_v6  ;;  %v1103_v15 = vsel %vm941_vm7, %v4095_v3, %v3021_v7  ;;  %v1102_v25 = vsel %vm941_vm7, %v4093_v2, %v3020_v12  ;;  %v3355_v3 = vld [vmem:[%s4678_s3 + $0x14] ss:$8 sps:$4 sm:$0xff]   ;;  %v3353_v22 = vld [vmem:[%s4678_s3 + $0x10] ss:$8 sps:$4 sm:$0xff]   ;;  %v3368_v5 = vld [vmem:[%s4678_s3 + $0x40] ss:$8 sps:$4 sm:$0xff]  }
 0x1ed   : > { %v1744_v32 = vpack.c.bf16 %v1729_v13, %v1728_v14  ;;  %v1118_v35 = vpack.c.bf16 %v1103_v15, %v1102_v25  ;;  %v4299_v23 = vpop.permute.xlu1 %3038  ;;  %v4301_v36 = vpop.permute.xlu0 %3033  ;;  %v3367_v2 = vld [vmem:[%s4678_s3 + $0x314] ss:$8 sps:$4 sm:$0xff]   ;;  %v3383_v6 = vld [vmem:[%s4678_s3 + $0x340] ss:$8 sps:$4 sm:$0xff]  }
 0x1ee   : > { %v3376_v12 = vld [vmem:[%s4678_s3 + $0x54] ss:$8 sps:$4 sm:$0xff]  }
 0x1ef   : > { %1351 = vmatmul.mubr.bf16.vlgmr.msra.gmra.mrb[8].mxu1 %v1118_v35  ;;  %1977 = vmatmul.mubr.bf16.vlgmr.msra.gmra.mrb[8].mxu0 %v1744_v32  ;;  %v3391_v13 = vld [vmem:[%s4678_s3 + $0x354] ss:$8 sps:$4 sm:$0xff]   ;;  %v3040_v32 = vunpack.i.l.bf16 %v4299_v23  ;;  %v3036_v35 = vunpack.i.h.bf16 %v4301_v36 }
 0x1f0   : > { %1552 = vmatpush1.bf16.msra.mxu1 %v3350_v28  ;;  %2354 = vmatpush1.bf16.msra.mxu0 %v3359_v31  ;;  %v3041_v31 = vunpack.i.h.bf16 %v4299_v23 }
 0x1f1   : > { %v4315_v38 = vpop.permute.xlu1 %3053  ;;  %1553 = vmatprep.subr.bf16.mxu1 %v3355_v3  ;;  %2355 = vmatprep.subr.bf16.mxu0 %v3367_v2  ;;  %v4323_v47 = vpop.permute.xlu0 %3043  ;;  %v3035_v3 = vunpack.i.l.bf16 %v4301_v36  ;;  %v3374_v2 = vld [vmem:[%s4678_s3 + $0x50] ss:$8 sps:$4 sm:$0xff]   ;;  %v3382_v36 = vld [vmem:[%s4678_s3 + $0x64] ss:$8 sps:$4 sm:$0xff]  }
 0x1f4   : > { %1554 = vmatpush1.bf16.msra.mxu1 %v3353_v22  ;;  %2356 = vmatpush1.bf16.msra.mxu0 %v3365_v37 }
 0x1f5   : > { %v4331_v53 = vpop.permute.xlu1 %3058  ;;  %1555 = vmatprep.subr.bf16.mxu1 %v3358_v41  ;;  %2357 = vmatprep.subr.bf16.mxu0 %v3373_v42  ;;  %v4345_v63 = vpop.permute.xlu0 %3048  ;;  %v3389_v41 = vld [vmem:[%s4678_s3 + $0x350] ss:$8 sps:$4 sm:$0xff]  }
 0x1f8   : > { %1556 = vmatpush1.bf16.msra.mxu1 %v3356_v50  ;;  %2358 = vmatpush1.bf16.msra.mxu0 %v3371_v52  ;;  %v3397_v50 = vld [vmem:[%s4678_s3 + $0x364] ss:$8 sps:$4 sm:$0xff]  }
 0x1f9   : > { %1557 = vmatprep.subr.bf16.mxu1 %v3364_v57  ;;  %2359 = vmatprep.subr.bf16.mxu0 %v3379_v58  ;;  %v3069_v4 = vpop.permute.xlu1 %3068  ;;  %v1114_v58 = vsel %vm941_vm7, %v3035_v3, %v3040_v32  ;;  %v3392_v32 = vld [vmem:[%s4678_s3 + $0x80] ss:$8 sps:$4 sm:$0xff]  }
 0x1fa   : > { %v3071_v14 = vunpack.i.h.bf16 %v3069_v4  ;;  %v3070_v15 = vunpack.i.l.bf16 %v3069_v4 }
 0x1fc   : > { %1558 = vmatpush1.bf16.msra.mxu1 %v3362_v59  ;;  %2360 = vmatpush1.bf16.msra.mxu0 %v3377_v60  ;;  %v1115_v59 = vsel %vm941_vm7, %v3036_v35, %v3041_v31  ;;  %v3380_v60 = vld [vmem:[%s4678_s3 + $0x60] ss:$8 sps:$4 sm:$0xff]   ;;  %v3409_v31 = vld [vmem:[%s4678_s3 + $0x384] ss:$8 sps:$4 sm:$0xff]  }
 0x1fd   : > { %v3064_v7 = vpop.permute.xlu0 %3063  ;;  %1559 = vmatprep.subr.bf16.mxu1 %v3370_v0  ;;  %2361 = vmatprep.subr.bf16.mxu0 %v3385_v1 }
 0x1fe   : > { %v3066_v25 = vunpack.i.h.bf16 %v3064_v7  ;;  %v3065_v28 = vunpack.i.l.bf16 %v3064_v7  ;;  %v3046_v7 = vunpack.i.h.bf16 %v4323_v47 }
 0x200   : > { %1560 = vmatpush1.bf16.msra.mxu1 %v3368_v5  ;;  %v1112_v22 = vsel %vm941_vm7, %v3065_v28, %v3070_v15  ;;  %v1113_v37 = vsel %vm941_vm7, %v3066_v25, %v3071_v14  ;;  %2362 = vmatpush1.bf16.msra.mxu0 %v3383_v6  ;;  %v3388_v5 = vld [vmem:[%s4678_s3 + $0x74] ss:$8 sps:$4 sm:$0xff]   ;;  %v3395_v6 = vld [vmem:[%s4678_s3 + $0x360] ss:$8 sps:$4 sm:$0xff]   ;;  %v3394_v15 = vld [vmem:[%s4678_s3 + $0x84] ss:$8 sps:$4 sm:$0xff]   ;;  %v1107_v28 = vsel %vm941_vm7, %v4139_v34, %v3046_v7 }
 0x201   : > { %v3074_v42 = vpop.permute.xlu0 %3073  ;;  %1561 = vmatprep.subr.bf16.mxu1 %v3376_v12  ;;  %v1121_v23 = vpack.c.bf16 %v1113_v37, %v1112_v22  ;;  %2363 = vmatprep.subr.bf16.mxu0 %v3391_v13  ;;  %v3045_v12 = vunpack.i.l.bf16 %v4323_v47  ;;  %v3386_v13 = vld [vmem:[%s4678_s3 + $0x70] ss:$8 sps:$4 sm:$0xff]   ;;  %v3407_v34 = vld [vmem:[%s4678_s3 + $0x380] ss:$8 sps:$4 sm:$0xff]  }
 0x202   : > { %v3076_v52 = vunpack.i.h.bf16 %v3074_v42  ;;  %v3075_v57 = vunpack.i.l.bf16 %v3074_v42  ;;  %v3401_v47 = vld [vmem:[%s4678_s3 + $0x370] ss:$8 sps:$4 sm:$0xff]  }
 0x203   : > { %1360 = vmatprep.mubr.bf16.mxu1 %v1121_v23  ;;  %v1106_v25 = vsel %vm941_vm7, %v4137_v33, %v3045_v12  ;;  %v3400_v33 = vld [vmem:[%s4678_s3 + $0x94] ss:$8 sps:$4 sm:$0xff]  }
 0x204   : > { %1562 = vmatpush1.bf16.msra.mxu1 %v3374_v2  ;;  %v1104_v0 = vsel %vm941_vm7, %v4164_v54, %v3075_v57  ;;  %v1105_v1 = vsel %vm941_vm7, %v4166_v55, %v3076_v52  ;;  %2364 = vmatpush1.bf16.msra.mxu0 %v3389_v41  ;;  %v1123_v54 = vpack.c.bf16 %v1115_v59, %v1114_v58  ;;  %v3403_v55 = vld [vmem:[%s4678_s3 + $0x374] ss:$8 sps:$4 sm:$0xff]  }
 0x205   : > { %1563 = vmatprep.subr.bf16.mxu1 %v3382_v36  ;;  %v1120_v4 = vpack.c.bf16 %v1105_v1, %v1104_v0  ;;  %2365 = vmatprep.subr.bf16.mxu0 %v3397_v50  ;;  %v1122_v2 = vpack.c.bf16 %v1107_v28, %v1106_v25  ;;  %v3415_v23 = vld [vmem:[%s4678_s3 + $0x394] ss:$8 sps:$4 sm:$0xff]   ;;  %v3398_v36 = vld [vmem:[%s4678_s3 + $0x90] ss:$8 sps:$4 sm:$0xff]  }
 0x206   : > { %v3413_v0 = vld [vmem:[%s4678_s3 + $0x390] ss:$8 sps:$4 sm:$0xff]  }
 0x207   : > { %1361 = vmatmul.mubr.bf16.gmra.mrb[12].mxu1 %v1120_v4 }
 0x208   : > { %1564 = vmatpush1.bf16.msra.mxu1 %v3380_v60  ;;  %1370 = vmatprep.mubr.bf16.mxu1 %v1123_v54  ;;  %v3406_v60 = vld [vmem:[%s4678_s3 + $0xa4] ss:$8 sps:$4 sm:$0xff]  }
 0x209   : > { %v3084_v14 = vpop.permute.xlu1 %3083  ;;  %1565 = vmatprep.subr.bf16.mxu1 %v3388_v5  ;;  %2366 = vmatpush1.bf16.msra.mxu0 %v3395_v6  ;;  %v3421_v5 = vld [vmem:[%s4678_s3 + $0x3a4] ss:$8 sps:$4 sm:$0xff]   ;;  %v3404_v6 = vld [vmem:[%s4678_s3 + $0xa0] ss:$8 sps:$4 sm:$0xff]  }
 0x20a   : > { %2367 = vmatprep.subr.bf16.mxu0 %v3403_v55  ;;  %v3086_v22 = vunpack.i.h.bf16 %v3084_v14  ;;  %v3085_v37 = vunpack.i.l.bf16 %v3084_v14  ;;  %v3412_v14 = vld [vmem:[%s4678_s3 + $0xb4] ss:$8 sps:$4 sm:$0xff]  }
 0x20c   : > { %1566 = vmatpush1.bf16.msra.mxu1 %v3386_v13 }
 0x20d   : > { %v4422_v35 = vpop.permute.xlu1 %3103  ;;  %v3079_v3 = vpop.permute.xlu0 %3078  ;;  %1567 = vmatprep.subr.bf16.mxu1 %v3394_v15  ;;  %2368 = vmatpush1.bf16.msra.mxu0 %v3401_v47  ;;  %v3419_v15 = vld [vmem:[%s4678_s3 + $0x3a0] ss:$8 sps:$4 sm:$0xff]  }
 0x20e   : > { %v3081_v41 = vunpack.i.h.bf16 %v3079_v3  ;;  %v3080_v42 = vunpack.i.l.bf16 %v3079_v3  ;;  %2369 = vmatprep.subr.bf16.mxu0 %v3409_v31  ;;  %v3051_v31 = vunpack.i.h.bf16 %v4345_v63  ;;  %v3056_v3 = vunpack.i.h.bf16 %v4315_v38 }
 0x20f   : > { %1371 = vmatmul.mubr.bf16.gmra.mrb[16].mxu1 %v1122_v2  ;;  %v3410_v2 = vld [vmem:[%s4678_s3 + $0xb0] ss:$8 sps:$4 sm:$0xff]  }
 0x210   : > { %1568 = vmatpush1.bf16.msra.mxu1 %v3392_v32  ;;  %v1116_v50 = vsel %vm941_vm7, %v3080_v42, %v3085_v37  ;;  %v1117_v52 = vsel %vm941_vm7, %v3081_v41, %v3086_v22  ;;  %v3050_v32 = vunpack.i.l.bf16 %v4345_v63  ;;  %v3055_v22 = vunpack.i.l.bf16 %v4315_v38 }
 0x211   : > { %v4438_v57 = vpop.permute.xlu1 %3113  ;;  %v3089_v58 = vpop.permute.xlu0 %3088  ;;  %1569 = vmatprep.subr.bf16.mxu1 %v3400_v33  ;;  %v1125_v59 = vpack.c.bf16 %v1117_v52, %v1116_v50  ;;  %2370 = vmatpush1.bf16.msra.mxu0 %v3407_v34  ;;  %v3106_v37 = vunpack.i.h.bf16 %v4422_v35  ;;  %v3105_v41 = vunpack.i.l.bf16 %v4422_v35  ;;  %v3425_v50 = vld [vmem:[%s4678_s3 + $0x3b0] ss:$8 sps:$4 sm:$0xff]   ;;  %v3433_v35 = vld [vmem:[%s4678_s3 + $0x3c4] ss:$8 sps:$4 sm:$0xff]  }
 0x212   : > { %v3091_v1 = vunpack.i.h.bf16 %v3089_v58  ;;  %v3090_v4 = vunpack.i.l.bf16 %v3089_v58  ;;  %2371 = vmatprep.subr.bf16.mxu0 %v3415_v23 }
 0x213   : > { %1380 = vmatprep.mubr.bf16.mxu1 %v1125_v59 }
 0x214   : > { %1570 = vmatpush1.bf16.msra.mxu1 %v3398_v36  ;;  %v1108_v7 = vsel %vm941_vm7, %v4181_v8, %v3090_v4  ;;  %v1109_v12 = vsel %vm941_vm7, %v4183_v9, %v3091_v1  ;;  %v3427_v9 = vld [vmem:[%s4678_s3 + $0x3b4] ss:$8 sps:$4 sm:$0xff]   ;;  %v3418_v36 = vld [vmem:[%s4678_s3 + $0xc4] ss:$8 sps:$4 sm:$0xff]   ;;  %v3416_v1 = vld [vmem:[%s4678_s3 + $0xc0] ss:$8 sps:$4 sm:$0xff]  }
 0x215   : > { %v3124_v54 = vpop.permute.xlu1 %3123  ;;  %v3094_v55 = vpop.permute.xlu0 %3093  ;;  %1571 = vmatprep.subr.bf16.mxu1 %v3406_v60  ;;  %v1124_v13 = vpack.c.bf16 %v1109_v12, %v1108_v7  ;;  %2372 = vmatpush1.bf16.msra.mxu0 %v3413_v0  ;;  %v1740_v60 = vsel %vm941_vm7, %v3050_v32, %v3055_v22  ;;  %v1741_v0 = vsel %vm941_vm7, %v3051_v31, %v3056_v3  ;;  %v3437_v31 = vld [vmem:[%s4678_s3 + $0x3d0] ss:$8 sps:$4 sm:$0xff]  }
 0x216   : > { %v3126_v47 = vunpack.i.h.bf16 %v3124_v54  ;;  %v3125_v25 = vunpack.i.l.bf16 %v3124_v54  ;;  %v3096_v28 = vunpack.i.h.bf16 %v3094_v55  ;;  %v3095_v8 = vunpack.i.l.bf16 %v3094_v55  ;;  %2373 = vmatprep.subr.bf16.mxu0 %v3421_v5 }
 0x217   : > { %1381 = vmatmul.mubr.bf16.gmra.mrb[20].mxu1 %v1124_v13 }
 0x218   : > { %1572 = vmatpush1.bf16.msra.mxu1 %v3404_v6  ;;  %v1738_v33 = vsel %vm941_vm7, %v3095_v8, %v3125_v25  ;;  %v1739_v34 = vsel %vm941_vm7, %v3096_v28, %v3126_v47  ;;  %v1749_v47 = vpack.c.bf16 %v1741_v0, %v1740_v60  ;;  %v3439_v25 = vld [vmem:[%s4678_s3 + $0x3d4] ss:$8 sps:$4 sm:$0xff]   ;;  %v3422_v28 = vld [vmem:[%s4678_s3 + $0xd0] ss:$8 sps:$4 sm:$0xff]   ;;  %v3116_v0 = vunpack.i.h.bf16 %v4438_v57 }
 0x219   : > { %v3129_v42 = vpop.permute.xlu1 %3128  ;;  %v3099_v63 = vpop.permute.xlu0 %3098  ;;  %1573 = vmatprep.subr.bf16.mxu1 %v3412_v14  ;;  %v1747_v23 = vpack.c.bf16 %v1739_v34, %v1738_v33  ;;  %2374 = vmatpush1.bf16.msra.mxu0 %v3419_v15  ;;  %v3424_v14 = vld [vmem:[%s4678_s3 + $0xd4] ss:$8 sps:$4 sm:$0xff]   ;;  %v3431_v15 = vld [vmem:[%s4678_s3 + $0x3c0] ss:$8 sps:$4 sm:$0xff]  }
 0x21a   : > { %v3131_v52 = vunpack.i.h.bf16 %v3129_v42  ;;  %v3130_v58 = vunpack.i.l.bf16 %v3129_v42  ;;  %v3101_v38 = vunpack.i.h.bf16 %v3099_v63  ;;  %v3100_v59 = vunpack.i.l.bf16 %v3099_v63  ;;  %2375 = vmatprep.subr.bf16.mxu0 %v3427_v9  ;;  %v3428_v33 = vld [vmem:[%s4678_s3 + $0xe0] ss:$8 sps:$4 sm:$0xff]  }
 0x21b   : > { %1986 = vmatprep.mubr.bf16.mxu0 %v1747_v23 }
 0x21c   : > { %1574 = vmatpush1.bf16.msra.mxu1 %v3410_v2  ;;  %v950_v4 = vsel %vm941_vm7, %v3100_v59, %v3105_v41  ;;  %v951_v5 = vsel %vm941_vm7, %v3101_v38, %v3106_v37  ;;  %v1730_v6 = vsel %vm941_vm7, %v4191_v19, %v3130_v58  ;;  %v1731_v7 = vsel %vm941_vm7, %v4193_v20, %v3131_v52  ;;  %v3442_v2 = vld [vmem:[%s4678_s3 + $0x3e4] ss:$8 sps:$4 sm:$0xff]   ;;  %v3445_v52 = vld [vmem:[%s4678_s3 + $0x3f4] ss:$8 sps:$4 sm:$0xff]   ;;  %v3434_v59 = vld [vmem:[%s4678_s3 + $0xf0] ss:$8 sps:$4 sm:$0xff]  }
 0x21d   : > { %v4496_v12 = vpop.permute.xlu1 %3133  ;;  %v4498_v54 = vpop.permute.xlu0 %3108  ;;  %1575 = vmatprep.subr.bf16.mxu1 %v3418_v36  ;;  %v959_v55 = vpack.c.bf16 %v951_v5, %v950_v4  ;;  %v1746_v13 = vpack.c.bf16 %v1731_v7, %v1730_v6  ;;  %2376 = vmatpush1.bf16.msra.mxu0 %v3425_v50  ;;  %v3061_v19 = vunpack.i.h.bf16 %v4331_v53  ;;  %v3060_v20 = vunpack.i.l.bf16 %v4331_v53  ;;  %v3430_v53 = vld [vmem:[%s4678_s3 + $0xe4] ss:$8 sps:$4 sm:$0xff]   ;;  %v3443_v7 = vld [vmem:[%s4678_s3 + $0x3f0] ss:$8 sps:$4 sm:$0xff]  }
 0x21e   : > { %2377 = vmatprep.subr.bf16.mxu0 %v3433_v35  ;;  %v3111_v58 = vunpack.i.h.bf16 %v4498_v54  ;;  %v3110_v38 = vunpack.i.l.bf16 %v4498_v54 }
 0x21f   : > { %1583 = vmatprep.mubr.bf16.mxu1 %v959_v55  ;;  %1987 = vmatmul.mubr.bf16.gmra.mrb[12].mxu0 %v1746_v13  ;;  %v1732_v32 = vsel %vm941_vm7, %v4151_v44, %v3060_v20  ;;  %v1733_v3 = vsel %vm941_vm7, %v4153_v45, %v3061_v19  ;;  %v3436_v44 = vld [vmem:[%s4678_s3 + $0xf4] ss:$8 sps:$4 sm:$0xff]   ;;  %v3440_v45 = vld [vmem:[%s4678_s3 + $0x3e0] ss:$8 sps:$4 sm:$0xff]  }
 0x220   : > { %1576 = vmatpush1.bf16.msra.mxu1 %v3416_v1  ;;  %1996 = vmatprep.mubr.bf16.mxu0 %v1749_v47  ;;  %v1748_v42 = vpack.c.bf16 %v1733_v3, %v1732_v32  ;;  %v3115_v1 = vunpack.i.l.bf16 %v4438_v57 }
 0x221   : > { %v4514_v8 = vpop.permute.xlu1 %3148  ;;  %v3119_v9 = vpop.permute.xlu0 %3118  ;;  %1577 = vmatprep.subr.bf16.mxu1 %v3424_v14  ;;  %2378 = vmatpush1.bf16.msra.mxu0 %v3431_v15  ;;  %v2146_v15 = vsel %vm941_vm7, %v3111_v58, %v3116_v0 }
 0x222   : > { %2379 = vmatprep.subr.bf16.mxu0 %v3439_v25  ;;  %v3121_v34 = vunpack.i.h.bf16 %v3119_v9  ;;  %v3120_v22 = vunpack.i.l.bf16 %v3119_v9  ;;  %v2145_v57 = vsel %vm941_vm7, %v3110_v38, %v3115_v1  ;;  %v3135_v9 = vunpack.i.l.bf16 %v4496_v12 }
 0x223   : > { %v2154_v32 = vpack.c.bf16 %v2146_v15, %v2145_v57  ;;  %v3151_v3 = vunpack.i.h.bf16 %v4514_v8 }
 0x224   : > { %1578 = vmatpush1.bf16.msra.mxu1 %v3422_v28  ;;  %v943_v54 = vsel %vm941_vm7, %v4201_v27, %v3121_v34  ;;  %v942_v55 = vsel %vm941_vm7, %v4199_v26, %v3120_v22  ;;  %v3136_v27 = vunpack.i.h.bf16 %v4496_v12  ;;  %v2137_v34 = vsel %vm941_vm7, %v4211_v30, %v3135_v9 }
 0x225   : > { %v3154_v37 = vpop.permute.xlu1 %3153  ;;  %v3139_v41 = vpop.permute.xlu0 %3138  ;;  %1579 = vmatprep.subr.bf16.mxu1 %v3430_v53  ;;  %2380 = vmatpush1.bf16.msra.mxu0 %v3437_v31  ;;  %v958_v47 = vpack.c.bf16 %v943_v54, %v942_v55 }
 0x226   : > { %v3156_v63 = vunpack.i.h.bf16 %v3154_v37  ;;  %v3155_v23 = vunpack.i.l.bf16 %v3154_v37  ;;  %v3141_v36 = vunpack.i.h.bf16 %v3139_v41  ;;  %v3140_v50 = vunpack.i.l.bf16 %v3139_v41  ;;  %2381 = vmatprep.subr.bf16.mxu0 %v3442_v2 }
 0x227   : > { %1997 = vmatmul.mubr.bf16.gmra.mrb[16].mxu0 %v1748_v42 }
 0x228   : > { %1580 = vmatpush1.bf16.msra.mxu1 %v3428_v33  ;;  %v1742_v35 = vsel %vm941_vm7, %v3140_v50, %v3155_v23  ;;  %v1743_v60 = vsel %vm941_vm7, %v3141_v36, %v3156_v63  ;;  %v2138_v33 = vsel %vm941_vm7, %v4207_v29, %v3136_v27 }
 0x229   : > { %v3159_v4 = vpop.permute.xlu1 %3158  ;;  %v3144_v5 = vpop.permute.xlu0 %3143  ;;  %1581 = vmatprep.subr.bf16.mxu1 %v3436_v44  ;;  %v1751_v6 = vpack.c.bf16 %v1743_v60, %v1742_v35  ;;  %2382 = vmatpush1.bf16.msra.mxu0 %v3440_v45  ;;  %v2153_v42 = vpack.c.bf16 %v2138_v33, %v2137_v34 }
 0x22a   : > { %v3161_v13 = vunpack.i.h.bf16 %v3159_v4  ;;  %v3160_v14 = vunpack.i.l.bf16 %v3159_v4  ;;  %2383 = vmatprep.subr.bf16.mxu0 %v3445_v52  ;;  %v3146_v53 = vunpack.i.h.bf16 %v3144_v5  ;;  %v3145_v31 = vunpack.i.l.bf16 %v3144_v5 }
 0x22b   : > { %2006 = vmatprep.mubr.bf16.mxu0 %v1751_v6 }
 0x22c   : > { %1582 = vmatpush1.bf16.msra.mxu1 %v3434_v59  ;;  %v1734_v19 = vsel %vm941_vm7, %v4217_v39, %v3160_v14  ;;  %v1735_v20 = vsel %vm941_vm7, %v4219_v40, %v3161_v13  ;;  %v3150_v39 = vunpack.i.l.bf16 %v4514_v8  ;;  %v2148_v22 = vsel %vm941_vm7, %v3146_v53, %v3151_v3 }
 0x22d   : > { %v3164_v25 = vpop.permute.xlu1 %3163  ;;  %v3169_v26 = vpop.permute.xlu0 %3168  ;;  %v1750_v28 = vpack.c.bf16 %v1735_v20, %v1734_v19  ;;  %2384 = vmatpush1.bf16.msra.mxu0 %v3443_v7 }
 0x22e   : > { %v2147_v12 = vsel %vm941_vm7, %v3145_v31, %v3150_v39  ;;  %v3165_v37 = vunpack.i.l.bf16 %v3164_v25  ;;  %v3166_v41 = vunpack.i.h.bf16 %v3164_v25  ;;  %v3171_v29 = vunpack.i.h.bf16 %v3169_v26 }
 0x22f   : > { %1584 = vmatmul.mubr.bf16.vlgmr.msra.gmra.mrb[8].mxu1 %v958_v47  ;;  %2007 = vmatmul.mubr.bf16.gmra.mrb[20].mxu0 %v1750_v28  ;;  %v2156_v23 = vpack.c.bf16 %v2148_v22, %v2147_v12  ;;  %v3170_v38 = vunpack.i.l.bf16 %v3169_v26 }
 0x230   : > { %2385 = vmatprep.mubr.bf16.mxu0 %v2154_v32  ;;  %v2139_v30 = vsel %vm941_vm7, %v4225_v43, %v3165_v37  ;;  %v2140_v0 = vsel %vm941_vm7, %v4227_v46, %v3166_v41 }
 0x231   : > { %v3174_v40 = vpop.permute.xlu1 %3173  ;;  %v3179_v2 = vpop.permute.xlu0 %3178  ;;  %v2155_v25 = vpack.c.bf16 %v2140_v0, %v2139_v30 }
 0x232   : > { %v3176_v44 = vunpack.i.h.bf16 %v3174_v40  ;;  %v3175_v45 = vunpack.i.l.bf16 %v3174_v40  ;;  %v3181_v59 = vunpack.i.h.bf16 %v3179_v2  ;;  %v3180_v1 = vunpack.i.l.bf16 %v3179_v2 }
 0x234   : > { %v954_v7 = vsel %vm941_vm7, %v3170_v38, %v3175_v45  ;;  %v955_v54 = vsel %vm941_vm7, %v3171_v29, %v3176_v44 }
 0x235   : > { %v3189_v63 = vpop.permute.xlu1 %3188  ;;  %v3184_v8 = vpop.permute.xlu0 %3183  ;;  %v963_v26 = vpack.c.bf16 %v955_v54, %v954_v7 }
 0x236   : > { %v3191_v36 = vunpack.i.h.bf16 %v3189_v63  ;;  %v3190_v50 = vunpack.i.l.bf16 %v3189_v63  ;;  %v3186_v52 = vunpack.i.h.bf16 %v3184_v8  ;;  %v3185_v58 = vunpack.i.l.bf16 %v3184_v8 }
 0x237   : > { %2386 = vmatmul.mubr.bf16.vlgmr.msra.gmra.mrb[8].mxu0 %v2153_v42 }
 0x238   : > { %2395 = vmatprep.mubr.bf16.mxu0 %v2156_v23  ;;  %v952_v35 = vsel %vm941_vm7, %v3185_v58, %v3190_v50  ;;  %v953_v60 = vsel %vm941_vm7, %v3186_v52, %v3191_v36 }
 0x239   : > { %v3194_v4 = vpop.permute.xlu1 %3193  ;;  %v3199_v5 = vpop.permute.xlu0 %3198  ;;  %v961_v6 = vpack.c.bf16 %v953_v60, %v952_v35 }
 0x23a   : > { %v3196_v55 = vunpack.i.h.bf16 %v3194_v4  ;;  %v3195_v13 = vunpack.i.l.bf16 %v3194_v4  ;;  %v3201_v43 = vunpack.i.h.bf16 %v3199_v5  ;;  %v3200_v14 = vunpack.i.l.bf16 %v3199_v5 }
 0x23b   : > { %1593 = vmatprep.mubr.bf16.mxu1 %v961_v6 }
 0x23c   : > { %v944_v57 = vsel %vm941_vm7, %v4249_v61, %v3200_v14  ;;  %v945_v15 = vsel %vm941_vm7, %v4251_v62, %v3201_v43  ;;  %v2149_v46 = vsel %vm941_vm7, %v3180_v1, %v3195_v13  ;;  %v2150_v19 = vsel %vm941_vm7, %v3181_v59, %v3196_v55 }
 0x23d   : > { %v3209_v20 = vpop.permute.xlu1 %3208  ;;  %v3204_v27 = vpop.permute.xlu0 %3203  ;;  %v960_v47 = vpack.c.bf16 %v945_v15, %v944_v57  ;;  %v2158_v28 = vpack.c.bf16 %v2150_v19, %v2149_v46  ;;  %v4619_v14 = vstv %s2470_s24 }
 0x23e   : > { %v3211_v9 = vunpack.i.h.bf16 %v3209_v20  ;;  %v3210_v53 = vunpack.i.l.bf16 %v3209_v20  ;;  %v3206_v31 = vunpack.i.h.bf16 %v3204_v27  ;;  %v3205_v32 = vunpack.i.l.bf16 %v3204_v27 }
 0x23f   : > { %1594 = vmatmul.mubr.bf16.gmra.mrb[12].mxu1 %v960_v47  ;;  %2396 = vmatmul.mubr.bf16.gmra.mrb[12].mxu0 %v2155_v25 }
 0x240   : > { %1603 = vmatprep.mubr.bf16.mxu1 %v963_v26  ;;  %2405 = vmatprep.mubr.bf16.mxu0 %v2158_v28  ;;  %v946_v3 = vsel %vm941_vm7, %v4233_v48, %v3205_v32  ;;  %v947_v39 = vsel %vm941_vm7, %v4235_v49, %v3206_v31  ;;  %v2141_v40 = vsel %vm941_vm7, %v4241_v51, %v3210_v53 }
 0x241   : > { %v3219_v61 = vpop.permute.xlu1 %3218  ;;  %v3214_v62 = vpop.permute.xlu0 %3213  ;;  %v2142_v2 = vsel %vm941_vm7, %v4243_v56, %v3211_v9  ;;  %v962_v48 = vpack.c.bf16 %v947_v39, %v946_v3 }
 0x242   : > { %v3221_v33 = vunpack.i.h.bf16 %v3219_v61  ;;  %v3220_v34 = vunpack.i.l.bf16 %v3219_v61  ;;  %v3216_v12 = vunpack.i.h.bf16 %v3214_v62  ;;  %v3215_v22 = vunpack.i.l.bf16 %v3214_v62 }
 0x243   : > { %v2157_v45 = vpack.c.bf16 %v2142_v2, %v2141_v40 }
 0x244   : > { %v2151_v37 = vsel %vm941_vm7, %v3215_v22, %v3220_v34  ;;  %v2152_v41 = vsel %vm941_vm7, %v3216_v12, %v3221_v33 }
 0x245   : > { %v3229_v42 = vpop.permute.xlu1 %3228  ;;  %v3224_v44 = vpop.permute.xlu0 %3223  ;;  %v2160_v63 = vpack.c.bf16 %v2152_v41, %v2151_v37 }
 0x246   : > { %v3231_v49 = vunpack.i.h.bf16 %v3229_v42  ;;  %v3230_v8 = vunpack.i.l.bf16 %v3229_v42  ;;  %v3226_v23 = vunpack.i.h.bf16 %v3224_v44  ;;  %v3225_v51 = vunpack.i.l.bf16 %v3224_v44 }
 0x247   : > { %1604 = vmatmul.mubr.bf16.gmra.mrb[16].mxu1 %v962_v48  ;;  %2406 = vmatmul.mubr.bf16.gmra.mrb[16].mxu0 %v2157_v45 }
 0x248   : > { %2415 = vmatprep.mubr.bf16.mxu0 %v2160_v63  ;;  %v956_v56 = vsel %vm941_vm7, %v3225_v51, %v3230_v8  ;;  %v957_v36 = vsel %vm941_vm7, %v3226_v23, %v3231_v49 }
 0x249   : > { %v3239_v50 = vpop.permute.xlu1 %3238  ;;  %v3234_v52 = vpop.permute.xlu0 %3233  ;;  %v965_v58 = vpack.c.bf16 %v957_v36, %v956_v56 }
 0x24a   : > { %v3241_v29 = vunpack.i.h.bf16 %v3239_v50  ;;  %v3240_v38 = vunpack.i.l.bf16 %v3239_v50  ;;  %v3236_v30 = vunpack.i.h.bf16 %v3234_v52  ;;  %v3235_v59 = vunpack.i.l.bf16 %v3234_v52 }
 0x24b   : > { %1613 = vmatprep.mubr.bf16.mxu1 %v965_v58 }
 0x24c   : > { %v948_v35 = vsel %vm941_vm7, %v4269_v16, %v3235_v59  ;;  %v949_v60 = vsel %vm941_vm7, %v4271_v24, %v3236_v30  ;;  %v2143_v0 = vsel %vm941_vm7, %v4261_v10, %v3240_v38  ;;  %v2144_v1 = vsel %vm941_vm7, %v4263_v11, %v3241_v29  ;;  %v2442_v16 = vld [vmem:[%s4679_s4] sm:$0x3] }
 0x24d   : > { %v964_v4 = vpack.c.bf16 %v949_v60, %v948_v35  ;;  %v2159_v5 = vpack.c.bf16 %v2144_v1, %v2143_v0  ;;  %v4613_v10 = vrot.slane %v2442_v16, %v517_v18  ;;  %v4617_v11 = vrot.slane %v2442_v16, %v521_v21 }
 0x24f   : > { %1614 = vmatmul.mubr.bf16.gmra.mrb[20].mxu1 %v964_v4  ;;  %2416 = vmatmul.mubr.bf16.gmra.mrb[20].mxu0 %v2159_v5 }
 0x302   : > { %v1585_v6 = vpop.f32.mrb[8].mxu1 }
 0x303   : > { %v1587_v7 = vpop.f32.mrb[9].mxu1 }
 0x304   : > { %v1589_v54 = vpop.f32.mrb[10].mxu1 }
 0x305   : > { %v1591_v55 = vpop.f32.mrb[11].mxu1 }
 0x30a   : > { %v2387_v24 = vpop.f32.mrb[8].mxu0 }
 0x30b   : > { %v2939_v13 = vadd.f32 %v2387_v24, %v1585_v6  ;;  %v2389_v43 = vpop.f32.mrb[9].mxu0 }
 0x30c   : > { %v2940_v57 = vadd.f32 %v2389_v43, %v1587_v7  ;;  %v2391_v15 = vpop.f32.mrb[10].mxu0 }
 0x30d   : > { %v2454_v46 = vadd.f32 %v2939_v13, %v4613_v10  ;;  %v2941_v19 = vadd.f32 %v2391_v15, %v1589_v54  ;;  %v2393_v20 = vpop.f32.mrb[11].mxu0 }
 0x30e   : > { %v2455_v27 = vadd.f32 %v2940_v57, %v4617_v11  ;;  %v2942_v18 = vadd.f32 %v2393_v20, %v1591_v55 }
 0x30f   : > { %vm2471_vm8 = vcmp.gt.f32.partialorder %v2454_v46, 0.0  ;;  %v2488_v17 = vmul.f32 %v4619_v14, %v2454_v46  ;;  %v2456_v21 = vadd.f32 %v2941_v19, %v4613_v10 }
 0x310   : > { %vm2472_vm9 = vcmp.gt.f32.partialorder %v2455_v27, 0.0  ;;  %v2489_v47 = vmul.f32 %v4619_v14, %v2455_v27  ;;  %v2457_v25 = vadd.f32 %v2942_v18, %v4617_v11 }
 0x311   : > { %v2504_v26 = vsel %vm2471_vm8, %v2454_v46, %v2488_v17  ;;  %vm2473_vm10 = vcmp.gt.f32.partialorder %v2456_v21, 0.0  ;;  %v2490_v28 = vmul.f32 %v4619_v14, %v2456_v21  ;;  %vm2588_vm8 = vcmask 1040384  }
 0x312   : > { %v2546_v9 = vmul.f32 %v2504_v26, %v2504_v26  ;;  %v2505_v53 = vsel %vm2472_vm9, %v2455_v27, %v2489_v47  ;;  %vm2474_vm11 = vcmp.gt.f32.partialorder %v2457_v25, 0.0  ;;  %v2491_v31 = vmul.f32 %v4619_v14, %v2457_v25  ;;  %v1595_v32 = vpop.f32.mrb[12].mxu1  ;;  %v2397_v61 = vpop.f32.mrb[12].mxu0 }
 0x313   : > { %v2547_v62 = vmul.f32 %v2505_v53, %v2505_v53  ;;  %v2931_v3 = vpack.c.bf16 %v2505_v53, %v2504_v26  ;;  %v2506_v39 = vsel %vm2473_vm10, %v2456_v21, %v2490_v28  ;;  %v2943_v40 = vadd.f32 %v2397_v61, %v1595_v32  ;;  %v1597_v2 = vpop.f32.mrb[13].mxu1  ;;  %v2399_v33 = vpop.f32.mrb[13].mxu0 }
 0x314   : > { %v2520_v34 = vadd.f32 %v2506_v39, %v2504_v26  ;;  %v2548_v12 = vmul.f32 %v2506_v39, %v2506_v39  ;;  %v2507_v22 = vsel %vm2474_vm11, %v2457_v25, %v2491_v31  ;;  %v2944_v37 = vadd.f32 %v2399_v33, %v1597_v2  ;;  %v1599_v41 = vpop.f32.mrb[14].mxu1  ;;  %v2401_v42 = vpop.f32.mrb[14].mxu0 }
 0x315   : > { %2667 = vst [vmem:[%s4631_s9] sm:$0xff] %v2931_v3  ;;  %v2533_v44 = vadd.f32 %v2507_v22, %v2505_v53  ;;  %v2549_v48 = vmul.f32 %v2507_v22, %v2507_v22  ;;  %v2932_v45 = vpack.c.bf16 %v2507_v22, %v2506_v39  ;;  %v2458_v63 = vadd.f32 %v2943_v40, %v4613_v10  ;;  %v1601_v49 = vpop.f32.mrb[15].mxu1  ;;  %v2403_v8 = vpop.f32.mrb[15].mxu0 }
 0x316   : > { %v2562_v23 = vadd.f32 %v2548_v12, %v2546_v9  ;;  %v2459_v51 = vadd.f32 %v2944_v37, %v4617_v11  ;;  %v2945_v56 = vadd.f32 %v2401_v42, %v1599_v41  ;;  %v2946_v36 = vadd.f32 %v2403_v8, %v1601_v49 }
 0x317   : > { %v2575_v50 = vadd.f32 %v2549_v48, %v2547_v62  ;;  %2668 = vst [vmem:[%s4631_s9 + $0x8] sm:$0xff] %v2932_v45  ;;  %vm2475_vm12 = vcmp.gt.f32.partialorder %v2458_v63, 0.0  ;;  %v2492_v52 = vmul.f32 %v4619_v14, %v2458_v63 }
 0x318   : > { %vm2476_vm13 = vcmp.gt.f32.partialorder %v2459_v51, 0.0  ;;  %v2493_v58 = vmul.f32 %v4619_v14, %v2459_v51  ;;  %v2460_v29 = vadd.f32 %v2945_v56, %v4613_v10  ;;  %v2461_v38 = vadd.f32 %v2946_v36, %v4617_v11 }
 0x319   : > { %v2508_v30 = vsel %vm2475_vm12, %v2458_v63, %v2492_v52 }
 0x31a   : > { %v2521_v59 = vadd.f32 %v2520_v34, %v2508_v30  ;;  %v2550_v35 = vmul.f32 %v2508_v30, %v2508_v30  ;;  %v2509_v60 = vsel %vm2476_vm13, %v2459_v51, %v2493_v58  ;;  %vm2477_vm14 = vcmp.gt.f32.partialorder %v2460_v29, 0.0  ;;  %v1605_v0 = vpop.f32.mrb[16].mxu1  ;;  %v2407_v1 = vpop.f32.mrb[16].mxu0 }
 0x31b   : > { %v2534_v4 = vadd.f32 %v2533_v44, %v2509_v60  ;;  %v2551_v5 = vmul.f32 %v2509_v60, %v2509_v60  ;;  %v2933_v6 = vpack.c.bf16 %v2509_v60, %v2508_v30  ;;  %v2494_v7 = vmul.f32 %v4619_v14, %v2460_v29  ;;  %v1607_v54 = vpop.f32.mrb[17].mxu1  ;;  %v2409_v55 = vpop.f32.mrb[17].mxu0 }
 0x31c   : > { %v2563_v16 = vadd.f32 %v2562_v23, %v2550_v35  ;;  %vm2478_vm15 = vcmp.gt.f32.partialorder %v2461_v38, 0.0  ;;  %v2495_v24 = vmul.f32 %v4619_v14, %v2461_v38  ;;  %v2947_v13 = vadd.f32 %v2407_v1, %v1605_v0  ;;  %v1609_v43 = vpop.f32.mrb[18].mxu1  ;;  %v2411_v57 = vpop.f32.mrb[18].mxu0 }
 0x31d   : > { %v2576_v15 = vadd.f32 %v2575_v50, %v2551_v5  ;;  %2669 = vst [vmem:[%s4631_s9 + $0x10] sm:$0xff] %v2933_v6  ;;  %v2510_v46 = vsel %vm2477_vm14, %v2460_v29, %v2494_v7  ;;  %v2948_v19 = vadd.f32 %v2409_v55, %v1607_v54  ;;  %v2949_v20 = vadd.f32 %v2411_v57, %v1609_v43  ;;  %v1611_v27 = vpop.f32.mrb[19].mxu1  ;;  %v2413_v18 = vpop.f32.mrb[19].mxu0 }
 0x31e   : > { %v2522_v17 = vadd.f32 %v2521_v59, %v2510_v46  ;;  %v2552_v21 = vmul.f32 %v2510_v46, %v2510_v46  ;;  %v2511_v47 = vsel %vm2478_vm15, %v2461_v38, %v2495_v24  ;;  %v2462_v25 = vadd.f32 %v2947_v13, %v4613_v10 }
 0x31f   : > { %v2535_v26 = vadd.f32 %v2534_v4, %v2511_v47  ;;  %v2553_v28 = vmul.f32 %v2511_v47, %v2511_v47  ;;  %v2934_v9 = vpack.c.bf16 %v2511_v47, %v2510_v46  ;;  %v2463_v53 = vadd.f32 %v2948_v19, %v4617_v11 }
 0x320   : > { %v2564_v31 = vadd.f32 %v2563_v16, %v2552_v21  ;;  %vm2479_vm0 = vcmp.gt.f32.partialorder %v2462_v25, 0.0  ;;  %v2496_v32 = vmul.f32 %v4619_v14, %v2462_v25  ;;  %v2464_v61 = vadd.f32 %v2949_v20, %v4613_v10 }
 0x321   : > { %v2577_v62 = vadd.f32 %v2576_v15, %v2553_v28  ;;  %2670 = vst [vmem:[%s4631_s9 + $0x18] sm:$0xff] %v2934_v9  ;;  %vm2480_vm1 = vcmp.gt.f32.partialorder %v2463_v53, 0.0  ;;  %v2497_v3 = vmul.f32 %v4619_v14, %v2463_v53  ;;  %v2950_v39 = vadd.f32 %v2413_v18, %v1611_v27 }
 0x322   : > { %v2512_v40 = vsel %vm2479_vm0, %v2462_v25, %v2496_v32  ;;  %vm2481_vm2 = vcmp.gt.f32.partialorder %v2464_v61, 0.0  ;;  %v2498_v2 = vmul.f32 %v4619_v14, %v2464_v61  ;;  %v1615_v33 = vpop.f32.mrb[20].mxu1  ;;  %v2417_v34 = vpop.f32.mrb[20].mxu0 }
 0x323   : > { %v2523_v12 = vadd.f32 %v2522_v17, %v2512_v40  ;;  %v2554_v22 = vmul.f32 %v2512_v40, %v2512_v40  ;;  %v2513_v37 = vsel %vm2480_vm1, %v2463_v53, %v2497_v3  ;;  %v2465_v41 = vadd.f32 %v2950_v39, %v4617_v11  ;;  %v1617_v42 = vpop.f32.mrb[21].mxu1  ;;  %v2419_v44 = vpop.f32.mrb[21].mxu0 }
 0x324   : > { %v2536_v48 = vadd.f32 %v2535_v26, %v2513_v37  ;;  %v2555_v45 = vmul.f32 %v2513_v37, %v2513_v37  ;;  %v2935_v63 = vpack.c.bf16 %v2513_v37, %v2512_v40  ;;  %v2514_v49 = vsel %vm2481_vm2, %v2464_v61, %v2498_v2  ;;  %v1619_v8 = vpop.f32.mrb[22].mxu1  ;;  %v2421_v23 = vpop.f32.mrb[22].mxu0 }
 0x325   : > { %v2565_v51 = vadd.f32 %v2564_v31, %v2554_v22  ;;  %v2524_v56 = vadd.f32 %v2523_v12, %v2514_v49  ;;  %v2556_v36 = vmul.f32 %v2514_v49, %v2514_v49  ;;  %vm2482_vm3 = vcmp.gt.f32.partialorder %v2465_v41, 0.0  ;;  %v1621_v50 = vpop.f32.mrb[23].mxu1  ;;  %v2423_v52 = vpop.f32.mrb[23].mxu0 }
 0x326   : > { %v2578_v58 = vadd.f32 %v2577_v62, %v2555_v45  ;;  %2671 = vst [vmem:[%s4631_s9 + $0x20] sm:$0xff] %v2935_v63  ;;  %v2499_v29 = vmul.f32 %v4619_v14, %v2465_v41  ;;  %v2951_v38 = vadd.f32 %v2417_v34, %v1615_v33  ;;  %v2952_v30 = vadd.f32 %v2419_v44, %v1617_v42 }
 0x327   : > { %v2566_v59 = vadd.f32 %v2565_v51, %v2556_v36  ;;  %v2953_v35 = vadd.f32 %v2421_v23, %v1619_v8  ;;  %v2954_v60 = vadd.f32 %v2423_v52, %v1621_v50 }
 0x328   : > { %v2515_v0 = vsel %vm2482_vm3, %v2465_v41, %v2499_v29  ;;  %v2466_v1 = vadd.f32 %v2951_v38, %v4613_v10  ;;  %v2467_v4 = vadd.f32 %v2952_v30, %v4617_v11 }
 0x329   : > { %v2537_v5 = vadd.f32 %v2536_v48, %v2515_v0  ;;  %v2557_v6 = vmul.f32 %v2515_v0, %v2515_v0  ;;  %v2936_v7 = vpack.c.bf16 %v2515_v0, %v2514_v49  ;;  %v2468_v54 = vadd.f32 %v2953_v35, %v4613_v10 }
 0x32a   : > { %vm2483_vm4 = vcmp.gt.f32.partialorder %v2466_v1, 0.0  ;;  %v2500_v55 = vmul.f32 %v4619_v14, %v2466_v1  ;;  %vm2484_vm5 = vcmp.gt.f32.partialorder %v2467_v4, 0.0  ;;  %v2501_v16 = vmul.f32 %v4619_v14, %v2467_v4 }
 0x32b   : > { %v2579_v24 = vadd.f32 %v2578_v58, %v2557_v6  ;;  %2672 = vst [vmem:[%s4631_s9 + $0x28] sm:$0xff] %v2936_v7  ;;  %vm2485_vm6 = vcmp.gt.f32.partialorder %v2468_v54, 0.0  ;;  %v2502_v13 = vmul.f32 %v4619_v14, %v2468_v54  ;;  %v2469_v43 = vadd.f32 %v2954_v60, %v4617_v11 }
 0x32c   : > { %v2516_v57 = vsel %vm2483_vm4, %v2466_v1, %v2500_v55  ;;  %v2517_v15 = vsel %vm2484_vm5, %v2467_v4, %v2501_v16 }
 0x32d   : > { %v2525_v46 = vadd.f32 %v2524_v56, %v2516_v57  ;;  %v2558_v19 = vmul.f32 %v2516_v57, %v2516_v57  ;;  %v2538_v20 = vadd.f32 %v2537_v5, %v2517_v15  ;;  %v2559_v10 = vmul.f32 %v2517_v15, %v2517_v15 }
 0x32e   : > { %v2937_v27 = vpack.c.bf16 %v2517_v15, %v2516_v57  ;;  %v2518_v18 = vsel %vm2485_vm6, %v2468_v54, %v2502_v13  ;;  %vm2486_vm7 = vcmp.gt.f32.partialorder %v2469_v43, 0.0  ;;  %v2503_v17 = vmul.f32 %v4619_v14, %v2469_v43 }
 0x32f   : > { %v2567_v21 = vadd.f32 %v2566_v59, %v2558_v19  ;;  %v2580_v47 = vadd.f32 %v2579_v24, %v2559_v10  ;;  %v2526_v25 = vadd.f32 %v2525_v46, %v2518_v18  ;;  %v2560_v26 = vmul.f32 %v2518_v18, %v2518_v18 }
 0x330   : > { %2673 = vst [vmem:[%s4631_s9 + $0x30] sm:$0xff] %v2937_v27  ;;  %v2519_v28 = vsel %vm2486_vm7, %v2469_v43, %v2503_v17 }
 0x331   : > { %v2527_v11 = vrot.slane %v2526_v25, 4  ;;  %v2568_v9 = vadd.f32 %v2567_v21, %v2560_v26  ;;  %v2539_v53 = vadd.f32 %v2538_v20, %v2519_v28  ;;  %v2561_v31 = vmul.f32 %v2519_v28, %v2519_v28 }
 0x332   : > { %v2938_v32 = vpack.c.bf16 %v2519_v28, %v2518_v18 }
 0x333   : > { %v2528_v61 = vadd.f32 %v2527_v11, %v2526_v25  ;;  %v2569_v62 = vrot.slane %v2568_v9, 4  ;;  %v2540_v3 = vrot.slane %v2539_v53, 4  ;;  %v2581_v39 = vadd.f32 %v2580_v47, %v2561_v31 }
 0x334   : > { %2674 = vst [vmem:[%s4631_s9 + $0x38] sm:$0xff] %v2938_v32 }
 0x335   : > { %v2529_v14 = vrot.slane %v2528_v61, 2  ;;  %v2570_v40 = vadd.f32 %v2569_v62, %v2568_v9  ;;  %v2541_v2 = vadd.f32 %v2540_v3, %v2539_v53  ;;  %v2582_v33 = vrot.slane %v2581_v39, 4 }
 0x337   : > { %v2530_v34 = vadd.f32 %v2529_v14, %v2528_v61  ;;  %v2571_v12 = vrot.slane %v2570_v40, 2  ;;  %v2542_v22 = vrot.slane %v2541_v2, 2  ;;  %v2583_v37 = vadd.f32 %v2582_v33, %v2581_v39 }
 0x339   : > { %v2531_v41 = vrot.slane %v2530_v34, 1  ;;  %v2572_v42 = vadd.f32 %v2571_v12, %v2570_v40  ;;  %v2543_v44 = vadd.f32 %v2542_v22, %v2541_v2  ;;  %v2584_v48 = vrot.slane %v2583_v37, 2 }
 0x33b   : > { %v2573_v45 = vrot.slane %v2572_v42, 1  ;;  %v2544_v63 = vrot.slane %v2543_v44, 1  ;;  %v2585_v49 = vadd.f32 %v2584_v48, %v2583_v37  ;;  %v2532_v8 = vadd.f32 %v2531_v41, %v2530_v34 }
 0x33d   : > { %v2574_v23 = vadd.f32 %v2573_v45, %v2572_v42  ;;  %v2586_v51 = vrot.slane %v2585_v49, 1  ;;  %v2545_v36 = vadd.f32 %v2544_v63, %v2543_v44 }
 0x33f   : > { %v2589_v56 = vsel %vm2588_vm8, %v2532_v8, %v2574_v23  ;;  %v2587_v50 = vadd.f32 %v2586_v51, %v2585_v49 }
 0x341   : > { %v2590_v52 = vsel %vm2588_vm8, %v2545_v36, %v2587_v50 }
 0x342   : > { %v2593_v58 = vcombine.low %v2589_v56, %v2590_v52 }
 0x344   : > { %2918 = vst.sshfl [vmem:[%s297_s13] sm:$0x33 pattern:$0x76325410] %v2593_v58 }
 0x345 PF: > { %s19_s26 = sadd.s32 1, %s3452_s26  }
 0x346   : > { %p16_p6 = scmp.ge.s32.totalorder %s19_s26, 4  }
 0x348   :  { %18 = sbr.rel (!%p16_p6) target bundleno = 2 (0x2), region = 93 }

// kernel: unet_up_block.3
= control target key start
LH: loop header
LB: loop body
LE: loop exit
PB: predicated region body
PF: predicated region fallthrough
CT: control target
= control target key end

     0   :  { %s3297_s26 = smov 0   ;;  %s4481_s0 = inlined_call_operand.vmem [shape: bf16[16,8,256], index: 0, kind: input, shape index: {}]   ;;  %s4482_s1 = inlined_call_operand.vmem [shape: f32[1,256], index: 1, kind: input, shape index: {}]   ;;  %s4483_s2 = inlined_call_operand.vmem [shape: f32[1,256], index: 2, kind: input, shape index: {}]   ;;  %s4484_s3 = inlined_call_operand.vmem [shape: bf16[1024,256], index: 3, kind: input, shape index: {}]   ;;  %s4485_s4 = inlined_call_operand.vmem [shape: f32[1,256], index: 4, kind: input, shape index: {}]   ;;  %s4486_s5 = inlined_call_operand.<no memory space> [shape: f32[1], index: 5, kind: input, shape index: {}]   ;;  %s4487_s6 = inlined_call_operand.vmem [shape: f32[16,8,256], index: 6, kind: output, shape index: {0}]   ;;  %s4488_s7 = inlined_call_operand.vmem [shape: f32[2,2,256], index: 7, kind: output, shape index: {1}]  }
   0x1   :  { %13 = sst [smem:[#allocation3]] %s4486_s5 }
   0x2 LB: > { %s3303_s27 = sadd.s32 4294967295, %s3246_s26   ;;  %p2603_p0 = scmp.ge.s32.totalorder %s3246_s26, 1  ;;  %s3246_s26 = sphi %s3297_s26, %s19_s26  }
   0x3   : > { %p243_p1 = scmp.lt.s32.totalorder %s3246_s26, 3 }
   0x5   : > { %p244_p2 = pnand %p2603_p0, %p243_p1 }
   0x6   : > { %s2604_s28 = sshll.u32 (!%p244_p2), %s3303_s27, 3  ;;  %v527_v0 = vlaneseq (!%p244_p2)  ;;  %v3317_v1 = vld [vmem:[%s4482_s1] sm:$0x3] (!%p244_p2)  ;;  %vm301_vm0 = vcmask (!%p244_p2), 647168   ;;  %vm318_vm1 = vcmask (!%p244_p2), 64512   ;;  %vm320_vm2 = vcmask (!%p244_p2), 58368  }
   0x7   : > { %247 = sbr.rel (%p244_p2) target bundleno = 624 (0x270), region = 44  ;;  %p3310_p3 = scmp.lt.s32.totalorder (!%p244_p2), %s2604_s28, 15  ;;  %vm336_vm3 = vcmask (!%p244_p2), 654912   ;;  %vm338_vm4 = vcmask (!%p244_p2), 648768   ;;  %v3248_v3 = vmov (!%p244_p2), 0.0   ;;  %vm613_vm5 = vcmask (!%p244_p2), 588864  }
   0x8   : > { %v3319_v2 = vshrl.u32 (!%p244_p2), %v527_v0, 7  ;;  %363 = vst.msk [vmem:[#allocation2 + $0x89] sm:$0x1] (!%p244_p2), %vm301_vm0, %v3248_v3  ;;  %310 = vst.msk [vmem:[#allocation2 + $0x9] sm:$0x1] (!%p244_p2), %vm301_vm0, %v3248_v3  ;;  %s3249_s14 = smov (!%p244_p2), 72  }
   0x9   : > { %311 = vst.msk [vmem:[#allocation2 + $0x19] sm:$0x1] (!%p244_p2), %vm301_vm0, %v3248_v3  ;;  %312 = vst.msk [vmem:[#allocation2 + $0x29] sm:$0x1] (!%p244_p2), %vm301_vm0, %v3248_v3  ;;  %v3394_v4 = vld [vmem:[%s4483_s2] sm:$0x3] (!%p244_p2) }
   0xa   : > { %313 = vst.msk [vmem:[#allocation2 + $0x39] sm:$0x1] (!%p244_p2), %vm301_vm0, %v3248_v3  ;;  %314 = vst.msk [vmem:[#allocation2 + $0x49] sm:$0x1] (!%p244_p2), %vm301_vm0, %v3248_v3  ;;  %v3525_v5 = vsub.s32 (!%p244_p2), 0, %v3319_v2  ;;  %v3657_v6 = vsub.s32 (!%p244_p2), 1, %v3319_v2 }
   0xb   : > { %315 = vst.msk [vmem:[#allocation2 + $0x59] sm:$0x1] (!%p244_p2), %vm301_vm0, %v3248_v3  ;;  %316 = vst.msk [vmem:[#allocation2 + $0x69] sm:$0x1] (!%p244_p2), %vm301_vm0, %v3248_v3  ;;  %s3250_s15 = smov (!%p244_p2), 8   ;;  %s3251_s20 = smov (!%p244_p2), 120  }
   0xc   : > { %317 = vst.msk [vmem:[#allocation2 + $0x79] sm:$0x1] (!%p244_p2), %vm301_vm0, %v3248_v3  ;;  %364 = vst.msk [vmem:[#allocation2 + $0x99] sm:$0x1] (!%p244_p2), %vm301_vm0, %v3248_v3  ;;  %v3666_v7 = vrot.slane (!%p244_p2), %v3317_v1, %v3525_v5  ;;  %v3672_v11 = vrot.slane (!%p244_p2), %v3394_v4, %v3525_v5  ;;  %v3676_v13 = vrot.slane (!%p244_p2), %v3317_v1, %v3657_v6  ;;  %s3252_s21 = smov (!%p244_p2), 48   ;;  %s3253_s24 = smov (!%p244_p2), 56  }
   0xd   : > { %365 = vst.msk [vmem:[#allocation2 + $0xa9] sm:$0x1] (!%p244_p2), %vm301_vm0, %v3248_v3  ;;  %366 = vst.msk [vmem:[#allocation2 + $0xb9] sm:$0x1] (!%p244_p2), %vm301_vm0, %v3248_v3  ;;  %v3683_v19 = vrot.slane (!%p244_p2), %v3394_v4, %v3657_v6  ;;  %v3050_v4 = vld [vmem:[%s4484_s3 + $0x200] ss:$8 sps:$4 sm:$0xff] (!%p244_p2)  }
   0xe   : > { %367 = vst.msk [vmem:[#allocation2 + $0xc9] sm:$0x1] %vm301_vm0, %v3248_v3  ;;  %368 = vst.msk [vmem:[#allocation2 + $0xd9] sm:$0x1] %vm301_vm0, %v3248_v3  ;;  %s4491_s28 = smov (!%p3310_p3, %s2604_s28), 15  ;;  %vm830_vm6 = vcmask 523264  }
   0xf   : > { %369 = vst.msk [vmem:[#allocation2 + $0xe9] sm:$0x1] %vm301_vm0, %v3248_v3  ;;  %370 = vst.msk [vmem:[#allocation2 + $0xf9] sm:$0x1] %vm301_vm0, %v3248_v3  ;;  %s2743_s10 = sshll.u32 %s4491_s28, 3  ;;  %s2359_s23 = sld [smem:[#allocation3]] }
  0x10   : > { %404 = vst.msk [vmem:[#allocation2 + $0x100] sm:$0x1] %vm301_vm0, %v3248_v3  ;;  %405 = vst.msk [vmem:[#allocation2 + $0x110] sm:$0x1] %vm301_vm0, %v3248_v3  ;;  %s3662_s13 = scalar_lea.vmem %s4481_s0, %s2743_s10  ;;  %s2744_s5 = sshll.u32 %s4491_s28, 4 }
  0x11   : > { %406 = vst.msk [vmem:[#allocation2 + $0x120] sm:$0x1] %vm301_vm0, %v3248_v3  ;;  %407 = vst.msk [vmem:[#allocation2 + $0x130] sm:$0x1] %vm301_vm0, %v3248_v3  ;;  %v501_v8 = vld [vmem:[%s3662_s13] sm:$0xff]  ;;  %v502_v9 = vld [vmem:[%s3662_s13 + $0x8] sm:$0xff]  ;;  %s4425_s8 = scalar_lea.vmem %s4487_s6, %s2744_s5 }
  0x12   : > { %408 = vst.msk [vmem:[#allocation2 + $0x140] sm:$0x1] %vm301_vm0, %v3248_v3  ;;  %409 = vst.msk [vmem:[#allocation2 + $0x150] sm:$0x1] %vm301_vm0, %v3248_v3  ;;  %v509_v10 = vunpack.c.l.bf16 %v501_v8  ;;  %v511_v12 = vunpack.c.l.bf16 %v502_v9  ;;  %v510_v14 = vunpack.c.h.bf16 %v501_v8  ;;  %v512_v17 = vunpack.c.h.bf16 %v502_v9  ;;  %v504_v20 = vld [vmem:[%s3662_s13 + $0x18] sm:$0xff]  ;;  %v503_v21 = vld [vmem:[%s3662_s13 + $0x10] sm:$0xff] }
  0x13   : > { %410 = vst.msk [vmem:[#allocation2 + $0x160] sm:$0x1] %vm301_vm0, %v3248_v3  ;;  %411 = vst.msk [vmem:[#allocation2 + $0x170] sm:$0x1] %vm301_vm0, %v3248_v3  ;;  %v515_v27 = vunpack.c.l.bf16 %v504_v20  ;;  %v513_v28 = vunpack.c.l.bf16 %v503_v21  ;;  %v516_v33 = vunpack.c.h.bf16 %v504_v20  ;;  %v514_v34 = vunpack.c.h.bf16 %v503_v21  ;;  %v506_v35 = vld [vmem:[%s3662_s13 + $0x28] sm:$0xff]  ;;  %v505_v36 = vld [vmem:[%s3662_s13 + $0x20] sm:$0xff] }
  0x14   : > { %453 = vst.msk [vmem:[#allocation2 + $0x180] sm:$0x1] %vm301_vm0, %v3248_v3  ;;  %454 = vst.msk [vmem:[#allocation2 + $0x190] sm:$0x1] %vm301_vm0, %v3248_v3  ;;  %v537_v15 = vmul.f32 %v3666_v7, %v509_v10  ;;  %v539_v16 = vmul.f32 %v3666_v7, %v511_v12  ;;  %v540_v23 = vmul.f32 %v3676_v13, %v512_v17  ;;  %v519_v41 = vunpack.c.l.bf16 %v506_v35  ;;  %v508_v49 = vld [vmem:[%s3662_s13 + $0x38] sm:$0xff]  ;;  %v507_v50 = vld [vmem:[%s3662_s13 + $0x30] sm:$0xff] }
  0x15   : > { %455 = vst.msk [vmem:[#allocation2 + $0x1a0] sm:$0x1] %vm301_vm0, %v3248_v3  ;;  %456 = vst.msk [vmem:[#allocation2 + $0x1b0] sm:$0x1] %vm301_vm0, %v3248_v3  ;;  %v538_v24 = vmul.f32 %v3676_v13, %v510_v14  ;;  %v543_v29 = vmul.f32 %v3666_v7, %v515_v27  ;;  %v541_v30 = vmul.f32 %v3666_v7, %v513_v28  ;;  %v517_v42 = vunpack.c.l.bf16 %v505_v36  ;;  %v3053_v8 = vld [vmem:[%s4484_s3 + $0x100] ss:$8 sps:$4 sm:$0xff]  }
  0x16   : > { %457 = vst.msk [vmem:[#allocation2 + $0x1c0] sm:$0x1] %vm301_vm0, %v3248_v3  ;;  %458 = vst.msk [vmem:[#allocation2 + $0x1d0] sm:$0x1] %vm301_vm0, %v3248_v3  ;;  %v565_v18 = vadd.f32 %v3672_v11, %v537_v15  ;;  %v567_v22 = vadd.f32 %v3672_v11, %v539_v16  ;;  %v568_v25 = vadd.f32 %v3683_v19, %v540_v23  ;;  %v520_v47 = vunpack.c.h.bf16 %v506_v35  ;;  %v3054_v9 = vld [vmem:[%s4484_s3 + $0x214] ss:$8 sps:$4 sm:$0xff]  }
  0x17   : > { %459 = vst.msk [vmem:[#allocation2 + $0x1e0] sm:$0x1] %vm301_vm0, %v3248_v3  ;;  %460 = vst.msk [vmem:[#allocation2 + $0x1f0] sm:$0x1] %vm301_vm0, %v3248_v3  ;;  %v566_v26 = vadd.f32 %v3683_v19, %v538_v24  ;;  %v571_v31 = vadd.f32 %v3672_v11, %v543_v29  ;;  %v569_v32 = vadd.f32 %v3672_v11, %v541_v30  ;;  %v518_v48 = vunpack.c.h.bf16 %v505_v36  ;;  %v3056_v10 = vld [vmem:[%s4484_s3 + $0x210] ss:$8 sps:$4 sm:$0xff]  }
  0x18   : > { %371 = vst.msk [vmem:[#allocation2 + $0x80] sm:$0xff] %vm318_vm1, %v3248_v3  ;;  %319 = vst.msk [vmem:[#allocation2] sm:$0xff] %vm318_vm1, %v3248_v3  ;;  %622 = vrot.lane.b32.xlu1 %v565_v18, %s3249_s14  ;;  %589 = vrot.lane.b32.xlu0 %v565_v18, %s3250_s15  ;;  %v544_v37 = vmul.f32 %v3676_v13, %v516_v33  ;;  %v542_v38 = vmul.f32 %v3676_v13, %v514_v34  ;;  %v523_v55 = vunpack.c.l.bf16 %v508_v49  ;;  %v3059_v12 = vld [vmem:[%s4484_s3 + $0x110] ss:$8 sps:$4 sm:$0xff]   ;;  %v3062_v14 = vld [vmem:[%s4484_s3 + $0x220] ss:$8 sps:$4 sm:$0xff]  }
  0x19   : > { %372 = vst.msk [vmem:[#allocation2 + $0x88] sm:$0x3] %vm320_vm2, %v3248_v3  ;;  %321 = vst.msk [vmem:[#allocation2 + $0x8] sm:$0x3] %vm320_vm2, %v3248_v3  ;;  %v547_v43 = vmul.f32 %v3666_v7, %v519_v41  ;;  %v545_v44 = vmul.f32 %v3666_v7, %v517_v42  ;;  %v548_v51 = vmul.f32 %v3676_v13, %v520_v47  ;;  %v521_v56 = vunpack.c.l.bf16 %v507_v50  ;;  %v3063_v15 = vld [vmem:[%s4484_s3 + $0x124] ss:$8 sps:$4 sm:$0xff]  }
  0x1a   : > { %322 = vst.msk [vmem:[#allocation2 + $0x10] sm:$0xff] %vm318_vm1, %v3248_v3  ;;  %324 = vst.msk [vmem:[#allocation2 + $0x20] sm:$0xff] %vm318_vm1, %v3248_v3  ;;  %v572_v39 = vadd.f32 %v3683_v19, %v544_v37  ;;  %v570_v40 = vadd.f32 %v3683_v19, %v542_v38  ;;  %v546_v52 = vmul.f32 %v3676_v13, %v518_v48  ;;  %v524_v61 = vunpack.c.h.bf16 %v508_v49  ;;  %v3065_v16 = vld [vmem:[%s4484_s3 + $0x120] ss:$8 sps:$4 sm:$0xff]   ;;  %v3066_v17 = vld [vmem:[%s4484_s3 + $0x234] ss:$8 sps:$4 sm:$0xff]  }
  0x1b   : > { %323 = vst.msk [vmem:[#allocation2 + $0x18] sm:$0x3] %vm320_vm2, %v3248_v3  ;;  %325 = vst.msk [vmem:[#allocation2 + $0x28] sm:$0x3] %vm320_vm2, %v3248_v3  ;;  %v575_v45 = vadd.f32 %v3672_v11, %v547_v43  ;;  %v573_v46 = vadd.f32 %v3672_v11, %v545_v44  ;;  %v576_v53 = vadd.f32 %v3683_v19, %v548_v51  ;;  %v522_v62 = vunpack.c.h.bf16 %v507_v50  ;;  %v3068_v18 = vld [vmem:[%s4484_s3 + $0x230] ss:$8 sps:$4 sm:$0xff]  }
  0x1c   : > { %326 = vst.msk [vmem:[#allocation2 + $0x30] sm:$0xff] %vm318_vm1, %v3248_v3  ;;  %328 = vst.msk [vmem:[#allocation2 + $0x40] sm:$0xff] %vm318_vm1, %v3248_v3  ;;  %624 = vrot.lane.b32.xlu1 %v567_v22, %s3249_s14  ;;  %591 = vrot.lane.b32.xlu0 %v567_v22, %s3250_s15  ;;  %v574_v54 = vadd.f32 %v3683_v19, %v546_v52  ;;  %v551_v57 = vmul.f32 %v3666_v7, %v523_v55  ;;  %v3071_v20 = vld [vmem:[%s4484_s3 + $0x130] ss:$8 sps:$4 sm:$0xff]   ;;  %v3072_v21 = vld [vmem:[%s4484_s3 + $0x244] ss:$8 sps:$4 sm:$0xff]  }
  0x1d   : > { %327 = vst.msk [vmem:[#allocation2 + $0x38] sm:$0x3] %vm320_vm2, %v3248_v3  ;;  %329 = vst.msk [vmem:[#allocation2 + $0x48] sm:$0x3] %vm320_vm2, %v3248_v3  ;;  %v549_v58 = vmul.f32 %v3666_v7, %v521_v56  ;;  %v552_v63 = vmul.f32 %v3676_v13, %v524_v61  ;;  %v550_v0 = vmul.f32 %v3676_v13, %v522_v62  ;;  %v3051_v7 = vld [vmem:[%s4484_s3 + $0x104] ss:$8 sps:$4 sm:$0xff]  }
  0x1e   : > { %330 = vst.msk [vmem:[#allocation2 + $0x50] sm:$0xff] %vm318_vm1, %v3248_v3  ;;  %332 = vst.msk [vmem:[#allocation2 + $0x60] sm:$0xff] %vm318_vm1, %v3248_v3  ;;  %v579_v59 = vadd.f32 %v3672_v11, %v551_v57  ;;  %1207 = vmatprep.subr.bf16.mxu1 %v3051_v7  ;;  %v3060_v13 = vld [vmem:[%s4484_s3 + $0x224] ss:$8 sps:$4 sm:$0xff]   ;;  %v3074_v22 = vld [vmem:[%s4484_s3 + $0x240] ss:$8 sps:$4 sm:$0xff]  }
  0x1f   : > { %331 = vst.msk [vmem:[#allocation2 + $0x58] sm:$0x3] %vm320_vm2, %v3248_v3  ;;  %333 = vst.msk [vmem:[#allocation2 + $0x68] sm:$0x3] %vm320_vm2, %v3248_v3  ;;  %v577_v60 = vadd.f32 %v3672_v11, %v549_v58  ;;  %v580_v1 = vadd.f32 %v3683_v19, %v552_v63  ;;  %v578_v2 = vadd.f32 %v3683_v19, %v550_v0  ;;  %1208 = vmatpush1.bf16.msra.mxu1 %v3053_v8  ;;  %v3057_v11 = vld [vmem:[%s4484_s3 + $0x114] ss:$8 sps:$4 sm:$0xff]  }
  0x20   : > { %334 = vst.msk [vmem:[#allocation2 + $0x70] sm:$0xff] %vm318_vm1, %v3248_v3  ;;  %373 = vst.msk [vmem:[#allocation2 + $0x90] sm:$0xff] %vm318_vm1, %v3248_v3  ;;  %664 = vrot.lane.b32.xlu1 %v568_v25, %s3250_s15  ;;  %662 = vrot.lane.b32.xlu0 %v566_v26, %s3250_s15  ;;  %v3069_v19 = vld [vmem:[%s4484_s3 + $0x134] ss:$8 sps:$4 sm:$0xff]   ;;  %v3075_v23 = vld [vmem:[%s4484_s3 + $0x144] ss:$8 sps:$4 sm:$0xff]  }
  0x21   : > { %335 = vst.msk [vmem:[#allocation2 + $0x78] sm:$0x3] %vm320_vm2, %v3248_v3  ;;  %374 = vst.msk [vmem:[#allocation2 + $0x98] sm:$0x3] %vm320_vm2, %v3248_v3  ;;  %1209 = vmatprep.subr.bf16.mxu1 %v3057_v11  ;;  %v3077_v24 = vld [vmem:[%s4484_s3 + $0x140] ss:$8 sps:$4 sm:$0xff]  }
  0x22   : > { %375 = vst.msk [vmem:[#allocation2 + $0xa0] sm:$0xff] %vm318_vm1, %v3248_v3  ;;  %377 = vst.msk [vmem:[#allocation2 + $0xb0] sm:$0xff] %vm318_vm1, %v3248_v3  ;;  %v3081_v27 = vld [vmem:[%s4484_s3 + $0x154] ss:$8 sps:$4 sm:$0xff]   ;;  %v3083_v28 = vld [vmem:[%s4484_s3 + $0x150] ss:$8 sps:$4 sm:$0xff]  }
  0x23   : > { %376 = vst.msk [vmem:[#allocation2 + $0xa8] sm:$0x3] %vm320_vm2, %v3248_v3  ;;  %378 = vst.msk [vmem:[#allocation2 + $0xb8] sm:$0x3] %vm320_vm2, %v3248_v3  ;;  %1210 = vmatpush1.bf16.msra.mxu1 %v3059_v12  ;;  %v3084_v29 = vld [vmem:[%s4484_s3 + $0x264] ss:$8 sps:$4 sm:$0xff]  }
  0x24   : > { %379 = vst.msk [vmem:[#allocation2 + $0xc0] sm:$0xff] %vm318_vm1, %v3248_v3  ;;  %381 = vst.msk [vmem:[#allocation2 + $0xd0] sm:$0xff] %vm318_vm1, %v3248_v3  ;;  %696 = vrot.lane.b32.xlu1 %v568_v25, %s3249_s14  ;;  %694 = vrot.lane.b32.xlu0 %v566_v26, %s3249_s14  ;;  %v3078_v25 = vld [vmem:[%s4484_s3 + $0x254] ss:$8 sps:$4 sm:$0xff]   ;;  %v3080_v26 = vld [vmem:[%s4484_s3 + $0x250] ss:$8 sps:$4 sm:$0xff]  }
  0x25   : > { %380 = vst.msk [vmem:[#allocation2 + $0xc8] sm:$0x3] %vm320_vm2, %v3248_v3  ;;  %382 = vst.msk [vmem:[#allocation2 + $0xd8] sm:$0x3] %vm320_vm2, %v3248_v3  ;;  %1211 = vmatprep.subr.bf16.mxu1 %v3063_v15  ;;  %v3086_v30 = vld [vmem:[%s4484_s3 + $0x260] ss:$8 sps:$4 sm:$0xff]  }
  0x26   : > { %383 = vst.msk [vmem:[#allocation2 + $0xe0] sm:$0xff] %vm318_vm1, %v3248_v3  ;;  %385 = vst.msk [vmem:[#allocation2 + $0xf0] sm:$0xff] %vm318_vm1, %v3248_v3  ;;  %v3090_v33 = vld [vmem:[%s4484_s3 + $0x274] ss:$8 sps:$4 sm:$0xff]   ;;  %v3092_v34 = vld [vmem:[%s4484_s3 + $0x270] ss:$8 sps:$4 sm:$0xff]  }
  0x27   : > { %384 = vst.msk [vmem:[#allocation2 + $0xe8] sm:$0x3] %vm320_vm2, %v3248_v3  ;;  %386 = vst.msk [vmem:[#allocation2 + $0xf8] sm:$0x3] %vm320_vm2, %v3248_v3  ;;  %1212 = vmatpush1.bf16.msra.mxu1 %v3065_v16  ;;  %v3093_v35 = vld [vmem:[%s4484_s3 + $0x174] ss:$8 sps:$4 sm:$0xff]  }
  0x28   : > { %420 = vst.msk [vmem:[#allocation2 + $0x100] sm:$0xff] %vm318_vm1, %v3248_v3  ;;  %422 = vst.msk [vmem:[#allocation2 + $0x110] sm:$0xff] %vm318_vm1, %v3248_v3  ;;  %595 = vrot.lane.b32.xlu1 %v571_v31, %s3250_s15  ;;  %593 = vrot.lane.b32.xlu0 %v569_v32, %s3250_s15  ;;  %v3095_v36 = vld [vmem:[%s4484_s3 + $0x170] ss:$8 sps:$4 sm:$0xff]   ;;  %v3096_v37 = vld [vmem:[%s4484_s3 + $0x284] ss:$8 sps:$4 sm:$0xff]  }
  0x29   : > { %421 = vst.msk [vmem:[#allocation2 + $0x108] sm:$0x3] %vm320_vm2, %v3248_v3  ;;  %423 = vst.msk [vmem:[#allocation2 + $0x118] sm:$0x3] %vm320_vm2, %v3248_v3  ;;  %1213 = vmatprep.subr.bf16.mxu1 %v3069_v19  ;;  %v3098_v38 = vld [vmem:[%s4484_s3 + $0x280] ss:$8 sps:$4 sm:$0xff]  }
  0x2a   : > { %424 = vst.msk [vmem:[#allocation2 + $0x120] sm:$0xff] %vm318_vm1, %v3248_v3  ;;  %426 = vst.msk [vmem:[#allocation2 + $0x130] sm:$0xff] %vm318_vm1, %v3248_v3  ;;  %v3102_v41 = vld [vmem:[%s4484_s3 + $0x294] ss:$8 sps:$4 sm:$0xff]   ;;  %v3104_v42 = vld [vmem:[%s4484_s3 + $0x290] ss:$8 sps:$4 sm:$0xff]  }
  0x2b   : > { %425 = vst.msk [vmem:[#allocation2 + $0x128] sm:$0x3] %vm320_vm2, %v3248_v3  ;;  %427 = vst.msk [vmem:[#allocation2 + $0x138] sm:$0x3] %vm320_vm2, %v3248_v3  ;;  %1214 = vmatpush1.bf16.msra.mxu1 %v3071_v20  ;;  %v3105_v43 = vld [vmem:[%s4484_s3 + $0x194] ss:$8 sps:$4 sm:$0xff]  }
  0x2c   : > { %428 = vst.msk [vmem:[#allocation2 + $0x140] sm:$0xff] %vm318_vm1, %v3248_v3  ;;  %430 = vst.msk [vmem:[#allocation2 + $0x150] sm:$0xff] %vm318_vm1, %v3248_v3  ;;  %628 = vrot.lane.b32.xlu1 %v571_v31, %s3249_s14  ;;  %626 = vrot.lane.b32.xlu0 %v569_v32, %s3249_s14  ;;  %v3087_v31 = vld [vmem:[%s4484_s3 + $0x164] ss:$8 sps:$4 sm:$0xff]   ;;  %v3089_v32 = vld [vmem:[%s4484_s3 + $0x160] ss:$8 sps:$4 sm:$0xff]  }
  0x2d   : > { %429 = vst.msk [vmem:[#allocation2 + $0x148] sm:$0x3] %vm320_vm2, %v3248_v3  ;;  %431 = vst.msk [vmem:[#allocation2 + $0x158] sm:$0x3] %vm320_vm2, %v3248_v3  ;;  %1215 = vmatprep.subr.bf16.mxu1 %v3075_v23  ;;  %v3107_v44 = vld [vmem:[%s4484_s3 + $0x190] ss:$8 sps:$4 sm:$0xff]  }
  0x2e   : > { %432 = vst.msk [vmem:[#allocation2 + $0x160] sm:$0xff] %vm318_vm1, %v3248_v3  ;;  %434 = vst.msk [vmem:[#allocation2 + $0x170] sm:$0xff] %vm318_vm1, %v3248_v3  ;;  %v3111_v47 = vld [vmem:[%s4484_s3 + $0x1a4] ss:$8 sps:$4 sm:$0xff]   ;;  %v3113_v48 = vld [vmem:[%s4484_s3 + $0x1a0] ss:$8 sps:$4 sm:$0xff]  }
  0x2f   : > { %433 = vst.msk [vmem:[#allocation2 + $0x168] sm:$0x3] %vm320_vm2, %v3248_v3  ;;  %435 = vst.msk [vmem:[#allocation2 + $0x178] sm:$0x3] %vm320_vm2, %v3248_v3  ;;  %1216 = vmatpush1.bf16.msra.mxu1 %v3077_v24  ;;  %v3114_v49 = vld [vmem:[%s4484_s3 + $0x2b4] ss:$8 sps:$4 sm:$0xff]  }
  0x30   : > { %469 = vst.msk [vmem:[#allocation2 + $0x180] sm:$0xff] %vm318_vm1, %v3248_v3  ;;  %471 = vst.msk [vmem:[#allocation2 + $0x190] sm:$0xff] %vm318_vm1, %v3248_v3  ;;  %668 = vrot.lane.b32.xlu1 %v572_v39, %s3250_s15  ;;  %666 = vrot.lane.b32.xlu0 %v570_v40, %s3250_s15  ;;  %v3116_v50 = vld [vmem:[%s4484_s3 + $0x2b0] ss:$8 sps:$4 sm:$0xff]   ;;  %v3117_v51 = vld [vmem:[%s4484_s3 + $0x1b4] ss:$8 sps:$4 sm:$0xff]  }
  0x31   : > { %470 = vst.msk [vmem:[#allocation2 + $0x188] sm:$0x3] %vm320_vm2, %v3248_v3  ;;  %472 = vst.msk [vmem:[#allocation2 + $0x198] sm:$0x3] %vm320_vm2, %v3248_v3  ;;  %1217 = vmatprep.subr.bf16.mxu1 %v3081_v27  ;;  %v3119_v52 = vld [vmem:[%s4484_s3 + $0x1b0] ss:$8 sps:$4 sm:$0xff]  }
  0x32   : > { %473 = vst.msk [vmem:[#allocation2 + $0x1a0] sm:$0xff] %vm318_vm1, %v3248_v3  ;;  %475 = vst.msk [vmem:[#allocation2 + $0x1b0] sm:$0xff] %vm318_vm1, %v3248_v3  ;;  %v3123_v57 = vld [vmem:[%s4484_s3 + $0x1c4] ss:$8 sps:$4 sm:$0xff]   ;;  %v3125_v58 = vld [vmem:[%s4484_s3 + $0x1c0] ss:$8 sps:$4 sm:$0xff]  }
  0x33   : > { %474 = vst.msk [vmem:[#allocation2 + $0x1a8] sm:$0x3] %vm320_vm2, %v3248_v3  ;;  %476 = vst.msk [vmem:[#allocation2 + $0x1b8] sm:$0x3] %vm320_vm2, %v3248_v3  ;;  %1218 = vmatpush1.bf16.msra.mxu1 %v3083_v28  ;;  %v3129_v63 = vld [vmem:[%s4484_s3 + $0x1d4] ss:$8 sps:$4 sm:$0xff]  }
  0x34   : > { %477 = vst.msk [vmem:[#allocation2 + $0x1c0] sm:$0xff] %vm318_vm1, %v3248_v3  ;;  %479 = vst.msk [vmem:[#allocation2 + $0x1d0] sm:$0xff] %vm318_vm1, %v3248_v3  ;;  %700 = vrot.lane.b32.xlu1 %v572_v39, %s3249_s14  ;;  %698 = vrot.lane.b32.xlu0 %v570_v40, %s3249_s14  ;;  %v3099_v39 = vld [vmem:[%s4484_s3 + $0x184] ss:$8 sps:$4 sm:$0xff]   ;;  %v3101_v40 = vld [vmem:[%s4484_s3 + $0x180] ss:$8 sps:$4 sm:$0xff]  }
  0x35   : > { %478 = vst.msk [vmem:[#allocation2 + $0x1c8] sm:$0x3] %vm320_vm2, %v3248_v3  ;;  %480 = vst.msk [vmem:[#allocation2 + $0x1d8] sm:$0x3] %vm320_vm2, %v3248_v3  ;;  %1219 = vmatprep.subr.bf16.mxu1 %v3087_v31  ;;  %v3131_v0 = vld [vmem:[%s4484_s3 + $0x1d0] ss:$8 sps:$4 sm:$0xff]  }
  0x36   : > { %481 = vst.msk [vmem:[#allocation2 + $0x1e0] sm:$0xff] %vm318_vm1, %v3248_v3  ;;  %483 = vst.msk [vmem:[#allocation2 + $0x1f0] sm:$0xff] %vm318_vm1, %v3248_v3  ;;  %v3135_v7 = vld [vmem:[%s4484_s3 + $0x1e4] ss:$8 sps:$4 sm:$0xff]   ;;  %v3137_v8 = vld [vmem:[%s4484_s3 + $0x1e0] ss:$8 sps:$4 sm:$0xff]  }
  0x37   : > { %482 = vst.msk [vmem:[#allocation2 + $0x1e8] sm:$0x3] %vm320_vm2, %v3248_v3  ;;  %484 = vst.msk [vmem:[#allocation2 + $0x1f8] sm:$0x3] %vm320_vm2, %v3248_v3  ;;  %1220 = vmatpush1.bf16.msra.mxu1 %v3089_v32  ;;  %v3141_v19 = vld [vmem:[%s4484_s3 + $0x1f4] ss:$8 sps:$4 sm:$0xff]  }
  0x38   : > { %387 = vst.msk [vmem:[#allocation2 + $0x80] sm:$0xff] %vm336_vm3, %v3248_v3  ;;  %337 = vst.msk [vmem:[#allocation2] sm:$0xff] %vm336_vm3, %v3248_v3  ;;  %599 = vrot.lane.b32.xlu1 %v575_v45, %s3250_s15  ;;  %597 = vrot.lane.b32.xlu0 %v573_v46, %s3250_s15  ;;  %v3143_v20 = vld [vmem:[%s4484_s3 + $0x1f0] ss:$8 sps:$4 sm:$0xff]   ;;  %v3149_v27 = vld [vmem:[%s4484_s3 + $0x4] ss:$8 sps:$4 sm:$0xff]  }
  0x39   : > { %388 = vst.msk [vmem:[#allocation2 + $0x88] sm:$0x3] %vm338_vm4, %v3248_v3  ;;  %339 = vst.msk [vmem:[#allocation2 + $0x8] sm:$0x3] %vm338_vm4, %v3248_v3  ;;  %1221 = vmatprep.subr.bf16.mxu1 %v3093_v35  ;;  %p296_p4 = scmp.lt.s32.totalorder %s3303_s27, 1 }
  0x3a   : > { %389 = vst.msk [vmem:[#allocation2 + $0x90] sm:$0xff] %vm336_vm3, %v3248_v3  ;;  %340 = vst.msk [vmem:[#allocation2 + $0x10] sm:$0xff] %vm336_vm3, %v3248_v3 }
  0x3b   : > { %390 = vst.msk [vmem:[#allocation2 + $0x98] sm:$0x3] %vm338_vm4, %v3248_v3  ;;  %341 = vst.msk [vmem:[#allocation2 + $0x18] sm:$0x3] %vm338_vm4, %v3248_v3  ;;  %1222 = vmatpush1.bf16.msra.mxu1 %v3095_v36  ;;  %s4493_s27 = smov (!%p296_p4, %s3303_s27), 1 }
  0x3c   : > { %342 = vst.msk [vmem:[#allocation2 + $0x20] sm:$0xff] %vm336_vm3, %v3248_v3  ;;  %344 = vst.msk [vmem:[#allocation2 + $0x30] sm:$0xff] %vm336_vm3, %v3248_v3  ;;  %632 = vrot.lane.b32.xlu1 %v575_v45, %s3249_s14  ;;  %630 = vrot.lane.b32.xlu0 %v573_v46, %s3249_s14  ;;  %v3108_v45 = vld [vmem:[%s4484_s3 + $0x2a4] ss:$8 sps:$4 sm:$0xff]   ;;  %v3110_v46 = vld [vmem:[%s4484_s3 + $0x2a0] ss:$8 sps:$4 sm:$0xff]  }
  0x3d   : > { %343 = vst.msk [vmem:[#allocation2 + $0x28] sm:$0x3] %vm338_vm4, %v3248_v3  ;;  %345 = vst.msk [vmem:[#allocation2 + $0x38] sm:$0x3] %vm338_vm4, %v3248_v3  ;;  %1223 = vmatprep.subr.bf16.mxu1 %v3099_v39  ;;  %s2745_s28 = sshll.u32 %s4493_s27, 2 }
  0x3e   : > { %346 = vst.msk [vmem:[#allocation2 + $0x40] sm:$0xff] %vm336_vm3, %v3248_v3  ;;  %348 = vst.msk [vmem:[#allocation2 + $0x50] sm:$0xff] %vm336_vm3, %v3248_v3  ;;  %s300_s11 = scalar_lea.vmem %s4488_s7, %s2745_s28 }
  0x3f   : > { %347 = vst.msk [vmem:[#allocation2 + $0x48] sm:$0x3] %vm338_vm4, %v3248_v3  ;;  %349 = vst.msk [vmem:[#allocation2 + $0x58] sm:$0x3] %vm338_vm4, %v3248_v3  ;;  %1224 = vmatpush1.bf16.msra.mxu1 %v3101_v40 }
  0x40   : > { %350 = vst.msk [vmem:[#allocation2 + $0x60] sm:$0xff] %vm336_vm3, %v3248_v3  ;;  %352 = vst.msk [vmem:[#allocation2 + $0x70] sm:$0xff] %vm336_vm3, %v3248_v3  ;;  %672 = vrot.lane.b32.xlu1 %v576_v53, %s3250_s15  ;;  %670 = vrot.lane.b32.xlu0 %v574_v54, %s3250_s15 }
  0x41   : > { %351 = vst.msk [vmem:[#allocation2 + $0x68] sm:$0x3] %vm338_vm4, %v3248_v3  ;;  %353 = vst.msk [vmem:[#allocation2 + $0x78] sm:$0x3] %vm338_vm4, %v3248_v3  ;;  %1225 = vmatprep.subr.bf16.mxu1 %v3105_v43 }
  0x42   : > { %391 = vst.msk [vmem:[#allocation2 + $0xa0] sm:$0xff] %vm336_vm3, %v3248_v3  ;;  %393 = vst.msk [vmem:[#allocation2 + $0xb0] sm:$0xff] %vm336_vm3, %v3248_v3 }
  0x43   : > { %392 = vst.msk [vmem:[#allocation2 + $0xa8] sm:$0x3] %vm338_vm4, %v3248_v3  ;;  %394 = vst.msk [vmem:[#allocation2 + $0xb8] sm:$0x3] %vm338_vm4, %v3248_v3  ;;  %1226 = vmatpush1.bf16.msra.mxu1 %v3107_v44 }
  0x44   : > { %395 = vst.msk [vmem:[#allocation2 + $0xc0] sm:$0xff] %vm336_vm3, %v3248_v3  ;;  %397 = vst.msk [vmem:[#allocation2 + $0xd0] sm:$0xff] %vm336_vm3, %v3248_v3  ;;  %704 = vrot.lane.b32.xlu1 %v576_v53, %s3249_s14  ;;  %702 = vrot.lane.b32.xlu0 %v574_v54, %s3249_s14  ;;  %v3120_v53 = vld [vmem:[%s4484_s3 + $0x2c4] ss:$8 sps:$4 sm:$0xff]   ;;  %v3122_v54 = vld [vmem:[%s4484_s3 + $0x2c0] ss:$8 sps:$4 sm:$0xff]  }
  0x45   : > { %396 = vst.msk [vmem:[#allocation2 + $0xc8] sm:$0x3] %vm338_vm4, %v3248_v3  ;;  %398 = vst.msk [vmem:[#allocation2 + $0xd8] sm:$0x3] %vm338_vm4, %v3248_v3  ;;  %1227 = vmatprep.subr.bf16.mxu1 %v3111_v47 }
  0x46   : > { %399 = vst.msk [vmem:[#allocation2 + $0xe0] sm:$0xff] %vm336_vm3, %v3248_v3  ;;  %401 = vst.msk [vmem:[#allocation2 + $0xf0] sm:$0xff] %vm336_vm3, %v3248_v3 }
  0x47   : > { %400 = vst.msk [vmem:[#allocation2 + $0xe8] sm:$0x3] %vm338_vm4, %v3248_v3  ;;  %402 = vst.msk [vmem:[#allocation2 + $0xf8] sm:$0x3] %vm338_vm4, %v3248_v3  ;;  %1228 = vmatpush1.bf16.msra.mxu1 %v3113_v48 }
  0x48   : > { %436 = vst.msk [vmem:[#allocation2 + $0x100] sm:$0xff] %vm336_vm3, %v3248_v3  ;;  %438 = vst.msk [vmem:[#allocation2 + $0x110] sm:$0xff] %vm336_vm3, %v3248_v3  ;;  %603 = vrot.lane.b32.xlu1 %v579_v59, %s3250_s15  ;;  %601 = vrot.lane.b32.xlu0 %v577_v60, %s3250_s15 }
  0x49   : > { %437 = vst.msk [vmem:[#allocation2 + $0x108] sm:$0x3] %vm338_vm4, %v3248_v3  ;;  %439 = vst.msk [vmem:[#allocation2 + $0x118] sm:$0x3] %vm338_vm4, %v3248_v3  ;;  %1229 = vmatprep.subr.bf16.mxu1 %v3117_v51 }
  0x4a   : > { %440 = vst.msk [vmem:[#allocation2 + $0x120] sm:$0xff] %vm336_vm3, %v3248_v3  ;;  %442 = vst.msk [vmem:[#allocation2 + $0x130] sm:$0xff] %vm336_vm3, %v3248_v3 }
  0x4b   : > { %441 = vst.msk [vmem:[#allocation2 + $0x128] sm:$0x3] %vm338_vm4, %v3248_v3  ;;  %443 = vst.msk [vmem:[#allocation2 + $0x138] sm:$0x3] %vm338_vm4, %v3248_v3  ;;  %1230 = vmatpush1.bf16.msra.mxu1 %v3119_v52 }
  0x4c   : > { %444 = vst.msk [vmem:[#allocation2 + $0x140] sm:$0xff] %vm336_vm3, %v3248_v3  ;;  %446 = vst.msk [vmem:[#allocation2 + $0x150] sm:$0xff] %vm336_vm3, %v3248_v3  ;;  %636 = vrot.lane.b32.xlu1 %v579_v59, %s3249_s14  ;;  %634 = vrot.lane.b32.xlu0 %v577_v60, %s3249_s14  ;;  %v3126_v59 = vld [vmem:[%s4484_s3 + $0x2d4] ss:$8 sps:$4 sm:$0xff]   ;;  %v3128_v60 = vld [vmem:[%s4484_s3 + $0x2d0] ss:$8 sps:$4 sm:$0xff]  }
  0x4d   : > { %445 = vst.msk [vmem:[#allocation2 + $0x148] sm:$0x3] %vm338_vm4, %v3248_v3  ;;  %447 = vst.msk [vmem:[#allocation2 + $0x158] sm:$0x3] %vm338_vm4, %v3248_v3  ;;  %1231 = vmatprep.subr.bf16.mxu1 %v3123_v57 }
  0x4e   : > { %448 = vst.msk [vmem:[#allocation2 + $0x160] sm:$0xff] %vm336_vm3, %v3248_v3  ;;  %450 = vst.msk [vmem:[#allocation2 + $0x170] sm:$0xff] %vm336_vm3, %v3248_v3 }
  0x4f   : > { %449 = vst.msk [vmem:[#allocation2 + $0x168] sm:$0x3] %vm338_vm4, %v3248_v3  ;;  %451 = vst.msk [vmem:[#allocation2 + $0x178] sm:$0x3] %vm338_vm4, %v3248_v3  ;;  %1232 = vmatpush1.bf16.msra.mxu1 %v3125_v58 }
  0x50   : > { %485 = vst.msk [vmem:[#allocation2 + $0x180] sm:$0xff] %vm336_vm3, %v3248_v3  ;;  %487 = vst.msk [vmem:[#allocation2 + $0x190] sm:$0xff] %vm336_vm3, %v3248_v3  ;;  %676 = vrot.lane.b32.xlu1 %v580_v1, %s3250_s15  ;;  %674 = vrot.lane.b32.xlu0 %v578_v2, %s3250_s15 }
  0x51   : > { %486 = vst.msk [vmem:[#allocation2 + $0x188] sm:$0x3] %vm338_vm4, %v3248_v3  ;;  %488 = vst.msk [vmem:[#allocation2 + $0x198] sm:$0x3] %vm338_vm4, %v3248_v3  ;;  %1233 = vmatprep.subr.bf16.mxu1 %v3129_v63 }
  0x52   : > { %489 = vst.msk [vmem:[#allocation2 + $0x1a0] sm:$0xff] %vm336_vm3, %v3248_v3  ;;  %491 = vst.msk [vmem:[#allocation2 + $0x1b0] sm:$0xff] %vm336_vm3, %v3248_v3 }
  0x53   : > { %490 = vst.msk [vmem:[#allocation2 + $0x1a8] sm:$0x3] %vm338_vm4, %v3248_v3  ;;  %492 = vst.msk [vmem:[#allocation2 + $0x1b8] sm:$0x3] %vm338_vm4, %v3248_v3  ;;  %1234 = vmatpush1.bf16.msra.mxu1 %v3131_v0 }
  0x54   : > { %493 = vst.msk [vmem:[#allocation2 + $0x1c0] sm:$0xff] %vm336_vm3, %v3248_v3  ;;  %495 = vst.msk [vmem:[#allocation2 + $0x1d0] sm:$0xff] %vm336_vm3, %v3248_v3  ;;  %708 = vrot.lane.b32.xlu1 %v580_v1, %s3249_s14  ;;  %706 = vrot.lane.b32.xlu0 %v578_v2, %s3249_s14  ;;  %v3132_v1 = vld [vmem:[%s4484_s3 + $0x2e4] ss:$8 sps:$4 sm:$0xff]   ;;  %v3134_v2 = vld [vmem:[%s4484_s3 + $0x2e0] ss:$8 sps:$4 sm:$0xff]  }
  0x55   : > { %494 = vst.msk [vmem:[#allocation2 + $0x1c8] sm:$0x3] %vm338_vm4, %v3248_v3  ;;  %496 = vst.msk [vmem:[#allocation2 + $0x1d8] sm:$0x3] %vm338_vm4, %v3248_v3  ;;  %1235 = vmatprep.subr.bf16.mxu1 %v3135_v7 }
  0x56   : > { %497 = vst.msk [vmem:[#allocation2 + $0x1e0] sm:$0xff] %vm336_vm3, %v3248_v3  ;;  %499 = vst.msk [vmem:[#allocation2 + $0x1f0] sm:$0xff] %vm336_vm3, %v3248_v3 }
  0x57   : > { %498 = vst.msk [vmem:[#allocation2 + $0x1e8] sm:$0x3] %vm338_vm4, %v3248_v3  ;;  %500 = vst.msk [vmem:[#allocation2 + $0x1f8] sm:$0x3] %vm338_vm4, %v3248_v3  ;;  %v3048_v3 = vld [vmem:[%s4484_s3 + $0x204] ss:$8 sps:$4 sm:$0xff]   ;;  %1236 = vmatpush1.bf16.msra.mxu1 %v3137_v8 }
  0x58   : > { %1833 = vmatprep.subr.bf16.mxu0 %v3048_v3  ;;  %1237 = vmatprep.subr.bf16.mxu1 %v3141_v19 }
  0x59   : > { %1834 = vmatpush1.bf16.msra.mxu0 %v3050_v4 }
  0x5a   : > { %1835 = vmatprep.subr.bf16.mxu0 %v3054_v9  ;;  %v3138_v9 = vld [vmem:[%s4484_s3 + $0x2f4] ss:$8 sps:$4 sm:$0xff]  }
  0x5b   : > { %1238 = vmatpush1.bf16.msra.mxu1 %v3143_v20 }
  0x5c   : > { %1440 = vmatprep.subr.bf16.mxu1 %v3149_v27 }
  0x5d   : > { %1836 = vmatpush1.bf16.msra.mxu0 %v3056_v10  ;;  %v3140_v10 = vld [vmem:[%s4484_s3 + $0x2f0] ss:$8 sps:$4 sm:$0xff]  }
  0x5e   : > { %1837 = vmatprep.subr.bf16.mxu0 %v3060_v13 }
  0x61   : > { %1838 = vmatpush1.bf16.msra.mxu0 %v3062_v14 }
  0x62   : > { %1839 = vmatprep.subr.bf16.mxu0 %v3066_v17 }
  0x65   : > { %1840 = vmatpush1.bf16.msra.mxu0 %v3068_v18 }
  0x66   : > { %1841 = vmatprep.subr.bf16.mxu0 %v3072_v21  ;;  %v3146_v21 = vld [vmem:[%s4484_s3 + $0x304] ss:$8 sps:$4 sm:$0xff]  }
  0x69   : > { %1842 = vmatpush1.bf16.msra.mxu0 %v3074_v22 }
  0x6a   : > { %1843 = vmatprep.subr.bf16.mxu0 %v3078_v25 }
  0x6d   : > { %1844 = vmatpush1.bf16.msra.mxu0 %v3080_v26 }
  0x6e   : > { %1845 = vmatprep.subr.bf16.mxu0 %v3084_v29 }
  0x71   : > { %1846 = vmatpush1.bf16.msra.mxu0 %v3086_v30 }
  0x72   : > { %1847 = vmatprep.subr.bf16.mxu0 %v3090_v33 }
  0x75   : > { %1848 = vmatpush1.bf16.msra.mxu0 %v3092_v34 }
  0x76   : > { %1849 = vmatprep.subr.bf16.mxu0 %v3096_v37 }
  0x79   : > { %1850 = vmatpush1.bf16.msra.mxu0 %v3098_v38 }
  0x7a   : > { %1851 = vmatprep.subr.bf16.mxu0 %v3102_v41 }
  0x7d   : > { %1852 = vmatpush1.bf16.msra.mxu0 %v3104_v42 }
  0x7e   : > { %1853 = vmatprep.subr.bf16.mxu0 %v3108_v45 }
  0x81   : > { %1854 = vmatpush1.bf16.msra.mxu0 %v3110_v46 }
  0x82   : > { %1855 = vmatprep.subr.bf16.mxu0 %v3114_v49 }
  0x85   : > { %1856 = vmatpush1.bf16.msra.mxu0 %v3116_v50 }
  0x86   : > { %1857 = vmatprep.subr.bf16.mxu0 %v3120_v53 }
  0x89   : > { %1858 = vmatpush1.bf16.msra.mxu0 %v3122_v54 }
  0x8a   : > { %v623_v55 = vpop.permute.xlu1 %622  ;;  %v590_v56 = vpop.permute.xlu0 %589  ;;  %1859 = vmatprep.subr.bf16.mxu0 %v3126_v59 }
  0x8b   : > { %646 = vst.msk [vmem:[#allocation2 + $0x81] sm:$0xff] %vm613_vm5, %v623_v55  ;;  %614 = vst.msk [vmem:[#allocation2 + $0x1] sm:$0xff] %vm613_vm5, %v590_v56 }
  0x8d   : > { %1860 = vmatpush1.bf16.msra.mxu0 %v3128_v60 }
  0x8e   : > { %v625_v61 = vpop.permute.xlu1 %624  ;;  %v592_v62 = vpop.permute.xlu0 %591  ;;  %1861 = vmatprep.subr.bf16.mxu0 %v3132_v1 }
  0x8f   : > { %647 = vst.msk [vmem:[#allocation2 + $0x91] sm:$0xff] %vm613_vm5, %v625_v61  ;;  %615 = vst.msk [vmem:[#allocation2 + $0x11] sm:$0xff] %vm613_vm5, %v592_v62 }
  0x91   : > { %1862 = vmatpush1.bf16.msra.mxu0 %v3134_v2 }
  0x92   : > { %v665_v3 = vpop.permute.xlu1 %664  ;;  %v663_v4 = vpop.permute.xlu0 %662  ;;  %v3944_v11 = vld [vmem:[#allocation2 + $0x81] sm:$0xff]  ;;  %1863 = vmatprep.subr.bf16.mxu0 %v3138_v9 }
  0x93   : > { %687 = vst.msk [vmem:[#allocation2 + $0x111] sm:$0xff] %vm613_vm5, %v665_v3  ;;  %686 = vst.msk [vmem:[#allocation2 + $0x101] sm:$0xff] %vm613_vm5, %v663_v4  ;;  %v895_v15 = vld [vmem:[#allocation2 + $0x1] sm:$0xff] }
  0x95   : > { %1864 = vmatpush1.bf16.msra.mxu0 %v3140_v10 }
  0x96   : > { %v697_v12 = vpop.permute.xlu1 %696  ;;  %v695_v13 = vpop.permute.xlu0 %694  ;;  %v3946_v14 = vld [vmem:[#allocation2 + $0x91] sm:$0xff]  ;;  %2242 = vmatprep.subr.bf16.mxu0 %v3146_v21 }
  0x97   : > { %v896_v16 = vld [vmem:[#allocation2 + $0x11] sm:$0xff]  ;;  %719 = vst.msk [vmem:[#allocation2 + $0x191] sm:$0xff] %vm613_vm5, %v697_v12  ;;  %718 = vst.msk [vmem:[#allocation2 + $0x181] sm:$0xff] %vm613_vm5, %v695_v13  ;;  %v2808_v17 = vpack.i.bf16 %v3946_v14, %v3944_v11 }
  0x98   : > { %v2813_v18 = vpack.i.bf16 %v896_v16, %v895_v15 }
  0x99   : > { %2809 = vrot.lane.b32.xlu0 %v2808_v17, %s3251_s20 }
  0x9a   : > { %2814 = vrot.lane.b32.xlu1 %v2813_v18, %s3252_s21  ;;  %v596_v22 = vpop.permute.xlu1 %595  ;;  %v594_v23 = vpop.permute.xlu0 %593  ;;  %v1521_v24 = vld [vmem:[#allocation2 + $0x101] sm:$0xff]  ;;  %v1522_v25 = vld [vmem:[#allocation2 + $0x111] sm:$0xff] }
  0x9b   : > { %617 = vst.msk [vmem:[#allocation2 + $0x31] sm:$0xff] %vm613_vm5, %v596_v22  ;;  %616 = vst.msk [vmem:[#allocation2 + $0x21] sm:$0xff] %vm613_vm5, %v594_v23  ;;  %v2823_v26 = vpack.i.bf16 %v1522_v25, %v1521_v24 }
  0x9e   : > { %2824 = vrot.lane.b32.xlu1 %v2823_v26, %s3252_s21  ;;  %v629_v28 = vpop.permute.xlu1 %628  ;;  %v627_v29 = vpop.permute.xlu0 %626  ;;  %v3969_v30 = vld [vmem:[#allocation2 + $0x181] sm:$0xff]  ;;  %v3971_v31 = vld [vmem:[#allocation2 + $0x191] sm:$0xff] }
  0x9f   : > { %649 = vst.msk [vmem:[#allocation2 + $0xb1] sm:$0xff] %vm613_vm5, %v629_v28  ;;  %648 = vst.msk [vmem:[#allocation2 + $0xa1] sm:$0xff] %vm613_vm5, %v627_v29  ;;  %v2818_v32 = vpack.i.bf16 %v3971_v31, %v3969_v30  ;;  %v734_v29 = vld [vmem:[#allocation2 + $0x100] sm:$0xff] }
  0xa1   : > { %2819 = vrot.lane.b32.xlu0 %v2818_v32, %s3251_s20  ;;  %v735_v32 = vld [vmem:[#allocation2 + $0x110] sm:$0xff] }
  0xa2   : > { %2834 = vrot.lane.b32.xlu1 %v2823_v26, %s3253_s24  ;;  %v669_v33 = vpop.permute.xlu1 %668  ;;  %v667_v34 = vpop.permute.xlu0 %666  ;;  %v897_v35 = vld [vmem:[#allocation2 + $0x21] sm:$0xff]  ;;  %v898_v36 = vld [vmem:[#allocation2 + $0x31] sm:$0xff] }
  0xa3   : > { %689 = vst.msk [vmem:[#allocation2 + $0x131] sm:$0xff] %vm613_vm5, %v669_v33  ;;  %688 = vst.msk [vmem:[#allocation2 + $0x121] sm:$0xff] %vm613_vm5, %v667_v34  ;;  %v2843_v37 = vpack.i.bf16 %v898_v36, %v897_v35  ;;  %v2933_v33 = vpack.i.bf16 %v735_v32, %v734_v29  ;;  %v1931_v34 = vld [vmem:[#allocation2 + $0x12] sm:$0xff]  ;;  %v4053_v35 = vld [vmem:[#allocation2 + $0x180] sm:$0xff] }
  0xa4   : > { %v4055_v36 = vld [vmem:[#allocation2 + $0x190] sm:$0xff] }
  0xa5   : > { %2829 = vrot.lane.b32.xlu0 %v2813_v18, %s3253_s24 }
  0xa6   : > { %2844 = vrot.lane.b32.xlu1 %v2843_v37, %s3252_s21  ;;  %v701_v38 = vpop.permute.xlu1 %700  ;;  %v699_v39 = vpop.permute.xlu0 %698  ;;  %v3983_v40 = vld [vmem:[#allocation2 + $0xa1] sm:$0xff]  ;;  %v3985_v41 = vld [vmem:[#allocation2 + $0xb1] sm:$0xff] }
  0xa7   : > { %721 = vst.msk [vmem:[#allocation2 + $0x1b1] sm:$0xff] %vm613_vm5, %v701_v38  ;;  %720 = vst.msk [vmem:[#allocation2 + $0x1a1] sm:$0xff] %vm613_vm5, %v699_v39  ;;  %v2838_v42 = vpack.i.bf16 %v3985_v41, %v3983_v40  ;;  %v2928_v39 = vpack.i.bf16 %v4055_v36, %v4053_v35 }
  0xa9   : > { %2839 = vrot.lane.b32.xlu0 %v2838_v42, %s3251_s20  ;;  %v4061_v42 = vld [vmem:[#allocation2 + $0x92] sm:$0xff] }
  0xaa   : > { %v600_v43 = vpop.permute.xlu1 %599  ;;  %v598_v44 = vpop.permute.xlu0 %597  ;;  %v1523_v45 = vld [vmem:[#allocation2 + $0x121] sm:$0xff]  ;;  %v1524_v46 = vld [vmem:[#allocation2 + $0x131] sm:$0xff] }
  0xab   : > { %619 = vst.msk [vmem:[#allocation2 + $0x51] sm:$0xff] %vm613_vm5, %v600_v43  ;;  %618 = vst.msk [vmem:[#allocation2 + $0x41] sm:$0xff] %vm613_vm5, %v598_v44  ;;  %v2853_v47 = vpack.i.bf16 %v1524_v46, %v1523_v45  ;;  %v4065_v43 = vld [vmem:[#allocation2 + $0x82] sm:$0xff]  ;;  %v737_v46 = vld [vmem:[#allocation2 + $0x130] sm:$0xff] }
  0xac   : > { %v2938_v44 = vpack.i.bf16 %v4061_v42, %v4065_v43  ;;  %v736_v45 = vld [vmem:[#allocation2 + $0x120] sm:$0xff] }
  0xad   : > { %2854 = vrot.lane.b32.xlu1 %v2853_v47, %s3252_s21 }
  0xae   : > { %v633_v48 = vpop.permute.xlu1 %632  ;;  %v631_v49 = vpop.permute.xlu0 %630  ;;  %v3995_v50 = vld [vmem:[#allocation2 + $0x1a1] sm:$0xff]  ;;  %v3997_v51 = vld [vmem:[#allocation2 + $0x1b1] sm:$0xff] }
  0xaf   : > { %651 = vst.msk [vmem:[#allocation2 + $0xd1] sm:$0xff] %vm613_vm5, %v633_v48  ;;  %650 = vst.msk [vmem:[#allocation2 + $0xc1] sm:$0xff] %vm613_vm5, %v631_v49  ;;  %v2848_v52 = vpack.i.bf16 %v3997_v51, %v3995_v50  ;;  %v1932_v48 = vld [vmem:[#allocation2 + $0x22] sm:$0xff]  ;;  %v1933_v49 = vld [vmem:[#allocation2 + $0x32] sm:$0xff] }
  0xb1   : > { %2864 = vrot.lane.b32.xlu1 %v2853_v47, %s3253_s24  ;;  %2849 = vrot.lane.b32.xlu0 %v2848_v52, %s3251_s20  ;;  %v2963_v47 = vpack.i.bf16 %v737_v46, %v736_v45  ;;  %v4071_v52 = vld [vmem:[#allocation2 + $0x1a0] sm:$0xff] }
  0xb2   : > { %v673_v53 = vpop.permute.xlu1 %672  ;;  %v671_v54 = vpop.permute.xlu0 %670  ;;  %v899_v55 = vld [vmem:[#allocation2 + $0x41] sm:$0xff]  ;;  %v900_v56 = vld [vmem:[#allocation2 + $0x51] sm:$0xff] }
  0xb3   : > { %691 = vst.msk [vmem:[#allocation2 + $0x151] sm:$0xff] %vm613_vm5, %v673_v53  ;;  %690 = vst.msk [vmem:[#allocation2 + $0x141] sm:$0xff] %vm613_vm5, %v671_v54  ;;  %v2873_v57 = vpack.i.bf16 %v900_v56, %v899_v55  ;;  %v4073_v53 = vld [vmem:[#allocation2 + $0x1b0] sm:$0xff]  ;;  %v2973_v54 = vpack.i.bf16 %v1933_v49, %v1932_v48  ;;  %v4079_v56 = vld [vmem:[#allocation2 + $0xa2] sm:$0xff] }
  0xb4   : > { %v2958_v55 = vpack.i.bf16 %v4073_v53, %v4071_v52 }
  0xb5   : > { %2859 = vrot.lane.b32.xlu0 %v2843_v37, %s3253_s24  ;;  %2874 = vrot.lane.b32.xlu1 %v2873_v57, %s3252_s21  ;;  %v1930_v37 = vld [vmem:[#allocation2 + $0x2] sm:$0xff] }
  0xb6   : > { %v705_v58 = vpop.permute.xlu1 %704  ;;  %v703_v59 = vpop.permute.xlu0 %702  ;;  %v4009_v60 = vld [vmem:[#allocation2 + $0xc1] sm:$0xff]  ;;  %v4011_v61 = vld [vmem:[#allocation2 + $0xd1] sm:$0xff]  ;;  %v2943_v38 = vpack.i.bf16 %v1931_v34, %v1930_v37 }
  0xb7   : > { %723 = vst.msk [vmem:[#allocation2 + $0x1d1] sm:$0xff] %vm613_vm5, %v705_v58  ;;  %722 = vst.msk [vmem:[#allocation2 + $0x1c1] sm:$0xff] %vm613_vm5, %v703_v59  ;;  %v2868_v62 = vpack.i.bf16 %v4011_v61, %v4009_v60 }
  0xb9   : > { %2869 = vrot.lane.b32.xlu0 %v2868_v62, %s3251_s20 }
  0xba   : > { %v604_v63 = vpop.permute.xlu1 %603  ;;  %v602_v0 = vpop.permute.xlu0 %601  ;;  %v1525_v1 = vld [vmem:[#allocation2 + $0x141] sm:$0xff]  ;;  %v1526_v2 = vld [vmem:[#allocation2 + $0x151] sm:$0xff] }
  0xbb   : > { %621 = vst.msk [vmem:[#allocation2 + $0x71] sm:$0xff] %vm613_vm5, %v604_v63  ;;  %620 = vst.msk [vmem:[#allocation2 + $0x61] sm:$0xff] %vm613_vm5, %v602_v0  ;;  %v2883_v3 = vpack.i.bf16 %v1526_v2, %v1525_v1  ;;  %v738_v59 = vld [vmem:[#allocation2 + $0x140] sm:$0xff]  ;;  %v739_v62 = vld [vmem:[#allocation2 + $0x150] sm:$0xff] }
  0xbc   : > { %v2993_v63 = vpack.i.bf16 %v739_v62, %v738_v59  ;;  %v1934_v0 = vld [vmem:[#allocation2 + $0x42] sm:$0xff]  ;;  %v1935_v1 = vld [vmem:[#allocation2 + $0x52] sm:$0xff] }
  0xbd   : > { %2884 = vrot.lane.b32.xlu1 %v2883_v3, %s3252_s21 }
  0xbe   : > { %v637_v4 = vpop.permute.xlu1 %636  ;;  %v635_v7 = vpop.permute.xlu0 %634  ;;  %v4021_v8 = vld [vmem:[#allocation2 + $0x1c1] sm:$0xff]  ;;  %v4023_v9 = vld [vmem:[#allocation2 + $0x1d1] sm:$0xff] }
  0xbf   : > { %653 = vst.msk [vmem:[#allocation2 + $0xf1] sm:$0xff] %vm613_vm5, %v637_v4  ;;  %652 = vst.msk [vmem:[#allocation2 + $0xe1] sm:$0xff] %vm613_vm5, %v635_v7  ;;  %v2878_v10 = vpack.i.bf16 %v4023_v9, %v4021_v8  ;;  %v4089_v2 = vld [vmem:[#allocation2 + $0x1c0] sm:$0xff]  ;;  %v3003_v4 = vpack.i.bf16 %v1935_v1, %v1934_v0 }
  0xc1   : > { %2894 = vrot.lane.b32.xlu1 %v2883_v3, %s3253_s24  ;;  %2879 = vrot.lane.b32.xlu0 %v2878_v10, %s3251_s20  ;;  %v4091_v3 = vld [vmem:[#allocation2 + $0x1d0] sm:$0xff]  ;;  %v4097_v10 = vld [vmem:[#allocation2 + $0xc2] sm:$0xff] }
  0xc2   : > { %v677_v12 = vpop.permute.xlu1 %676  ;;  %v675_v13 = vpop.permute.xlu0 %674  ;;  %v901_v15 = vld [vmem:[#allocation2 + $0x61] sm:$0xff]  ;;  %v902_v16 = vld [vmem:[#allocation2 + $0x71] sm:$0xff]  ;;  %v2988_v7 = vpack.i.bf16 %v4091_v3, %v4089_v2 }
  0xc3   : > { %693 = vst.msk [vmem:[#allocation2 + $0x171] sm:$0xff] %vm613_vm5, %v677_v12  ;;  %692 = vst.msk [vmem:[#allocation2 + $0x161] sm:$0xff] %vm613_vm5, %v675_v13  ;;  %v2903_v17 = vpack.i.bf16 %v902_v16, %v901_v15  ;;  %v4099_v12 = vld [vmem:[#allocation2 + $0xd2] sm:$0xff] }
  0xc4   : > { %v2998_v13 = vpack.i.bf16 %v4099_v12, %v4097_v10 }
  0xc5   : > { %2889 = vrot.lane.b32.xlu0 %v2873_v57, %s3253_s24  ;;  %2904 = vrot.lane.b32.xlu1 %v2903_v17, %s3252_s21  ;;  %v4081_v57 = vld [vmem:[#allocation2 + $0xb2] sm:$0xff] }
  0xc6   : > { %v709_v18 = vpop.permute.xlu1 %708  ;;  %v707_v19 = vpop.permute.xlu0 %706  ;;  %v4035_v20 = vld [vmem:[#allocation2 + $0xe1] sm:$0xff]  ;;  %v4037_v21 = vld [vmem:[#allocation2 + $0xf1] sm:$0xff]  ;;  %v2968_v58 = vpack.i.bf16 %v4081_v57, %v4079_v56 }
  0xc7   : > { %725 = vst.msk [vmem:[#allocation2 + $0x1f1] sm:$0xff] %vm613_vm5, %v709_v18  ;;  %724 = vst.msk [vmem:[#allocation2 + $0x1e1] sm:$0xff] %vm613_vm5, %v707_v19  ;;  %v2898_v22 = vpack.i.bf16 %v4037_v21, %v4035_v20  ;;  %v1936_v18 = vld [vmem:[#allocation2 + $0x62] sm:$0xff]  ;;  %v1937_v19 = vld [vmem:[#allocation2 + $0x72] sm:$0xff] }
  0xc8   : > { %v4117_v29 = vld [vmem:[#allocation2 + $0xf2] sm:$0xff] }
  0xc9   : > { %2899 = vrot.lane.b32.xlu0 %v2898_v22, %s3251_s20 }
  0xca   : > { %v1527_v23 = vld [vmem:[#allocation2 + $0x161] sm:$0xff]  ;;  %v1528_v24 = vld [vmem:[#allocation2 + $0x171] sm:$0xff] }
  0xcb   : > { %v2913_v25 = vpack.i.bf16 %v1528_v24, %v1527_v23  ;;  %v740_v15 = vld [vmem:[#allocation2 + $0x160] sm:$0xff]  ;;  %v741_v16 = vld [vmem:[#allocation2 + $0x170] sm:$0xff]  ;;  %v3033_v24 = vpack.i.bf16 %v1937_v19, %v1936_v18 }
  0xcd   : > { %2914 = vrot.lane.b32.xlu1 %v2913_v25, %s3252_s21 }
  0xce   : > { %v4045_v26 = vld [vmem:[#allocation2 + $0x1e1] sm:$0xff]  ;;  %v4047_v27 = vld [vmem:[#allocation2 + $0x1f1] sm:$0xff] }
  0xcf   : > { %v2908_v28 = vpack.i.bf16 %v4047_v27, %v4045_v26  ;;  %v4107_v22 = vld [vmem:[#allocation2 + $0x1e0] sm:$0xff]  ;;  %v4109_v23 = vld [vmem:[#allocation2 + $0x1f0] sm:$0xff] }
  0xd1   : > { %2924 = vrot.lane.b32.xlu1 %v2913_v25, %s3253_s24  ;;  %2909 = vrot.lane.b32.xlu0 %v2908_v28, %s3251_s20  ;;  %v3018_v25 = vpack.i.bf16 %v4109_v23, %v4107_v22  ;;  %v4115_v28 = vld [vmem:[#allocation2 + $0xe2] sm:$0xff] }
  0xd2   : > { %v3028_v32 = vpack.i.bf16 %v4117_v29, %v4115_v28 }
  0xd5   : > { %2934 = vrot.lane.b32.xlu1 %v2933_v33, %s3252_s21  ;;  %2919 = vrot.lane.b32.xlu0 %v2903_v17, %s3253_s24  ;;  %v3023_v17 = vpack.i.bf16 %v741_v16, %v740_v15 }
  0xd9   : > { %2944 = vrot.lane.b32.xlu1 %v2943_v38, %s3252_s21  ;;  %2929 = vrot.lane.b32.xlu0 %v2928_v39, %s3251_s20 }
  0xdd   : > { %2954 = vrot.lane.b32.xlu1 %v2943_v38, %s3253_s24  ;;  %2939 = vrot.lane.b32.xlu0 %v2938_v44, %s3251_s20 }
  0xe1   : > { %2964 = vrot.lane.b32.xlu1 %v2963_v47, %s3252_s21  ;;  %2949 = vrot.lane.b32.xlu0 %v2933_v33, %s3253_s24 }
  0xe5   : > { %2974 = vrot.lane.b32.xlu1 %v2973_v54, %s3252_s21  ;;  %2959 = vrot.lane.b32.xlu0 %v2958_v55, %s3251_s20 }
  0xe9   : > { %2984 = vrot.lane.b32.xlu1 %v2973_v54, %s3253_s24  ;;  %2969 = vrot.lane.b32.xlu0 %v2968_v58, %s3251_s20 }
  0xed   : > { %2994 = vrot.lane.b32.xlu1 %v2993_v63, %s3252_s21  ;;  %2979 = vrot.lane.b32.xlu0 %v2963_v47, %s3253_s24 }
  0xf1   : > { %3004 = vrot.lane.b32.xlu1 %v3003_v4, %s3252_s21  ;;  %2989 = vrot.lane.b32.xlu0 %v2988_v7, %s3251_s20 }
  0xf5   : > { %3014 = vrot.lane.b32.xlu1 %v3003_v4, %s3253_s24  ;;  %2999 = vrot.lane.b32.xlu0 %v2998_v13, %s3251_s20 }
  0xf9   : > { %3024 = vrot.lane.b32.xlu1 %v3023_v17, %s3252_s21  ;;  %3009 = vrot.lane.b32.xlu0 %v2993_v63, %s3253_s24 }
  0xfd   : > { %3034 = vrot.lane.b32.xlu1 %v3033_v24, %s3252_s21  ;;  %3019 = vrot.lane.b32.xlu0 %v3018_v25, %s3251_s20  ;;  %v3152_v25 = vld [vmem:[%s4484_s3 + $0x314] ss:$8 sps:$4 sm:$0xff]  }
 0x101   : > { %3044 = vrot.lane.b32.xlu1 %v3033_v24, %s3253_s24  ;;  %3029 = vrot.lane.b32.xlu0 %v3028_v32, %s3251_s20 }
 0x105   : > { %3039 = vrot.lane.b32.xlu0 %v3023_v17, %s3253_s24  ;;  %v3144_v17 = vld [vmem:[%s4484_s3 + $0x300] ss:$8 sps:$4 sm:$0xff]  }
 0x10b   : > { %v2810_v34 = vpop.permute.xlu0 %2809 }
 0x10c   : > { %v2815_v33 = vpop.permute.xlu1 %2814  ;;  %v2812_v39 = vunpack.i.h.bf16 %v2810_v34  ;;  %v2811_v44 = vunpack.i.l.bf16 %v2810_v34 }
 0x10d   : > { %v2817_v37 = vunpack.i.h.bf16 %v2815_v33  ;;  %v2816_v38 = vunpack.i.l.bf16 %v2815_v33 }
 0x10f   : > { %v999_v45 = vsel %vm830_vm6, %v2811_v44, %v2816_v38  ;;  %v1000_v46 = vsel %vm830_vm6, %v2812_v39, %v2817_v37  ;;  %v3150_v38 = vld [vmem:[%s4484_s3 + $0x310] ss:$8 sps:$4 sm:$0xff]   ;;  %v3155_v39 = vld [vmem:[%s4484_s3 + $0x14] ss:$8 sps:$4 sm:$0xff]  }
 0x110   : > { %v2825_v47 = vpop.permute.xlu1 %2824  ;;  %v1008_v48 = vpack.c.bf16 %v1000_v46, %v999_v45 }
 0x111   : > { %v2827_v49 = vunpack.i.h.bf16 %v2825_v47  ;;  %v2826_v54 = vunpack.i.l.bf16 %v2825_v47 }
 0x112   : > { %1239 = vmatprep.mubr.bf16.mxu1 %v1008_v48 }
 0x113   : > { %v2820_v58 = vpop.permute.xlu0 %2819 }
 0x114   : > { %v2835_v55 = vpop.permute.xlu1 %2834  ;;  %v2822_v63 = vunpack.i.h.bf16 %v2820_v58  ;;  %v2821_v0 = vunpack.i.l.bf16 %v2820_v58  ;;  %v3156_v58 = vld [vmem:[%s4484_s3 + $0x320] ss:$8 sps:$4 sm:$0xff]  }
 0x115   : > { %v2837_v59 = vunpack.i.h.bf16 %v2835_v55  ;;  %v2836_v62 = vunpack.i.l.bf16 %v2835_v55 }
 0x116   : > { %v1625_v1 = vsel %vm830_vm6, %v2821_v0, %v2826_v54  ;;  %v1626_v4 = vsel %vm830_vm6, %v2822_v63, %v2827_v49  ;;  %v3159_v63 = vld [vmem:[%s4484_s3 + $0x20] ss:$8 sps:$4 sm:$0xff]  }
 0x117   : > { %v1617_v7 = vsel %vm830_vm6, %v3969_v30, %v2836_v62  ;;  %v1618_v13 = vsel %vm830_vm6, %v3971_v31, %v2837_v59  ;;  %v2830_v15 = vpop.permute.xlu0 %2829  ;;  %v1634_v16 = vpack.c.bf16 %v1626_v4, %v1625_v1  ;;  %v3147_v30 = vld [vmem:[%s4484_s3] ss:$8 sps:$4 sm:$0xff]   ;;  %v3161_v59 = vld [vmem:[%s4484_s3 + $0x24] ss:$8 sps:$4 sm:$0xff]   ;;  %v3164_v62 = vld [vmem:[%s4484_s3 + $0x334] ss:$8 sps:$4 sm:$0xff]  }
 0x118   : > { %v1633_v18 = vpack.c.bf16 %v1618_v13, %v1617_v7  ;;  %v2832_v19 = vunpack.i.h.bf16 %v2830_v15  ;;  %v2831_v24 = vunpack.i.l.bf16 %v2830_v15  ;;  %v2845_v32 = vpop.permute.xlu1 %2844  ;;  %v3162_v13 = vld [vmem:[%s4484_s3 + $0x330] ss:$8 sps:$4 sm:$0xff]   ;;  %v3167_v15 = vld [vmem:[%s4484_s3 + $0x34] ss:$8 sps:$4 sm:$0xff]  }
 0x119   : > { %1865 = vmatprep.mubr.bf16.mxu0 %v1634_v16  ;;  %v2847_v44 = vunpack.i.h.bf16 %v2845_v32  ;;  %v2846_v45 = vunpack.i.l.bf16 %v2845_v32 }
 0x11a   : > { %1866 = vmatmul.mubr.bf16.vlgmr.msra.gmra.mrb[0].mxu0 %v1633_v18  ;;  %v991_v31 = vsel %vm830_vm6, %v3944_v11, %v2831_v24  ;;  %v992_v33 = vsel %vm830_vm6, %v3946_v14, %v2832_v19  ;;  %v3158_v11 = vld [vmem:[%s4484_s3 + $0x324] ss:$8 sps:$4 sm:$0xff]   ;;  %v3153_v14 = vld [vmem:[%s4484_s3 + $0x10] ss:$8 sps:$4 sm:$0xff]  }
 0x11b   : > { %2243 = vmatpush1.bf16.msra.mxu0 %v3144_v17  ;;  %v2840_v34 = vpop.permute.xlu0 %2839  ;;  %v1007_v37 = vpack.c.bf16 %v992_v33, %v991_v31  ;;  %v3170_v24 = vld [vmem:[%s4484_s3 + $0x344] ss:$8 sps:$4 sm:$0xff]  }
 0x11c   : > { %v2842_v46 = vunpack.i.h.bf16 %v2840_v34  ;;  %v2841_v47 = vunpack.i.l.bf16 %v2840_v34  ;;  %2244 = vmatprep.subr.bf16.mxu0 %v3152_v25  ;;  %v3165_v25 = vld [vmem:[%s4484_s3 + $0x30] ss:$8 sps:$4 sm:$0xff]  }
 0x11d   : > { %1240 = vmatmul.mubr.bf16.vlgmr.msra.gmra.mrb[0].mxu1 %v1007_v37 }
 0x11e   : > { %1441 = vmatpush1.bf16.msra.mxu1 %v3147_v30  ;;  %v1001_v48 = vsel %vm830_vm6, %v2841_v47, %v2846_v45  ;;  %v1002_v49 = vsel %vm830_vm6, %v2842_v46, %v2847_v44  ;;  %v3173_v44 = vld [vmem:[%s4484_s3 + $0x44] ss:$8 sps:$4 sm:$0xff]   ;;  %v3171_v47 = vld [vmem:[%s4484_s3 + $0x40] ss:$8 sps:$4 sm:$0xff]  }
 0x11f   : > { %2245 = vmatpush1.bf16.msra.mxu0 %v3150_v38  ;;  %v2855_v54 = vpop.permute.xlu1 %2854  ;;  %1442 = vmatprep.subr.bf16.mxu1 %v3155_v39  ;;  %v1010_v55 = vpack.c.bf16 %v1002_v49, %v1001_v48  ;;  %v3168_v38 = vld [vmem:[%s4484_s3 + $0x340] ss:$8 sps:$4 sm:$0xff]  }
 0x120   : > { %2246 = vmatprep.subr.bf16.mxu0 %v3158_v11  ;;  %v2857_v0 = vunpack.i.h.bf16 %v2855_v54  ;;  %v2856_v1 = vunpack.i.l.bf16 %v2855_v54  ;;  %v3174_v54 = vld [vmem:[%s4484_s3 + $0x350] ss:$8 sps:$4 sm:$0xff]  }
 0x121   : > { %1249 = vmatprep.mubr.bf16.mxu1 %v1010_v55  ;;  %v3179_v55 = vld [vmem:[%s4484_s3 + $0x54] ss:$8 sps:$4 sm:$0xff]  }
 0x122   : > { %1443 = vmatpush1.bf16.msra.mxu1 %v3153_v14 }
 0x123   : > { %2247 = vmatpush1.bf16.msra.mxu0 %v3156_v58  ;;  %v2865_v4 = vpop.permute.xlu1 %2864  ;;  %v2850_v7 = vpop.permute.xlu0 %2849  ;;  %1444 = vmatprep.subr.bf16.mxu1 %v3161_v59 }
 0x124   : > { %v2867_v16 = vunpack.i.h.bf16 %v2865_v4  ;;  %v2866_v17 = vunpack.i.l.bf16 %v2865_v4  ;;  %v2852_v18 = vunpack.i.h.bf16 %v2850_v7  ;;  %v2851_v19 = vunpack.i.l.bf16 %v2850_v7  ;;  %2248 = vmatprep.subr.bf16.mxu0 %v3164_v62 }
 0x126   : > { %1445 = vmatpush1.bf16.msra.mxu1 %v3159_v63  ;;  %v1627_v32 = vsel %vm830_vm6, %v2851_v19, %v2856_v1  ;;  %v1628_v30 = vsel %vm830_vm6, %v2852_v18, %v2857_v0  ;;  %v1619_v31 = vsel %vm830_vm6, %v3995_v50, %v2866_v17  ;;  %v1620_v33 = vsel %vm830_vm6, %v3997_v51, %v2867_v16  ;;  %v3176_v50 = vld [vmem:[%s4484_s3 + $0x354] ss:$8 sps:$4 sm:$0xff]   ;;  %v3183_v17 = vld [vmem:[%s4484_s3 + $0x60] ss:$8 sps:$4 sm:$0xff]  }
 0x127   : > { %2249 = vmatpush1.bf16.msra.mxu0 %v3162_v13  ;;  %v2860_v34 = vpop.permute.xlu0 %2859  ;;  %1446 = vmatprep.subr.bf16.mxu1 %v3167_v15  ;;  %v1636_v37 = vpack.c.bf16 %v1628_v30, %v1627_v32  ;;  %v1635_v39 = vpack.c.bf16 %v1620_v33, %v1619_v31  ;;  %v2875_v51 = vpop.permute.xlu1 %2874  ;;  %v3180_v13 = vld [vmem:[%s4484_s3 + $0x360] ss:$8 sps:$4 sm:$0xff]   ;;  %v3185_v15 = vld [vmem:[%s4484_s3 + $0x64] ss:$8 sps:$4 sm:$0xff]   ;;  %v3188_v16 = vld [vmem:[%s4484_s3 + $0x374] ss:$8 sps:$4 sm:$0xff]  }
 0x128   : > { %v2862_v45 = vunpack.i.h.bf16 %v2860_v34  ;;  %v2861_v46 = vunpack.i.l.bf16 %v2860_v34  ;;  %2250 = vmatprep.subr.bf16.mxu0 %v3170_v24  ;;  %v2877_v58 = vunpack.i.h.bf16 %v2875_v51  ;;  %v2876_v59 = vunpack.i.l.bf16 %v2875_v51  ;;  %v3186_v32 = vld [vmem:[%s4484_s3 + $0x370] ss:$8 sps:$4 sm:$0xff]   ;;  %v3191_v30 = vld [vmem:[%s4484_s3 + $0x74] ss:$8 sps:$4 sm:$0xff]  }
 0x129   : > { %1875 = vmatprep.mubr.bf16.mxu0 %v1636_v37 }
 0x12a   : > { %1447 = vmatpush1.bf16.msra.mxu1 %v3165_v25  ;;  %1876 = vmatmul.mubr.bf16.gmra.mrb[4].mxu0 %v1635_v39  ;;  %v993_v11 = vsel %vm830_vm6, %v3983_v40, %v2861_v46  ;;  %v994_v14 = vsel %vm830_vm6, %v3985_v41, %v2862_v45  ;;  %v3182_v40 = vld [vmem:[%s4484_s3 + $0x364] ss:$8 sps:$4 sm:$0xff]   ;;  %v3177_v41 = vld [vmem:[%s4484_s3 + $0x50] ss:$8 sps:$4 sm:$0xff]  }
 0x12b   : > { %2251 = vmatpush1.bf16.msra.mxu0 %v3168_v38  ;;  %v2870_v48 = vpop.permute.xlu0 %2869  ;;  %1448 = vmatprep.subr.bf16.mxu1 %v3173_v44  ;;  %v1009_v49 = vpack.c.bf16 %v994_v14, %v993_v11  ;;  %v3194_v38 = vld [vmem:[%s4484_s3 + $0x384] ss:$8 sps:$4 sm:$0xff]   ;;  %v3189_v39 = vld [vmem:[%s4484_s3 + $0x70] ss:$8 sps:$4 sm:$0xff]   ;;  %v3192_v11 = vld [vmem:[%s4484_s3 + $0x380] ss:$8 sps:$4 sm:$0xff]  }
 0x12c   : > { %v2872_v62 = vunpack.i.h.bf16 %v2870_v48  ;;  %v2871_v63 = vunpack.i.l.bf16 %v2870_v48  ;;  %2252 = vmatprep.subr.bf16.mxu0 %v3176_v50  ;;  %v3197_v48 = vld [vmem:[%s4484_s3 + $0x84] ss:$8 sps:$4 sm:$0xff]  }
 0x12d   : > { %1250 = vmatmul.mubr.bf16.gmra.mrb[4].mxu1 %v1009_v49 }
 0x12e   : > { %1449 = vmatpush1.bf16.msra.mxu1 %v3171_v47  ;;  %v1003_v0 = vsel %vm830_vm6, %v2871_v63, %v2876_v59  ;;  %v1004_v1 = vsel %vm830_vm6, %v2872_v62, %v2877_v58 }
 0x12f   : > { %2253 = vmatpush1.bf16.msra.mxu0 %v3174_v54  ;;  %v2885_v4 = vpop.permute.xlu1 %2884  ;;  %1450 = vmatprep.subr.bf16.mxu1 %v3179_v55  ;;  %v1012_v7 = vpack.c.bf16 %v1004_v1, %v1003_v0  ;;  %v3195_v55 = vld [vmem:[%s4484_s3 + $0x80] ss:$8 sps:$4 sm:$0xff]  }
 0x130   : > { %2254 = vmatprep.subr.bf16.mxu0 %v3182_v40  ;;  %v2887_v18 = vunpack.i.h.bf16 %v2885_v4  ;;  %v2886_v19 = vunpack.i.l.bf16 %v2885_v4  ;;  %v3198_v40 = vld [vmem:[%s4484_s3 + $0x390] ss:$8 sps:$4 sm:$0xff]  }
 0x131   : > { %1259 = vmatprep.mubr.bf16.mxu1 %v1012_v7 }
 0x132   : > { %1451 = vmatpush1.bf16.msra.mxu1 %v3177_v41  ;;  %v3203_v41 = vld [vmem:[%s4484_s3 + $0x94] ss:$8 sps:$4 sm:$0xff]  }
 0x133   : > { %2255 = vmatpush1.bf16.msra.mxu0 %v3180_v13  ;;  %v2895_v24 = vpop.permute.xlu1 %2894  ;;  %v2880_v25 = vpop.permute.xlu0 %2879  ;;  %1452 = vmatprep.subr.bf16.mxu1 %v3185_v15 }
 0x134   : > { %v2897_v31 = vunpack.i.h.bf16 %v2895_v24  ;;  %v2896_v33 = vunpack.i.l.bf16 %v2895_v24  ;;  %v2882_v34 = vunpack.i.h.bf16 %v2880_v25  ;;  %v2881_v37 = vunpack.i.l.bf16 %v2880_v25  ;;  %2256 = vmatprep.subr.bf16.mxu0 %v3188_v16  ;;  %v3212_v24 = vld [vmem:[%s4484_s3 + $0x3b4] ss:$8 sps:$4 sm:$0xff]   ;;  %v3207_v25 = vld [vmem:[%s4484_s3 + $0xa0] ss:$8 sps:$4 sm:$0xff]  }
 0x136   : > { %1453 = vmatpush1.bf16.msra.mxu1 %v3183_v17  ;;  %v1629_v44 = vsel %vm830_vm6, %v2881_v37, %v2886_v19  ;;  %v1630_v45 = vsel %vm830_vm6, %v2882_v34, %v2887_v18  ;;  %v1621_v46 = vsel %vm830_vm6, %v4021_v8, %v2896_v33  ;;  %v1622_v50 = vsel %vm830_vm6, %v4023_v9, %v2897_v31  ;;  %v3200_v8 = vld [vmem:[%s4484_s3 + $0x394] ss:$8 sps:$4 sm:$0xff]   ;;  %v3204_v18 = vld [vmem:[%s4484_s3 + $0x3a0] ss:$8 sps:$4 sm:$0xff]   ;;  %v3209_v19 = vld [vmem:[%s4484_s3 + $0xa4] ss:$8 sps:$4 sm:$0xff]  }
 0x137   : > { %2257 = vmatpush1.bf16.msra.mxu0 %v3186_v32  ;;  %v2890_v51 = vpop.permute.xlu0 %2889  ;;  %1454 = vmatprep.subr.bf16.mxu1 %v3191_v30  ;;  %v1638_v47 = vpack.c.bf16 %v1630_v45, %v1629_v44  ;;  %v1637_v14 = vpack.c.bf16 %v1622_v50, %v1621_v46  ;;  %v2905_v9 = vpop.permute.xlu1 %2904  ;;  %v3210_v34 = vld [vmem:[%s4484_s3 + $0x3b0] ss:$8 sps:$4 sm:$0xff]   ;;  %v3215_v37 = vld [vmem:[%s4484_s3 + $0xb4] ss:$8 sps:$4 sm:$0xff]   ;;  %v3218_v46 = vld [vmem:[%s4484_s3 + $0x3c4] ss:$8 sps:$4 sm:$0xff]  }
 0x138   : > { %v2892_v49 = vunpack.i.h.bf16 %v2890_v51  ;;  %v2891_v54 = vunpack.i.l.bf16 %v2890_v51  ;;  %2258 = vmatprep.subr.bf16.mxu0 %v3194_v38  ;;  %v2907_v0 = vunpack.i.h.bf16 %v2905_v9  ;;  %v2906_v1 = vunpack.i.l.bf16 %v2905_v9  ;;  %v3213_v50 = vld [vmem:[%s4484_s3 + $0xb0] ss:$8 sps:$4 sm:$0xff]  }
 0x139   : > { %1885 = vmatprep.mubr.bf16.mxu0 %v1638_v47 }
 0x13a   : > { %1455 = vmatpush1.bf16.msra.mxu1 %v3189_v39  ;;  %1886 = vmatmul.mubr.bf16.gmra.mrb[8].mxu0 %v1637_v14  ;;  %v995_v58 = vsel %vm830_vm6, %v4009_v60, %v2891_v54  ;;  %v996_v59 = vsel %vm830_vm6, %v4011_v61, %v2892_v49  ;;  %v3206_v60 = vld [vmem:[%s4484_s3 + $0x3a4] ss:$8 sps:$4 sm:$0xff]   ;;  %v3201_v61 = vld [vmem:[%s4484_s3 + $0x90] ss:$8 sps:$4 sm:$0xff]  }
 0x13b   : > { %2259 = vmatpush1.bf16.msra.mxu0 %v3192_v11  ;;  %v2900_v62 = vpop.permute.xlu0 %2899  ;;  %1456 = vmatprep.subr.bf16.mxu1 %v3197_v48  ;;  %v1011_v63 = vpack.c.bf16 %v996_v59, %v995_v58 }
 0x13c   : > { %v2902_v4 = vunpack.i.h.bf16 %v2900_v62  ;;  %v2901_v7 = vunpack.i.l.bf16 %v2900_v62  ;;  %2260 = vmatprep.subr.bf16.mxu0 %v3200_v8  ;;  %v3216_v8 = vld [vmem:[%s4484_s3 + $0x3c0] ss:$8 sps:$4 sm:$0xff]  }
 0x13d   : > { %1260 = vmatmul.mubr.bf16.gmra.mrb[8].mxu1 %v1011_v63 }
 0x13e   : > { %1457 = vmatpush1.bf16.msra.mxu1 %v3195_v55  ;;  %v1005_v13 = vsel %vm830_vm6, %v2901_v7, %v2906_v1  ;;  %v1006_v15 = vsel %vm830_vm6, %v2902_v4, %v2907_v0  ;;  %v3221_v55 = vld [vmem:[%s4484_s3 + $0xc4] ss:$8 sps:$4 sm:$0xff]   ;;  %v3222_v1 = vld [vmem:[%s4484_s3 + $0x3d0] ss:$8 sps:$4 sm:$0xff]   ;;  %v3227_v4 = vld [vmem:[%s4484_s3 + $0xd4] ss:$8 sps:$4 sm:$0xff]  }
 0x13f   : > { %2261 = vmatpush1.bf16.msra.mxu0 %v3198_v40  ;;  %v2915_v16 = vpop.permute.xlu1 %2914  ;;  %1458 = vmatprep.subr.bf16.mxu1 %v3203_v41  ;;  %v1014_v17 = vpack.c.bf16 %v1006_v15, %v1005_v13  ;;  %v3225_v13 = vld [vmem:[%s4484_s3 + $0xd0] ss:$8 sps:$4 sm:$0xff]  }
 0x140   : > { %2262 = vmatprep.subr.bf16.mxu0 %v3206_v60  ;;  %v2917_v32 = vunpack.i.h.bf16 %v2915_v16  ;;  %v2916_v30 = vunpack.i.l.bf16 %v2915_v16 }
 0x141   : > { %1269 = vmatprep.mubr.bf16.mxu1 %v1014_v17 }
 0x142   : > { %1459 = vmatpush1.bf16.msra.mxu1 %v3201_v61 }
 0x143   : > { %2263 = vmatpush1.bf16.msra.mxu0 %v3204_v18  ;;  %v2925_v31 = vpop.permute.xlu1 %2924  ;;  %v2910_v33 = vpop.permute.xlu0 %2909  ;;  %1460 = vmatprep.subr.bf16.mxu1 %v3209_v19 }
 0x144   : > { %v2927_v38 = vunpack.i.h.bf16 %v2925_v31  ;;  %v2926_v39 = vunpack.i.l.bf16 %v2925_v31  ;;  %v2912_v44 = vunpack.i.h.bf16 %v2910_v33  ;;  %v2911_v45 = vunpack.i.l.bf16 %v2910_v33  ;;  %2264 = vmatprep.subr.bf16.mxu0 %v3212_v24 }
 0x146   : > { %1461 = vmatpush1.bf16.msra.mxu1 %v3207_v25  ;;  %v1631_v51 = vsel %vm830_vm6, %v2911_v45, %v2916_v30  ;;  %v1632_v47 = vsel %vm830_vm6, %v2912_v44, %v2917_v32  ;;  %v1623_v11 = vsel %vm830_vm6, %v4045_v26, %v2926_v39  ;;  %v1624_v14 = vsel %vm830_vm6, %v4047_v27, %v2927_v38  ;;  %v3224_v26 = vld [vmem:[%s4484_s3 + $0x3d4] ss:$8 sps:$4 sm:$0xff]   ;;  %v3219_v27 = vld [vmem:[%s4484_s3 + $0xc0] ss:$8 sps:$4 sm:$0xff]   ;;  %v3233_v30 = vld [vmem:[%s4484_s3 + $0xe4] ss:$8 sps:$4 sm:$0xff]  }
 0x147   : > { %2265 = vmatpush1.bf16.msra.mxu0 %v3210_v34  ;;  %v2935_v48 = vpop.permute.xlu1 %2934  ;;  %v2920_v49 = vpop.permute.xlu0 %2919  ;;  %1462 = vmatprep.subr.bf16.mxu1 %v3215_v37  ;;  %v1640_v54 = vpack.c.bf16 %v1632_v47, %v1631_v51  ;;  %v1639_v9 = vpack.c.bf16 %v1624_v14, %v1623_v11  ;;  %v3228_v32 = vld [vmem:[%s4484_s3 + $0x3e0] ss:$8 sps:$4 sm:$0xff]   ;;  %v3236_v38 = vld [vmem:[%s4484_s3 + $0x3f4] ss:$8 sps:$4 sm:$0xff]   ;;  %v3234_v51 = vld [vmem:[%s4484_s3 + $0x3f0] ss:$8 sps:$4 sm:$0xff]  }
 0x148   : > { %v2922_v58 = vunpack.i.h.bf16 %v2920_v49  ;;  %v2921_v59 = vunpack.i.l.bf16 %v2920_v49  ;;  %2266 = vmatprep.subr.bf16.mxu0 %v3218_v46  ;;  %v2937_v7 = vunpack.i.h.bf16 %v2935_v48  ;;  %v2936_v60 = vunpack.i.l.bf16 %v2935_v48  ;;  %v3231_v39 = vld [vmem:[%s4484_s3 + $0xe0] ss:$8 sps:$4 sm:$0xff]   ;;  %v3239_v11 = vld [vmem:[%s4484_s3 + $0xf4] ss:$8 sps:$4 sm:$0xff]  }
 0x149   : > { %1895 = vmatprep.mubr.bf16.mxu0 %v1640_v54 }
 0x14a   : > { %1463 = vmatpush1.bf16.msra.mxu1 %v3213_v50  ;;  %1896 = vmatmul.mubr.bf16.gmra.mrb[12].mxu0 %v1639_v9  ;;  %v997_v62 = vsel %vm830_vm6, %v4035_v20, %v2921_v59  ;;  %v998_v63 = vsel %vm830_vm6, %v4037_v21, %v2922_v58  ;;  %v3230_v21 = vld [vmem:[%s4484_s3 + $0x3e4] ss:$8 sps:$4 sm:$0xff]  }
 0x14b   : > { %2267 = vmatpush1.bf16.msra.mxu0 %v3216_v8  ;;  %v2945_v40 = vpop.permute.xlu1 %2944  ;;  %v2930_v41 = vpop.permute.xlu0 %2929  ;;  %1464 = vmatprep.subr.bf16.mxu1 %v3221_v55  ;;  %v1013_v0 = vpack.c.bf16 %v998_v63, %v997_v62  ;;  %v3237_v8 = vld [vmem:[%s4484_s3 + $0xf0] ss:$8 sps:$4 sm:$0xff]  }
 0x14c   : > { %v2932_v61 = vunpack.i.h.bf16 %v2930_v41  ;;  %v2931_v20 = vunpack.i.l.bf16 %v2930_v41  ;;  %2268 = vmatprep.subr.bf16.mxu0 %v3224_v26  ;;  %v2947_v17 = vunpack.i.h.bf16 %v2945_v40  ;;  %v2946_v18 = vunpack.i.l.bf16 %v2945_v40 }
 0x14d   : > { %1270 = vmatmul.mubr.bf16.gmra.mrb[12].mxu1 %v1013_v0 }
 0x14e   : > { %1465 = vmatpush1.bf16.msra.mxu1 %v3219_v27  ;;  %v839_v15 = vsel %vm830_vm6, %v2931_v20, %v2936_v60  ;;  %v840_v16 = vsel %vm830_vm6, %v2932_v61, %v2937_v7 }
 0x14f   : > { %2269 = vmatpush1.bf16.msra.mxu0 %v3222_v1  ;;  %v2955_v19 = vpop.permute.xlu1 %2954  ;;  %v2940_v24 = vpop.permute.xlu0 %2939  ;;  %1466 = vmatprep.subr.bf16.mxu1 %v3227_v4  ;;  %v848_v25 = vpack.c.bf16 %v840_v16, %v839_v15 }
 0x150   : > { %v2957_v31 = vunpack.i.h.bf16 %v2955_v19  ;;  %v2956_v33 = vunpack.i.l.bf16 %v2955_v19  ;;  %v2942_v34 = vunpack.i.h.bf16 %v2940_v24  ;;  %v2941_v37 = vunpack.i.l.bf16 %v2940_v24  ;;  %2270 = vmatprep.subr.bf16.mxu0 %v3230_v21 }
 0x151   : > { %1472 = vmatprep.mubr.bf16.mxu1 %v848_v25 }
 0x152   : > { %1467 = vmatpush1.bf16.msra.mxu1 %v3225_v13  ;;  %v2034_v44 = vsel %vm830_vm6, %v2941_v37, %v2946_v18  ;;  %v2035_v45 = vsel %vm830_vm6, %v2942_v34, %v2947_v17  ;;  %v2027_v14 = vsel %vm830_vm6, %v4061_v42, %v2957_v31  ;;  %v2026_v48 = vsel %vm830_vm6, %v4065_v43, %v2956_v33 }
 0x153   : > { %2271 = vmatpush1.bf16.msra.mxu0 %v3228_v32  ;;  %v2965_v46 = vpop.permute.xlu1 %2964  ;;  %v2950_v50 = vpop.permute.xlu0 %2949  ;;  %1468 = vmatprep.subr.bf16.mxu1 %v3233_v30  ;;  %v2043_v47 = vpack.c.bf16 %v2035_v45, %v2034_v44  ;;  %v2042_v9 = vpack.c.bf16 %v2027_v14, %v2026_v48 }
 0x154   : > { %v2952_v49 = vunpack.i.h.bf16 %v2950_v50  ;;  %v2951_v54 = vunpack.i.l.bf16 %v2950_v50  ;;  %2272 = vmatprep.subr.bf16.mxu0 %v3236_v38  ;;  %v2967_v55 = vunpack.i.h.bf16 %v2965_v46  ;;  %v2966_v58 = vunpack.i.l.bf16 %v2965_v46 }
 0x155   : > { %2274 = vmatprep.mubr.bf16.mxu0 %v2043_v47 }
 0x156   : > { %1469 = vmatpush1.bf16.msra.mxu1 %v3231_v39  ;;  %v832_v42 = vsel %vm830_vm6, %v4055_v36, %v2952_v49  ;;  %v831_v43 = vsel %vm830_vm6, %v4053_v35, %v2951_v54 }
 0x157   : > { %2273 = vmatpush1.bf16.msra.mxu0 %v3234_v51  ;;  %v2975_v59 = vpop.permute.xlu1 %2974  ;;  %v2960_v26 = vpop.permute.xlu0 %2959  ;;  %1470 = vmatprep.subr.bf16.mxu1 %v3239_v11  ;;  %v847_v41 = vpack.c.bf16 %v832_v42, %v831_v43 }
 0x158   : > { %v2962_v27 = vunpack.i.h.bf16 %v2960_v26  ;;  %v2961_v62 = vunpack.i.l.bf16 %v2960_v26  ;;  %v2977_v0 = vunpack.i.h.bf16 %v2975_v59  ;;  %v2976_v1 = vunpack.i.l.bf16 %v2975_v59 }
 0x15a   : > { %1471 = vmatpush1.bf16.msra.mxu1 %v3237_v8  ;;  %2275 = vmatmul.mubr.bf16.vlgmr.msra.gmra.mrb[0].mxu0 %v2042_v9  ;;  %v841_v63 = vsel %vm830_vm6, %v2961_v62, %v2966_v58  ;;  %v842_v40 = vsel %vm830_vm6, %v2962_v27, %v2967_v55 }
 0x15b   : > { %v2985_v4 = vpop.permute.xlu1 %2984  ;;  %v2970_v7 = vpop.permute.xlu0 %2969  ;;  %v850_v60 = vpack.c.bf16 %v842_v40, %v841_v63 }
 0x15c   : > { %v2987_v61 = vunpack.i.h.bf16 %v2985_v4  ;;  %v2986_v20 = vunpack.i.l.bf16 %v2985_v4  ;;  %v2972_v36 = vunpack.i.h.bf16 %v2970_v7  ;;  %v2971_v21 = vunpack.i.l.bf16 %v2970_v7 }
 0x15d   : > { %1473 = vmatmul.mubr.bf16.vlgmr.msra.gmra.mrb[0].mxu1 %v847_v41 }
 0x15e   : > { %1482 = vmatprep.mubr.bf16.mxu1 %v850_v60  ;;  %v2036_v35 = vsel %vm830_vm6, %v2971_v21, %v2976_v1  ;;  %v2037_v13 = vsel %vm830_vm6, %v2972_v36, %v2977_v0  ;;  %v2028_v15 = vsel %vm830_vm6, %v4079_v56, %v2986_v20  ;;  %v2029_v16 = vsel %vm830_vm6, %v4081_v57, %v2987_v61 }
 0x15f   : > { %v2995_v17 = vpop.permute.xlu1 %2994  ;;  %v2980_v18 = vpop.permute.xlu0 %2979  ;;  %v2045_v19 = vpack.c.bf16 %v2037_v13, %v2036_v35  ;;  %v2044_v24 = vpack.c.bf16 %v2029_v16, %v2028_v15 }
 0x160   : > { %v2982_v25 = vunpack.i.h.bf16 %v2980_v18  ;;  %v2981_v32 = vunpack.i.l.bf16 %v2980_v18  ;;  %v2997_v37 = vunpack.i.h.bf16 %v2995_v17  ;;  %v2996_v38 = vunpack.i.l.bf16 %v2995_v17 }
 0x161   : > { %2284 = vmatprep.mubr.bf16.mxu0 %v2045_v19 }
 0x162   : > { %2285 = vmatmul.mubr.bf16.gmra.mrb[4].mxu0 %v2044_v24  ;;  %v833_v30 = vsel %vm830_vm6, %v4071_v52, %v2981_v32  ;;  %v834_v31 = vsel %vm830_vm6, %v4073_v53, %v2982_v25 }
 0x163   : > { %v3005_v33 = vpop.permute.xlu1 %3004  ;;  %v2990_v34 = vpop.permute.xlu0 %2989  ;;  %v849_v56 = vpack.c.bf16 %v834_v31, %v833_v30 }
 0x164   : > { %v2992_v57 = vunpack.i.h.bf16 %v2990_v34  ;;  %v2991_v39 = vunpack.i.l.bf16 %v2990_v34  ;;  %v3007_v46 = vunpack.i.h.bf16 %v3005_v33  ;;  %v3006_v50 = vunpack.i.l.bf16 %v3005_v33 }
 0x165   : > { %1483 = vmatmul.mubr.bf16.gmra.mrb[4].mxu1 %v849_v56 }
 0x166   : > { %v843_v44 = vsel %vm830_vm6, %v2991_v39, %v2996_v38  ;;  %v844_v45 = vsel %vm830_vm6, %v2992_v57, %v2997_v37 }
 0x167   : > { %v3015_v51 = vpop.permute.xlu1 %3014  ;;  %v3000_v47 = vpop.permute.xlu0 %2999  ;;  %v852_v52 = vpack.c.bf16 %v844_v45, %v843_v44  ;;  %v4418_v45 = vstv %s2359_s23 }
 0x168   : > { %v3017_v11 = vunpack.i.h.bf16 %v3015_v51  ;;  %v3016_v14 = vunpack.i.l.bf16 %v3015_v51  ;;  %v3002_v53 = vunpack.i.h.bf16 %v3000_v47  ;;  %v3001_v48 = vunpack.i.l.bf16 %v3000_v47 }
 0x169   : > { %1492 = vmatprep.mubr.bf16.mxu1 %v852_v52 }
 0x16a   : > { %v2038_v49 = vsel %vm830_vm6, %v3001_v48, %v3006_v50  ;;  %v2039_v54 = vsel %vm830_vm6, %v3002_v53, %v3007_v46  ;;  %v2030_v8 = vsel %vm830_vm6, %v4097_v10, %v3016_v14  ;;  %v2031_v9 = vsel %vm830_vm6, %v4099_v12, %v3017_v11 }
 0x16b   : > { %v3025_v55 = vpop.permute.xlu1 %3024  ;;  %v3010_v58 = vpop.permute.xlu0 %3009  ;;  %v2047_v59 = vpack.c.bf16 %v2039_v54, %v2038_v49  ;;  %v2046_v26 = vpack.c.bf16 %v2031_v9, %v2030_v8 }
 0x16c   : > { %v3012_v42 = vunpack.i.h.bf16 %v3010_v58  ;;  %v3011_v43 = vunpack.i.l.bf16 %v3010_v58  ;;  %v3027_v41 = vunpack.i.h.bf16 %v3025_v55  ;;  %v3026_v0 = vunpack.i.l.bf16 %v3025_v55 }
 0x16d   : > { %2294 = vmatprep.mubr.bf16.mxu0 %v2047_v59 }
 0x16e   : > { %2295 = vmatmul.mubr.bf16.gmra.mrb[8].mxu0 %v2046_v26  ;;  %v835_v27 = vsel %vm830_vm6, %v4089_v2, %v3011_v43  ;;  %v836_v62 = vsel %vm830_vm6, %v4091_v3, %v3012_v42 }
 0x16f   : > { %v3035_v63 = vpop.permute.xlu1 %3034  ;;  %v3020_v40 = vpop.permute.xlu0 %3019  ;;  %v851_v10 = vpack.c.bf16 %v836_v62, %v835_v27 }
 0x170   : > { %v3022_v12 = vunpack.i.h.bf16 %v3020_v40  ;;  %v3021_v1 = vunpack.i.l.bf16 %v3020_v40  ;;  %v3037_v60 = vunpack.i.h.bf16 %v3035_v63  ;;  %v3036_v61 = vunpack.i.l.bf16 %v3035_v63 }
 0x171   : > { %1493 = vmatmul.mubr.bf16.gmra.mrb[8].mxu1 %v851_v10 }
 0x172   : > { %v845_v4 = vsel %vm830_vm6, %v3021_v1, %v3026_v0  ;;  %v846_v7 = vsel %vm830_vm6, %v3022_v12, %v3027_v41 }
 0x173   : > { %v3045_v20 = vpop.permute.xlu1 %3044  ;;  %v3030_v36 = vpop.permute.xlu0 %3029  ;;  %v854_v2 = vpack.c.bf16 %v846_v7, %v845_v4 }
 0x174   : > { %v3047_v21 = vunpack.i.h.bf16 %v3045_v20  ;;  %v3046_v35 = vunpack.i.l.bf16 %v3045_v20  ;;  %v3032_v3 = vunpack.i.h.bf16 %v3030_v36  ;;  %v3031_v13 = vunpack.i.l.bf16 %v3030_v36 }
 0x175   : > { %1502 = vmatprep.mubr.bf16.mxu1 %v854_v2 }
 0x176   : > { %v2040_v15 = vsel %vm830_vm6, %v3031_v13, %v3036_v61  ;;  %v2041_v16 = vsel %vm830_vm6, %v3032_v3, %v3037_v60  ;;  %v2032_v17 = vsel %vm830_vm6, %v4115_v28, %v3046_v35  ;;  %v2033_v18 = vsel %vm830_vm6, %v4117_v29, %v3047_v21  ;;  %v2331_v28 = vld [vmem:[%s4485_s4] sm:$0x3] }
 0x177   : > { %v3040_v19 = vpop.permute.xlu0 %3039  ;;  %v2049_v24 = vpack.c.bf16 %v2041_v16, %v2040_v15  ;;  %v2048_v25 = vpack.c.bf16 %v2033_v18, %v2032_v17  ;;  %v4412_v38 = vrot.slane %v2331_v28, %v3525_v5 }
 0x178   : > { %v3042_v32 = vunpack.i.h.bf16 %v3040_v19  ;;  %v3041_v30 = vunpack.i.l.bf16 %v3040_v19 }
 0x179   : > { %2304 = vmatprep.mubr.bf16.mxu0 %v2049_v24 }
 0x17a   : > { %2305 = vmatmul.mubr.bf16.gmra.mrb[12].mxu0 %v2048_v25  ;;  %v837_v31 = vsel %vm830_vm6, %v4107_v22, %v3041_v30  ;;  %v838_v33 = vsel %vm830_vm6, %v4109_v23, %v3042_v32  ;;  %v4415_v22 = vrot.slane %v2331_v28, %v3657_v6 }
 0x17b   : > { %v853_v34 = vpack.c.bf16 %v838_v33, %v837_v31 }
 0x17d   : > { %1503 = vmatmul.mubr.bf16.gmra.mrb[12].mxu1 %v853_v34 }
 0x22d   : > { %v2276_v29 = vpop.f32.mrb[0].mxu0 }
 0x22e   : > { %v2278_v56 = vpop.f32.mrb[1].mxu0 }
 0x22f   : > { %v2280_v37 = vpop.f32.mrb[2].mxu0 }
 0x230   : > { %v1474_v57 = vpop.f32.mrb[0].mxu1  ;;  %v2282_v39 = vpop.f32.mrb[3].mxu0 }
 0x231   : > { %v2746_v44 = vadd.f32 %v2276_v29, %v1474_v57  ;;  %v1476_v23 = vpop.f32.mrb[1].mxu1 }
 0x232   : > { %v2747_v46 = vadd.f32 %v2278_v56, %v1476_v23  ;;  %v1478_v50 = vpop.f32.mrb[2].mxu1 }
 0x233   : > { %v2343_v51 = vadd.f32 %v2746_v44, %v4412_v38  ;;  %v2748_v47 = vadd.f32 %v2280_v37, %v1478_v50  ;;  %v1480_v52 = vpop.f32.mrb[3].mxu1 }
 0x234   : > { %v2344_v11 = vadd.f32 %v2747_v46, %v4415_v22  ;;  %v2749_v5 = vadd.f32 %v2282_v39, %v1480_v52 }
 0x235   : > { %vm2360_vm7 = vcmp.gt.f32.partialorder %v2343_v51, 0.0  ;;  %v2377_v6 = vmul.f32 %v4418_v45, %v2343_v51  ;;  %v2345_v14 = vadd.f32 %v2748_v47, %v4412_v38  ;;  %v2286_v53 = vpop.f32.mrb[4].mxu0 }
 0x236   : > { %vm2361_vm8 = vcmp.gt.f32.partialorder %v2344_v11, 0.0  ;;  %v2378_v48 = vmul.f32 %v4418_v45, %v2344_v11  ;;  %v2346_v49 = vadd.f32 %v2749_v5, %v4415_v22  ;;  %v2288_v54 = vpop.f32.mrb[5].mxu0 }
 0x237   : > { %v2393_v8 = vsel %vm2360_vm7, %v2343_v51, %v2377_v6  ;;  %vm2362_vm9 = vcmp.gt.f32.partialorder %v2345_v14, 0.0  ;;  %v2379_v9 = vmul.f32 %v4418_v45, %v2345_v14  ;;  %v2290_v55 = vpop.f32.mrb[6].mxu0  ;;  %vm2477_vm7 = vcmask 1040384  }
 0x238   : > { %2492 = vst [vmem:[%s4425_s8] sm:$0xff] %v2393_v8  ;;  %v2394_v58 = vsel %vm2361_vm8, %v2344_v11, %v2378_v48  ;;  %vm2363_vm10 = vcmp.gt.f32.partialorder %v2346_v49, 0.0  ;;  %v2380_v59 = vmul.f32 %v4418_v45, %v2346_v49  ;;  %v1484_v26 = vpop.f32.mrb[4].mxu1  ;;  %v2292_v42 = vpop.f32.mrb[7].mxu0  ;;  %v2435_v43 = vmul.f32 %v2393_v8, %v2393_v8 }
 0x239   : > { %v2436_v27 = vmul.f32 %v2394_v58, %v2394_v58  ;;  %2493 = vst [vmem:[%s4425_s8 + $0x8] sm:$0xff] %v2394_v58  ;;  %v2395_v62 = vsel %vm2362_vm9, %v2345_v14, %v2379_v9  ;;  %v2750_v63 = vadd.f32 %v2286_v53, %v1484_v26  ;;  %v1486_v40 = vpop.f32.mrb[5].mxu1 }
 0x23a   : > { %v2409_v10 = vadd.f32 %v2395_v62, %v2393_v8  ;;  %v2437_v41 = vmul.f32 %v2395_v62, %v2395_v62  ;;  %2494 = vst [vmem:[%s4425_s8 + $0x10] sm:$0xff] %v2395_v62  ;;  %v2396_v0 = vsel %vm2363_vm10, %v2346_v49, %v2380_v59  ;;  %v2751_v12 = vadd.f32 %v2288_v54, %v1486_v40  ;;  %v1488_v1 = vpop.f32.mrb[6].mxu1 }
 0x23b   : > { %v2422_v4 = vadd.f32 %v2396_v0, %v2394_v58  ;;  %v2438_v7 = vmul.f32 %v2396_v0, %v2396_v0  ;;  %2495 = vst [vmem:[%s4425_s8 + $0x18] sm:$0xff] %v2396_v0  ;;  %v2347_v60 = vadd.f32 %v2750_v63, %v4412_v38  ;;  %v2752_v61 = vadd.f32 %v2290_v55, %v1488_v1  ;;  %v1490_v20 = vpop.f32.mrb[7].mxu1 }
 0x23c   : > { %v2451_v36 = vadd.f32 %v2437_v41, %v2435_v43  ;;  %v2348_v2 = vadd.f32 %v2751_v12, %v4415_v22  ;;  %v2753_v21 = vadd.f32 %v2292_v42, %v1490_v20 }
 0x23d   : > { %v2464_v35 = vadd.f32 %v2438_v7, %v2436_v27  ;;  %vm2364_vm11 = vcmp.gt.f32.partialorder %v2347_v60, 0.0  ;;  %v2381_v3 = vmul.f32 %v4418_v45, %v2347_v60  ;;  %v2349_v13 = vadd.f32 %v2752_v61, %v4412_v38 }
 0x23e   : > { %vm2365_vm12 = vcmp.gt.f32.partialorder %v2348_v2, 0.0  ;;  %v2382_v15 = vmul.f32 %v4418_v45, %v2348_v2  ;;  %v2350_v16 = vadd.f32 %v2753_v21, %v4415_v22 }
 0x23f   : > { %v2397_v17 = vsel %vm2364_vm11, %v2347_v60, %v2381_v3  ;;  %vm2366_vm13 = vcmp.gt.f32.partialorder %v2349_v13, 0.0  ;;  %v2383_v18 = vmul.f32 %v4418_v45, %v2349_v13 }
 0x240   : > { %v2410_v19 = vadd.f32 %v2409_v10, %v2397_v17  ;;  %v2439_v24 = vmul.f32 %v2397_v17, %v2397_v17  ;;  %2496 = vst [vmem:[%s4425_s8 + $0x20] sm:$0xff] %v2397_v17  ;;  %v2398_v25 = vsel %vm2365_vm12, %v2348_v2, %v2382_v15  ;;  %vm2367_vm14 = vcmp.gt.f32.partialorder %v2350_v16, 0.0 }
 0x241   : > { %v2423_v32 = vadd.f32 %v2422_v4, %v2398_v25  ;;  %v2440_v30 = vmul.f32 %v2398_v25, %v2398_v25  ;;  %2497 = vst [vmem:[%s4425_s8 + $0x28] sm:$0xff] %v2398_v25  ;;  %v2399_v31 = vsel %vm2366_vm13, %v2349_v13, %v2383_v18  ;;  %v2384_v33 = vmul.f32 %v4418_v45, %v2350_v16  ;;  %v2296_v34 = vpop.f32.mrb[8].mxu0 }
 0x242   : > { %v2452_v28 = vadd.f32 %v2451_v36, %v2439_v24  ;;  %v2411_v29 = vadd.f32 %v2410_v19, %v2399_v31  ;;  %v2441_v56 = vmul.f32 %v2399_v31, %v2399_v31  ;;  %2498 = vst [vmem:[%s4425_s8 + $0x30] sm:$0xff] %v2399_v31  ;;  %v2298_v37 = vpop.f32.mrb[9].mxu0 }
 0x243   : > { %v2465_v57 = vadd.f32 %v2464_v35, %v2440_v30  ;;  %v2400_v39 = vsel %vm2367_vm14, %v2350_v16, %v2384_v33  ;;  %v2300_v44 = vpop.f32.mrb[10].mxu0 }
 0x244   : > { %v2453_v23 = vadd.f32 %v2452_v28, %v2441_v56  ;;  %v2424_v46 = vadd.f32 %v2423_v32, %v2400_v39  ;;  %v2442_v50 = vmul.f32 %v2400_v39, %v2400_v39  ;;  %2499 = vst [vmem:[%s4425_s8 + $0x38] sm:$0xff] %v2400_v39  ;;  %v1494_v51 = vpop.f32.mrb[8].mxu1  ;;  %v2302_v47 = vpop.f32.mrb[11].mxu0 }
 0x245   : > { %v2754_v52 = vadd.f32 %v2296_v34, %v1494_v51  ;;  %v1496_v11 = vpop.f32.mrb[9].mxu1 }
 0x246   : > { %v2466_v5 = vadd.f32 %v2465_v57, %v2442_v50  ;;  %v2755_v6 = vadd.f32 %v2298_v37, %v1496_v11  ;;  %v1498_v14 = vpop.f32.mrb[10].mxu1 }
 0x247   : > { %v2351_v53 = vadd.f32 %v2754_v52, %v4412_v38  ;;  %v2756_v48 = vadd.f32 %v2300_v44, %v1498_v14  ;;  %v1500_v49 = vpop.f32.mrb[11].mxu1 }
 0x248   : > { %v2352_v54 = vadd.f32 %v2755_v6, %v4415_v22  ;;  %v2757_v8 = vadd.f32 %v2302_v47, %v1500_v49 }
 0x249   : > { %vm2368_vm15 = vcmp.gt.f32.partialorder %v2351_v53, 0.0  ;;  %v2385_v9 = vmul.f32 %v4418_v45, %v2351_v53  ;;  %v2353_v55 = vadd.f32 %v2756_v48, %v4412_v38 }
 0x24a   : > { %vm2369_vm0 = vcmp.gt.f32.partialorder %v2352_v54, 0.0  ;;  %v2386_v58 = vmul.f32 %v4418_v45, %v2352_v54  ;;  %v2354_v59 = vadd.f32 %v2757_v8, %v4415_v22 }
 0x24b   : > { %v2401_v26 = vsel %vm2368_vm15, %v2351_v53, %v2385_v9  ;;  %vm2370_vm1 = vcmp.gt.f32.partialorder %v2353_v55, 0.0  ;;  %v2387_v42 = vmul.f32 %v4418_v45, %v2353_v55 }
 0x24c   : > { %v2412_v43 = vadd.f32 %v2411_v29, %v2401_v26  ;;  %v2443_v27 = vmul.f32 %v2401_v26, %v2401_v26  ;;  %2500 = vst [vmem:[%s4425_s8 + $0x40] sm:$0xff] %v2401_v26  ;;  %v2402_v62 = vsel %vm2369_vm0, %v2352_v54, %v2386_v58  ;;  %vm2371_vm2 = vcmp.gt.f32.partialorder %v2354_v59, 0.0 }
 0x24d   : > { %v2425_v63 = vadd.f32 %v2424_v46, %v2402_v62  ;;  %v2444_v40 = vmul.f32 %v2402_v62, %v2402_v62  ;;  %2501 = vst [vmem:[%s4425_s8 + $0x48] sm:$0xff] %v2402_v62  ;;  %v2403_v10 = vsel %vm2370_vm1, %v2353_v55, %v2387_v42  ;;  %v2388_v41 = vmul.f32 %v4418_v45, %v2354_v59  ;;  %v2306_v0 = vpop.f32.mrb[12].mxu0 }
 0x24e   : > { %v2454_v12 = vadd.f32 %v2453_v23, %v2443_v27  ;;  %v2413_v1 = vadd.f32 %v2412_v43, %v2403_v10  ;;  %v2445_v4 = vmul.f32 %v2403_v10, %v2403_v10  ;;  %2502 = vst [vmem:[%s4425_s8 + $0x50] sm:$0xff] %v2403_v10  ;;  %v2308_v7 = vpop.f32.mrb[13].mxu0 }
 0x24f   : > { %v2467_v60 = vadd.f32 %v2466_v5, %v2444_v40  ;;  %v2404_v61 = vsel %vm2371_vm2, %v2354_v59, %v2388_v41  ;;  %v2310_v20 = vpop.f32.mrb[14].mxu0 }
 0x250   : > { %v2455_v36 = vadd.f32 %v2454_v12, %v2445_v4  ;;  %v2426_v2 = vadd.f32 %v2425_v63, %v2404_v61  ;;  %v2446_v21 = vmul.f32 %v2404_v61, %v2404_v61  ;;  %2503 = vst [vmem:[%s4425_s8 + $0x58] sm:$0xff] %v2404_v61  ;;  %v1504_v35 = vpop.f32.mrb[12].mxu1  ;;  %v2312_v3 = vpop.f32.mrb[15].mxu0 }
 0x251   : > { %v2758_v13 = vadd.f32 %v2306_v0, %v1504_v35  ;;  %v1506_v15 = vpop.f32.mrb[13].mxu1 }
 0x252   : > { %v2468_v16 = vadd.f32 %v2467_v60, %v2446_v21  ;;  %v2759_v17 = vadd.f32 %v2308_v7, %v1506_v15  ;;  %v1508_v18 = vpop.f32.mrb[14].mxu1 }
 0x253   : > { %v2355_v19 = vadd.f32 %v2758_v13, %v4412_v38  ;;  %v2760_v24 = vadd.f32 %v2310_v20, %v1508_v18  ;;  %v1510_v25 = vpop.f32.mrb[15].mxu1 }
 0x254   : > { %v2356_v32 = vadd.f32 %v2759_v17, %v4415_v22  ;;  %v2761_v30 = vadd.f32 %v2312_v3, %v1510_v25 }
 0x255   : > { %vm2372_vm3 = vcmp.gt.f32.partialorder %v2355_v19, 0.0  ;;  %v2389_v31 = vmul.f32 %v4418_v45, %v2355_v19  ;;  %v2357_v33 = vadd.f32 %v2760_v24, %v4412_v38 }
 0x256   : > { %vm2373_vm4 = vcmp.gt.f32.partialorder %v2356_v32, 0.0  ;;  %v2390_v34 = vmul.f32 %v4418_v45, %v2356_v32  ;;  %v2358_v28 = vadd.f32 %v2761_v30, %v4415_v22 }
 0x257   : > { %v2405_v29 = vsel %vm2372_vm3, %v2355_v19, %v2389_v31  ;;  %vm2374_vm5 = vcmp.gt.f32.partialorder %v2357_v33, 0.0  ;;  %v2391_v56 = vmul.f32 %v4418_v45, %v2357_v33 }
 0x258   : > { %v2414_v37 = vadd.f32 %v2413_v1, %v2405_v29  ;;  %v2447_v57 = vmul.f32 %v2405_v29, %v2405_v29  ;;  %2504 = vst [vmem:[%s4425_s8 + $0x60] sm:$0xff] %v2405_v29  ;;  %v2406_v39 = vsel %vm2373_vm4, %v2356_v32, %v2390_v34  ;;  %vm2375_vm6 = vcmp.gt.f32.partialorder %v2358_v28, 0.0 }
 0x259   : > { %v2427_v44 = vadd.f32 %v2426_v2, %v2406_v39  ;;  %v2448_v23 = vmul.f32 %v2406_v39, %v2406_v39  ;;  %2505 = vst [vmem:[%s4425_s8 + $0x68] sm:$0xff] %v2406_v39  ;;  %v2407_v38 = vsel %vm2374_vm5, %v2357_v33, %v2391_v56  ;;  %v2392_v46 = vmul.f32 %v4418_v45, %v2358_v28 }
 0x25a   : > { %v2456_v50 = vadd.f32 %v2455_v36, %v2447_v57  ;;  %v2415_v51 = vadd.f32 %v2414_v37, %v2407_v38  ;;  %v2449_v22 = vmul.f32 %v2407_v38, %v2407_v38  ;;  %2506 = vst [vmem:[%s4425_s8 + $0x70] sm:$0xff] %v2407_v38 }
 0x25b   : > { %v2469_v47 = vadd.f32 %v2468_v16, %v2448_v23  ;;  %v2408_v52 = vsel %vm2375_vm6, %v2358_v28, %v2392_v46 }
 0x25c   : > { %v2416_v11 = vrot.slane %v2415_v51, 4  ;;  %v2457_v5 = vadd.f32 %v2456_v50, %v2449_v22  ;;  %v2428_v6 = vadd.f32 %v2427_v44, %v2408_v52  ;;  %v2450_v14 = vmul.f32 %v2408_v52, %v2408_v52  ;;  %2507 = vst [vmem:[%s4425_s8 + $0x78] sm:$0xff] %v2408_v52 }
 0x25e   : > { %v2417_v53 = vadd.f32 %v2416_v11, %v2415_v51  ;;  %v2458_v48 = vrot.slane %v2457_v5, 4  ;;  %v2429_v49 = vrot.slane %v2428_v6, 4  ;;  %v2470_v54 = vadd.f32 %v2469_v47, %v2450_v14 }
 0x260   : > { %v2418_v8 = vrot.slane %v2417_v53, 2  ;;  %v2459_v9 = vadd.f32 %v2458_v48, %v2457_v5  ;;  %v2430_v45 = vadd.f32 %v2429_v49, %v2428_v6  ;;  %v2471_v55 = vrot.slane %v2470_v54, 4 }
 0x262   : > { %v2419_v58 = vadd.f32 %v2418_v8, %v2417_v53  ;;  %v2460_v59 = vrot.slane %v2459_v9, 2  ;;  %v2431_v26 = vrot.slane %v2430_v45, 2  ;;  %v2472_v42 = vadd.f32 %v2471_v55, %v2470_v54 }
 0x264   : > { %v2420_v43 = vrot.slane %v2419_v58, 1  ;;  %v2461_v27 = vadd.f32 %v2460_v59, %v2459_v9  ;;  %v2432_v62 = vadd.f32 %v2431_v26, %v2430_v45  ;;  %v2473_v63 = vrot.slane %v2472_v42, 2 }
 0x266   : > { %v2462_v40 = vrot.slane %v2461_v27, 1  ;;  %v2433_v10 = vrot.slane %v2432_v62, 1  ;;  %v2474_v41 = vadd.f32 %v2473_v63, %v2472_v42  ;;  %v2421_v0 = vadd.f32 %v2420_v43, %v2419_v58 }
 0x268   : > { %v2463_v12 = vadd.f32 %v2462_v40, %v2461_v27  ;;  %v2475_v1 = vrot.slane %v2474_v41, 1  ;;  %v2434_v7 = vadd.f32 %v2433_v10, %v2432_v62 }
 0x26a   : > { %v2478_v4 = vsel %vm2477_vm7, %v2421_v0, %v2463_v12  ;;  %v2476_v60 = vadd.f32 %v2475_v1, %v2474_v41 }
 0x26c   : > { %v2479_v61 = vsel %vm2477_vm7, %v2434_v7, %v2476_v60 }
 0x26d   : > { %v2482_v20 = vcombine.low %v2478_v4, %v2479_v61 }
 0x26f   : > { %2740 = vst.sshfl [vmem:[%s300_s11] sm:$0x33 pattern:$0x76325410] %v2482_v20 }
 0x270 PF: > { %s19_s26 = sadd.s32 1, %s3246_s26  }
 0x271   : > { %p16_p5 = scmp.ge.s32.totalorder %s19_s26, 4  }
 0x273   :  { %18 = sbr.rel (!%p16_p5) target bundleno = 2 (0x2), region = 89 }

</bundles_post_ra>
